<compile_context>
chip_gen: v7x
topology: tpu7x:2x2x1
jax: 0.10.0
libtpu: 0.0.40
codegen_flags: <defaults>
</compile_context>

<pallas_src>
import functools

import jax
import jax.numpy as jnp
from jax.experimental import pallas as pl
from jax.experimental.pallas import tpu as pltpu

IN_CHANNELS = 1
NUM_CLASSES = 2
INIT_CH = 64                  # dscnn_s init_block_channel
INIT_KERNEL = (10, 4)
INIT_STRIDE = (2, 2)          # dscnn_s init_block_stride
STAGE_CH = 64                 # 'shallow' backbone -> channels = [[64]], stride 1
BN_EPS = 1e-5


def get_same_padding(kernel_size):
    """Returns (left, right, top, bottom) like the PyTorch reference (ZeroPad2d order)."""
    kh, kw = kernel_size
    if kh == kw and kh % 2 == 1:
        p = (kh - 1) // 2
        return (p, p, p, p)
    pad = [0, 0, 0, 0]
    if kh % 2 == 1:
        pad[2] = pad[3] = (kh - 1) // 2
    else:
        pad[2], pad[3] = kh // 2 - 1, kh // 2
    if kw % 2 == 1:
        pad[0] = pad[1] = (kw - 1) // 2
    else:
        pad[0], pad[1] = kw // 2 - 1, kw // 2
    return tuple(pad)


def fold_bn(gamma, beta, mean, var):
    scale = gamma / jnp.sqrt(var + BN_EPS)
    bias = beta - mean * scale
    return scale.astype(jnp.float32), bias.astype(jnp.float32)


# ----------------------------- fused Pallas kernel -----------------------------

def _dscnn_fused_kernel(ph_ref, w0_ref, b0_ref, wdw_ref, bdw_ref, wpw_ref, bpw_ref,
                        wfc_ref, bfc_ref, out_ref, ypad_ref, *, kh, kw, Ho, Wo, C):
    """One grid step == one batch element. Everything stays in vregs / VMEM."""
    # ---- init block: Conv(kh,kw), stride (2,2), Cin=1, BN-folded weights, bias + ReLU ----
    # Input arrives pre-split into the 4 stride-2 polyphase planes, so every kernel tap
    # is a contiguous (Ho, Wo) slice (no strided loads inside the kernel).
    phv = ph_ref[...]                                   # (1, 2, 2, nH2, nW2)
    w0 = w0_ref[...]                                    # (kh*kw, C), BN scale folded in
    acc0 = jnp.zeros((Ho, Wo, C), jnp.float32)
    for ky in range(kh):
        qy, py = ky // 2, ky % 2
        for kx in range(kw):
            qx, px = kx // 2, kx % 2
            k = ky * kw + kx
            patch = phv[0, py, px, qy:qy + Ho, qx:qx + Wo]          # (Ho, Wo)
            acc0 = acc0 + patch[:, :, None] * w0[k:k + 1]           # -> (Ho, Wo, C)
    y0 = jnp.maximum(acc0 + b0_ref[...], 0.0)                       # (Ho, Wo, C)

    # ---- depthwise 3x3, stride 1, pad 1 (BN folded) + ReLU; zero-pad in VMEM scratch ----
    ypad_ref[...] = jnp.zeros(ypad_ref.shape, jnp.float32)
    ypad_ref[1:Ho + 1, 1:Wo + 1, :] = y0
    ypad = ypad_ref[...]                                            # (Ho+2, Wo+2, C)
    wdw = wdw_ref[...]                                              # (9, C), row k = dy*3+dx
    acc1 = jnp.zeros((Ho, Wo, C), jnp.float32)
    for dy in range(3):
        for dx in range(3):
            k = dy * 3 + dx
            acc1 = acc1 + ypad[dy:dy + Ho, dx:dx + Wo, :] * wdw[k:k + 1]
    y1 = jnp.maximum(acc1 + bdw_ref[...], 0.0)                      # (Ho, Wo, C)

    # ---- pointwise 1x1 conv (BN folded) + ReLU: MXU matmul over (Ho*Wo, C) ----
    y2 = jnp.dot(y1.reshape(Ho * Wo, C), wpw_ref[...],
                 preferred_element_type=jnp.float32)
    y2 = jnp.maximum(y2 + bpw_ref[...], 0.0)                        # (Ho*Wo, C)

    # ---- Dropout(0.4) == identity at inference; global avg pool + linear_output head ----
    # TODO(synk): train-mode dropout RNG masking not implemented (inference semantics).
    pooled = jnp.mean(y2, axis=0, keepdims=True)                    # (1, C)
    logits = jnp.dot(pooled, wfc_ref[...],
                     preferred_element_type=jnp.float32) + bfc_ref[...]
    out_ref[...] = logits.reshape(1, 1, NUM_CLASSES)


# ------------------------------- model forward ---------------------------------

@jax.jit
def dscnn_forward(x_nchw, params):
    B, cin, H, W = x_nchw.shape
    assert cin == IN_CHANNELS == 1
    kh, kw = INIT_KERNEL
    sh, sw = INIT_STRIDE
    assert (sh, sw) == (2, 2)
    l, r, t, b = get_same_padding(INIT_KERNEL)
    Hp, Wp = H + t + b, W + l + r
    Ho, Wo = (Hp - kh) // sh + 1, (Wp - kw) // sw + 1

    # -- wrapper-side layout prep (tiny, XLA-fused): pad + stride-2 polyphase split --
    x = x_nchw[:, 0].astype(jnp.float32)                             # (B, H, W), Cin = 1
    # pad to even extents; the extra bottom/right zero row/col is never read by any window
    xp = jnp.pad(x, ((0, 0), (t, b + (Hp % 2)), (l, r + (Wp % 2))))
    nH2, nW2 = xp.shape[1] // 2, xp.shape[2] // 2
    phases = xp.reshape(B, nH2, 2, nW2, 2).transpose(0, 2, 4, 1, 3)  # (B, 2, 2, nH2, nW2)
    assert (kh - 1) // 2 + Ho <= nH2 and (kw - 1) // 2 + Wo <= nW2

    # -- fold eval-mode BatchNorm scales into conv weights (one-time weight transform) --
    s0, b0 = fold_bn(*params["bn0"])
    w0 = jnp.transpose(params["w_init"][:, 0], (1, 2, 0)).reshape(kh * kw, INIT_CH) * s0[None, :]
    sdw, bdw = fold_bn(*params["bn_dw"])
    wdw = params["w_dw"].reshape(STAGE_CH, 9).T * sdw[None, :]       # (9, C)
    spw, bpw = fold_bn(*params["bn_pw"])
    wpw = params["w_pw"][:, :, 0, 0].T * spw[None, :]                # (Cin, Cout)
    wfc = params["w_fc"].T                                           # (C, num_classes)
    bfc = params["b_fc"].reshape(1, NUM_CLASSES)

    kernel = functools.partial(_dscnn_fused_kernel, kh=kh, kw=kw, Ho=Ho, Wo=Wo, C=STAGE_CH)
    out = pl.pallas_call(
        kernel,
        out_shape=jax.ShapeDtypeStruct((B, 1, NUM_CLASSES), jnp.float32),
        grid=(B,),
        in_specs=[
            pl.BlockSpec((1, 2, 2, nH2, nW2), lambda i: (i, 0, 0, 0, 0)),
            pl.BlockSpec((kh * kw, INIT_CH), lambda i: (0, 0)),
            pl.BlockSpec((1, INIT_CH), lambda i: (0, 0)),
            pl.BlockSpec((9, STAGE_CH), lambda i: (0, 0)),
            pl.BlockSpec((1, STAGE_CH), lambda i: (0, 0)),
            pl.BlockSpec((INIT_CH, STAGE_CH), lambda i: (0, 0)),
            pl.BlockSpec((1, STAGE_CH), lambda i: (0, 0)),
            pl.BlockSpec((STAGE_CH, NUM_CLASSES), lambda i: (0, 0)),
            pl.BlockSpec((1, NUM_CLASSES), lambda i: (0, 0)),
        ],
        out_specs=pl.BlockSpec((1, 1, NUM_CLASSES), lambda i: (i, 0, 0)),
        scratch_shapes=[pltpu.VMEM((Ho + 2, Wo + 2, STAGE_CH), jnp.float32)],
        compiler_params=pltpu.CompilerParams(
            dimension_semantics=("parallel",)),   # batch sharded over v7x's 2 TCs
    )(phases, w0, b0.reshape(1, INIT_CH), wdw, bdw.reshape(1, STAGE_CH),
      wpw, bpw.reshape(1, STAGE_CH), wfc, bfc)
    return out.reshape(B, NUM_CLASSES)


# ----------------------------- pure-JAX reference -------------------------------

def reference_forward(x_nchw, params):
    hp = jax.lax.Precision.HIGHEST

    def bn(y, gamma, beta, mean, var):
        g = gamma[None, :, None, None]
        bta = beta[None, :, None, None]
        m = mean[None, :, None, None]
        v = var[None, :, None, None]
        return (y - m) / jnp.sqrt(v + BN_EPS) * g + bta

    l, r, t, bo = get_same_padding(INIT_KERNEL)
    xp = jnp.pad(x_nchw, ((0, 0), (0, 0), (t, bo), (l, r)))
    y = jax.lax.conv_general_dilated(xp, params["w_init"], INIT_STRIDE, "VALID",
                                     dimension_numbers=("NCHW", "OIHW", "NCHW"),
                                     precision=hp)
    y = jax.nn.relu(bn(y, *params["bn0"]))
    y = jax.lax.conv_general_dilated(y, params["w_dw"], (1, 1), ((1, 1), (1, 1)),
                                     dimension_numbers=("NCHW", "OIHW", "NCHW"),
                                     feature_group_count=STAGE_CH, precision=hp)
    y = jax.nn.relu(bn(y, *params["bn_dw"]))
    y = jax.lax.conv_general_dilated(y, params["w_pw"], (1, 1), "VALID",
                                     dimension_numbers=("NCHW", "OIHW", "NCHW"),
                                     precision=hp)
    y = jax.nn.relu(bn(y, *params["bn_pw"]))
    pooled = jnp.mean(y, axis=(2, 3))
    return jnp.dot(pooled, params["w_fc"].T, precision=hp) + params["b_fc"]


# ------------------------ deterministic parameter init --------------------------

def init_params(key):
    k1, k2, k3, k4 = jax.random.split(key, 4)
    kh, kw = INIT_KERNEL
    # kaiming-style scaling (fan_out for init/pw/fc, fan_in for dw), as in _init_params
    w_init = jax.random.normal(k1, (INIT_CH, IN_CHANNELS, kh, kw), jnp.float32) * jnp.sqrt(2.0 / (INIT_CH * kh * kw))
    w_dw = jax.random.normal(k2, (STAGE_CH, 1, 3, 3), jnp.float32) * jnp.sqrt(2.0 / 9.0)
    w_pw = jax.random.normal(k3, (STAGE_CH, INIT_CH, 1, 1), jnp.float32) * jnp.sqrt(2.0 / STAGE_CH)
    w_fc = jax.random.normal(k4, (NUM_CLASSES, STAGE_CH), jnp.float32) * jnp.sqrt(2.0 / NUM_CLASSES)
    b_fc = jnp.zeros((NUM_CLASSES,), jnp.float32)
    # BatchNorm (eval mode): weight=1, bias=0, running_mean=0, running_var=1 (PyTorch init)
    bn = lambda c: (jnp.ones((c,), jnp.float32), jnp.zeros((c,), jnp.float32),
                    jnp.zeros((c,), jnp.float32), jnp.ones((c,), jnp.float32))
    return dict(w_init=w_init, bn0=bn(INIT_CH),
                w_dw=w_dw, bn_dw=bn(STAGE_CH),
                w_pw=w_pw, bn_pw=bn(STAGE_CH),
                w_fc=w_fc, b_fc=b_fc)


if __name__ == "__main__":
    key = jax.random.PRNGKey(0)
    kx, kp = jax.random.split(key)
    x = jax.random.normal(kx, (2, IN_CHANNELS, 16, 16), jnp.float32)  # NCHW, like PyTorch
    params = init_params(kp)

    out = jax.block_until_ready(dscnn_forward(x, params))
    assert out.shape == (2, NUM_CLASSES), out.shape

    ref = jax.block_until_ready(reference_forward(x, params))
    assert jnp.allclose(out, ref, atol=1e-3, rtol=1e-3), (out, ref)

    print("KERNEL_OK")
</pallas_src>

<mosaic_0001>
module attributes {stable_mosaic.version = 11 : i64} {
  func.func @_dscnn_fused_kernel(%arg0: i32, %arg1: memref<1x2x2x13x10xf32, #tpu.memory_space<vmem>>, %arg2: memref<40x64xf32, #tpu.memory_space<vmem>>, %arg3: memref<1x64xf32, #tpu.memory_space<vmem>>, %arg4: memref<9x64xf32, #tpu.memory_space<vmem>>, %arg5: memref<1x64xf32, #tpu.memory_space<vmem>>, %arg6: memref<64x64xf32, #tpu.memory_space<vmem>>, %arg7: memref<1x64xf32, #tpu.memory_space<vmem>>, %arg8: memref<64x2xf32, #tpu.memory_space<vmem>>, %arg9: memref<1x2xf32, #tpu.memory_space<vmem>>, %arg10: memref<1x1x2xf32, #tpu.memory_space<vmem>>, %arg11: memref<10x10x64xf32, #tpu.memory_space<vmem>>) attributes {dimension_semantics = [#tpu.dimension_semantics<parallel>], iteration_bounds = array<i64: 2>, scalar_prefetch = 0 : i64, scratch_operands = 1 : i64, tpu.core_type = #tpu.core_type<tc>, window_params = [{transform_indices = @transform_0, window_bounds = array<i64: 1, 2, 2, 13, 10>}, {pipeline_mode = #tpu.pipeline_mode<synchronous>, transform_indices = @transform_1, window_bounds = array<i64: 40, 64>}, {pipeline_mode = #tpu.pipeline_mode<synchronous>, transform_indices = @transform_2, window_bounds = array<i64: 1, 64>}, {pipeline_mode = #tpu.pipeline_mode<synchronous>, transform_indices = @transform_3, window_bounds = array<i64: 9, 64>}, {pipeline_mode = #tpu.pipeline_mode<synchronous>, transform_indices = @transform_4, window_bounds = array<i64: 1, 64>}, {pipeline_mode = #tpu.pipeline_mode<synchronous>, transform_indices = @transform_5, window_bounds = array<i64: 64, 64>}, {pipeline_mode = #tpu.pipeline_mode<synchronous>, transform_indices = @transform_6, window_bounds = array<i64: 1, 64>}, {pipeline_mode = #tpu.pipeline_mode<synchronous>, transform_indices = @transform_7, window_bounds = array<i64: 64, 2>}, {pipeline_mode = #tpu.pipeline_mode<synchronous>, transform_indices = @transform_8, window_bounds = array<i64: 1, 2>}, {transform_indices = @transform_9, window_bounds = array<i64: 1, 1, 2>}]} {
    %c0 = arith.constant 0 : index
    %c0_0 = arith.constant 0 : index
    %c0_1 = arith.constant 0 : index
    %c0_2 = arith.constant 0 : index
    %c0_3 = arith.constant 0 : index
    %0 = vector.load %arg1[%c0, %c0_0, %c0_1, %c0_2, %c0_3] : memref<1x2x2x13x10xf32, #tpu.memory_space<vmem>>, vector<1x2x2x13x10xf32>
    %c0_4 = arith.constant 0 : index
    %c0_5 = arith.constant 0 : index
    %1 = vector.load %arg2[%c0_4, %c0_5] : memref<40x64xf32, #tpu.memory_space<vmem>>, vector<40x64xf32>
    %cst = arith.constant 0.000000e+00 : f32
    %2 = vector.broadcast %cst : f32 to vector<8x8x64xf32>
    %3 = vector.extract_strided_slice %0 {offsets = [0, 0, 0, 0, 0], sizes = [1, 1, 1, 8, 8], strides = [1, 1, 1, 1, 1]} : vector<1x2x2x13x10xf32> to vector<1x1x1x8x8xf32>
    %4 = vector.shape_cast %3 : vector<1x1x1x8x8xf32> to vector<8x8xf32>
    %5 = vector.shape_cast %4 : vector<8x8xf32> to vector<8x8x1xf32>
    %6 = vector.extract_strided_slice %1 {offsets = [0, 0], sizes = [1, 64], strides = [1, 1]} : vector<40x64xf32> to vector<1x64xf32>
    %7 = vector.shape_cast %6 : vector<1x64xf32> to vector<1x1x64xf32>
    %8 = vector.broadcast %5 : vector<8x8x1xf32> to vector<8x8x64xf32>
    %9 = vector.broadcast %7 : vector<1x1x64xf32> to vector<8x8x64xf32>
    %10 = arith.mulf %8, %9 : vector<8x8x64xf32>
    %11 = arith.addf %2, %10 : vector<8x8x64xf32>
    %12 = vector.extract_strided_slice %0 {offsets = [0, 0, 1, 0, 0], sizes = [1, 1, 1, 8, 8], strides = [1, 1, 1, 1, 1]} : vector<1x2x2x13x10xf32> to vector<1x1x1x8x8xf32>
    %13 = vector.shape_cast %12 : vector<1x1x1x8x8xf32> to vector<8x8xf32>
    %14 = vector.shape_cast %13 : vector<8x8xf32> to vector<8x8x1xf32>
    %15 = vector.extract_strided_slice %1 {offsets = [1, 0], sizes = [1, 64], strides = [1, 1]} : vector<40x64xf32> to vector<1x64xf32>
    %16 = vector.shape_cast %15 : vector<1x64xf32> to vector<1x1x64xf32>
    %17 = vector.broadcast %14 : vector<8x8x1xf32> to vector<8x8x64xf32>
    %18 = vector.broadcast %16 : vector<1x1x64xf32> to vector<8x8x64xf32>
    %19 = arith.mulf %17, %18 : vector<8x8x64xf32>
    %20 = arith.addf %11, %19 : vector<8x8x64xf32>
    %21 = vector.extract_strided_slice %0 {offsets = [0, 0, 0, 0, 1], sizes = [1, 1, 1, 8, 8], strides = [1, 1, 1, 1, 1]} : vector<1x2x2x13x10xf32> to vector<1x1x1x8x8xf32>
    %22 = vector.shape_cast %21 : vector<1x1x1x8x8xf32> to vector<8x8xf32>
    %23 = vector.shape_cast %22 : vector<8x8xf32> to vector<8x8x1xf32>
    %24 = vector.extract_strided_slice %1 {offsets = [2, 0], sizes = [1, 64], strides = [1, 1]} : vector<40x64xf32> to vector<1x64xf32>
    %25 = vector.shape_cast %24 : vector<1x64xf32> to vector<1x1x64xf32>
    %26 = vector.broadcast %23 : vector<8x8x1xf32> to vector<8x8x64xf32>
    %27 = vector.broadcast %25 : vector<1x1x64xf32> to vector<8x8x64xf32>
    %28 = arith.mulf %26, %27 : vector<8x8x64xf32>
    %29 = arith.addf %20, %28 : vector<8x8x64xf32>
    %30 = vector.extract_strided_slice %0 {offsets = [0, 0, 1, 0, 1], sizes = [1, 1, 1, 8, 8], strides = [1, 1, 1, 1, 1]} : vector<1x2x2x13x10xf32> to vector<1x1x1x8x8xf32>
    %31 = vector.shape_cast %30 : vector<1x1x1x8x8xf32> to vector<8x8xf32>
    %32 = vector.shape_cast %31 : vector<8x8xf32> to vector<8x8x1xf32>
    %33 = vector.extract_strided_slice %1 {offsets = [3, 0], sizes = [1, 64], strides = [1, 1]} : vector<40x64xf32> to vector<1x64xf32>
    %34 = vector.shape_cast %33 : vector<1x64xf32> to vector<1x1x64xf32>
    %35 = vector.broadcast %32 : vector<8x8x1xf32> to vector<8x8x64xf32>
    %36 = vector.broadcast %34 : vector<1x1x64xf32> to vector<8x8x64xf32>
    %37 = arith.mulf %35, %36 : vector<8x8x64xf32>
    %38 = arith.addf %29, %37 : vector<8x8x64xf32>
    %39 = vector.extract_strided_slice %0 {offsets = [0, 1, 0, 0, 0], sizes = [1, 1, 1, 8, 8], strides = [1, 1, 1, 1, 1]} : vector<1x2x2x13x10xf32> to vector<1x1x1x8x8xf32>
    %40 = vector.shape_cast %39 : vector<1x1x1x8x8xf32> to vector<8x8xf32>
    %41 = vector.shape_cast %40 : vector<8x8xf32> to vector<8x8x1xf32>
    %42 = vector.extract_strided_slice %1 {offsets = [4, 0], sizes = [1, 64], strides = [1, 1]} : vector<40x64xf32> to vector<1x64xf32>
    %43 = vector.shape_cast %42 : vector<1x64xf32> to vector<1x1x64xf32>
    %44 = vector.broadcast %41 : vector<8x8x1xf32> to vector<8x8x64xf32>
    %45 = vector.broadcast %43 : vector<1x1x64xf32> to vector<8x8x64xf32>
    %46 = arith.mulf %44, %45 : vector<8x8x64xf32>
    %47 = arith.addf %38, %46 : vector<8x8x64xf32>
    %48 = vector.extract_strided_slice %0 {offsets = [0, 1, 1, 0, 0], sizes = [1, 1, 1, 8, 8], strides = [1, 1, 1, 1, 1]} : vector<1x2x2x13x10xf32> to vector<1x1x1x8x8xf32>
    %49 = vector.shape_cast %48 : vector<1x1x1x8x8xf32> to vector<8x8xf32>
    %50 = vector.shape_cast %49 : vector<8x8xf32> to vector<8x8x1xf32>
    %51 = vector.extract_strided_slice %1 {offsets = [5, 0], sizes = [1, 64], strides = [1, 1]} : vector<40x64xf32> to vector<1x64xf32>
    %52 = vector.shape_cast %51 : vector<1x64xf32> to vector<1x1x64xf32>
    %53 = vector.broadcast %50 : vector<8x8x1xf32> to vector<8x8x64xf32>
    %54 = vector.broadcast %52 : vector<1x1x64xf32> to vector<8x8x64xf32>
    %55 = arith.mulf %53, %54 : vector<8x8x64xf32>
    %56 = arith.addf %47, %55 : vector<8x8x64xf32>
    %57 = vector.extract_strided_slice %0 {offsets = [0, 1, 0, 0, 1], sizes = [1, 1, 1, 8, 8], strides = [1, 1, 1, 1, 1]} : vector<1x2x2x13x10xf32> to vector<1x1x1x8x8xf32>
    %58 = vector.shape_cast %57 : vector<1x1x1x8x8xf32> to vector<8x8xf32>
    %59 = vector.shape_cast %58 : vector<8x8xf32> to vector<8x8x1xf32>
    %60 = vector.extract_strided_slice %1 {offsets = [6, 0], sizes = [1, 64], strides = [1, 1]} : vector<40x64xf32> to vector<1x64xf32>
    %61 = vector.shape_cast %60 : vector<1x64xf32> to vector<1x1x64xf32>
    %62 = vector.broadcast %59 : vector<8x8x1xf32> to vector<8x8x64xf32>
    %63 = vector.broadcast %61 : vector<1x1x64xf32> to vector<8x8x64xf32>
    %64 = arith.mulf %62, %63 : vector<8x8x64xf32>
    %65 = arith.addf %56, %64 : vector<8x8x64xf32>
    %66 = vector.extract_strided_slice %0 {offsets = [0, 1, 1, 0, 1], sizes = [1, 1, 1, 8, 8], strides = [1, 1, 1, 1, 1]} : vector<1x2x2x13x10xf32> to vector<1x1x1x8x8xf32>
    %67 = vector.shape_cast %66 : vector<1x1x1x8x8xf32> to vector<8x8xf32>
    %68 = vector.shape_cast %67 : vector<8x8xf32> to vector<8x8x1xf32>
    %69 = vector.extract_strided_slice %1 {offsets = [7, 0], sizes = [1, 64], strides = [1, 1]} : vector<40x64xf32> to vector<1x64xf32>
    %70 = vector.shape_cast %69 : vector<1x64xf32> to vector<1x1x64xf32>
    %71 = vector.broadcast %68 : vector<8x8x1xf32> to vector<8x8x64xf32>
    %72 = vector.broadcast %70 : vector<1x1x64xf32> to vector<8x8x64xf32>
    %73 = arith.mulf %71, %72 : vector<8x8x64xf32>
    %74 = arith.addf %65, %73 : vector<8x8x64xf32>
    %75 = vector.extract_strided_slice %0 {offsets = [0, 0, 0, 1, 0], sizes = [1, 1, 1, 8, 8], strides = [1, 1, 1, 1, 1]} : vector<1x2x2x13x10xf32> to vector<1x1x1x8x8xf32>
    %76 = vector.shape_cast %75 : vector<1x1x1x8x8xf32> to vector<8x8xf32>
    %77 = vector.shape_cast %76 : vector<8x8xf32> to vector<8x8x1xf32>
    %78 = vector.extract_strided_slice %1 {offsets = [8, 0], sizes = [1, 64], strides = [1, 1]} : vector<40x64xf32> to vector<1x64xf32>
    %79 = vector.shape_cast %78 : vector<1x64xf32> to vector<1x1x64xf32>
    %80 = vector.broadcast %77 : vector<8x8x1xf32> to vector<8x8x64xf32>
    %81 = vector.broadcast %79 : vector<1x1x64xf32> to vector<8x8x64xf32>
    %82 = arith.mulf %80, %81 : vector<8x8x64xf32>
    %83 = arith.addf %74, %82 : vector<8x8x64xf32>
    %84 = vector.extract_strided_slice %0 {offsets = [0, 0, 1, 1, 0], sizes = [1, 1, 1, 8, 8], strides = [1, 1, 1, 1, 1]} : vector<1x2x2x13x10xf32> to vector<1x1x1x8x8xf32>
    %85 = vector.shape_cast %84 : vector<1x1x1x8x8xf32> to vector<8x8xf32>
    %86 = vector.shape_cast %85 : vector<8x8xf32> to vector<8x8x1xf32>
    %87 = vector.extract_strided_slice %1 {offsets = [9, 0], sizes = [1, 64], strides = [1, 1]} : vector<40x64xf32> to vector<1x64xf32>
    %88 = vector.shape_cast %87 : vector<1x64xf32> to vector<1x1x64xf32>
    %89 = vector.broadcast %86 : vector<8x8x1xf32> to vector<8x8x64xf32>
    %90 = vector.broadcast %88 : vector<1x1x64xf32> to vector<8x8x64xf32>
    %91 = arith.mulf %89, %90 : vector<8x8x64xf32>
    %92 = arith.addf %83, %91 : vector<8x8x64xf32>
    %93 = vector.extract_strided_slice %0 {offsets = [0, 0, 0, 1, 1], sizes = [1, 1, 1, 8, 8], strides = [1, 1, 1, 1, 1]} : vector<1x2x2x13x10xf32> to vector<1x1x1x8x8xf32>
    %94 = vector.shape_cast %93 : vector<1x1x1x8x8xf32> to vector<8x8xf32>
    %95 = vector.shape_cast %94 : vector<8x8xf32> to vector<8x8x1xf32>
    %96 = vector.extract_strided_slice %1 {offsets = [10, 0], sizes = [1, 64], strides = [1, 1]} : vector<40x64xf32> to vector<1x64xf32>
    %97 = vector.shape_cast %96 : vector<1x64xf32> to vector<1x1x64xf32>
    %98 = vector.broadcast %95 : vector<8x8x1xf32> to vector<8x8x64xf32>
    %99 = vector.broadcast %97 : vector<1x1x64xf32> to vector<8x8x64xf32>
    %100 = arith.mulf %98, %99 : vector<8x8x64xf32>
    %101 = arith.addf %92, %100 : vector<8x8x64xf32>
    %102 = vector.extract_strided_slice %0 {offsets = [0, 0, 1, 1, 1], sizes = [1, 1, 1, 8, 8], strides = [1, 1, 1, 1, 1]} : vector<1x2x2x13x10xf32> to vector<1x1x1x8x8xf32>
    %103 = vector.shape_cast %102 : vector<1x1x1x8x8xf32> to vector<8x8xf32>
    %104 = vector.shape_cast %103 : vector<8x8xf32> to vector<8x8x1xf32>
    %105 = vector.extract_strided_slice %1 {offsets = [11, 0], sizes = [1, 64], strides = [1, 1]} : vector<40x64xf32> to vector<1x64xf32>
    %106 = vector.shape_cast %105 : vector<1x64xf32> to vector<1x1x64xf32>
    %107 = vector.broadcast %104 : vector<8x8x1xf32> to vector<8x8x64xf32>
    %108 = vector.broadcast %106 : vector<1x1x64xf32> to vector<8x8x64xf32>
    %109 = arith.mulf %107, %108 : vector<8x8x64xf32>
    %110 = arith.addf %101, %109 : vector<8x8x64xf32>
    %111 = vector.extract_strided_slice %0 {offsets = [0, 1, 0, 1, 0], sizes = [1, 1, 1, 8, 8], strides = [1, 1, 1, 1, 1]} : vector<1x2x2x13x10xf32> to vector<1x1x1x8x8xf32>
    %112 = vector.shape_cast %111 : vector<1x1x1x8x8xf32> to vector<8x8xf32>
    %113 = vector.shape_cast %112 : vector<8x8xf32> to vector<8x8x1xf32>
    %114 = vector.extract_strided_slice %1 {offsets = [12, 0], sizes = [1, 64], strides = [1, 1]} : vector<40x64xf32> to vector<1x64xf32>
    %115 = vector.shape_cast %114 : vector<1x64xf32> to vector<1x1x64xf32>
    %116 = vector.broadcast %113 : vector<8x8x1xf32> to vector<8x8x64xf32>
    %117 = vector.broadcast %115 : vector<1x1x64xf32> to vector<8x8x64xf32>
    %118 = arith.mulf %116, %117 : vector<8x8x64xf32>
    %119 = arith.addf %110, %118 : vector<8x8x64xf32>
    %120 = vector.extract_strided_slice %0 {offsets = [0, 1, 1, 1, 0], sizes = [1, 1, 1, 8, 8], strides = [1, 1, 1, 1, 1]} : vector<1x2x2x13x10xf32> to vector<1x1x1x8x8xf32>
    %121 = vector.shape_cast %120 : vector<1x1x1x8x8xf32> to vector<8x8xf32>
    %122 = vector.shape_cast %121 : vector<8x8xf32> to vector<8x8x1xf32>
    %123 = vector.extract_strided_slice %1 {offsets = [13, 0], sizes = [1, 64], strides = [1, 1]} : vector<40x64xf32> to vector<1x64xf32>
    %124 = vector.shape_cast %123 : vector<1x64xf32> to vector<1x1x64xf32>
    %125 = vector.broadcast %122 : vector<8x8x1xf32> to vector<8x8x64xf32>
    %126 = vector.broadcast %124 : vector<1x1x64xf32> to vector<8x8x64xf32>
    %127 = arith.mulf %125, %126 : vector<8x8x64xf32>
    %128 = arith.addf %119, %127 : vector<8x8x64xf32>
    %129 = vector.extract_strided_slice %0 {offsets = [0, 1, 0, 1, 1], sizes = [1, 1, 1, 8, 8], strides = [1, 1, 1, 1, 1]} : vector<1x2x2x13x10xf32> to vector<1x1x1x8x8xf32>
    %130 = vector.shape_cast %129 : vector<1x1x1x8x8xf32> to vector<8x8xf32>
    %131 = vector.shape_cast %130 : vector<8x8xf32> to vector<8x8x1xf32>
    %132 = vector.extract_strided_slice %1 {offsets = [14, 0], sizes = [1, 64], strides = [1, 1]} : vector<40x64xf32> to vector<1x64xf32>
    %133 = vector.shape_cast %132 : vector<1x64xf32> to vector<1x1x64xf32>
    %134 = vector.broadcast %131 : vector<8x8x1xf32> to vector<8x8x64xf32>
    %135 = vector.broadcast %133 : vector<1x1x64xf32> to vector<8x8x64xf32>
    %136 = arith.mulf %134, %135 : vector<8x8x64xf32>
    %137 = arith.addf %128, %136 : vector<8x8x64xf32>
    %138 = vector.extract_strided_slice %0 {offsets = [0, 1, 1, 1, 1], sizes = [1, 1, 1, 8, 8], strides = [1, 1, 1, 1, 1]} : vector<1x2x2x13x10xf32> to vector<1x1x1x8x8xf32>
    %139 = vector.shape_cast %138 : vector<1x1x1x8x8xf32> to vector<8x8xf32>
    %140 = vector.shape_cast %139 : vector<8x8xf32> to vector<8x8x1xf32>
    %141 = vector.extract_strided_slice %1 {offsets = [15, 0], sizes = [1, 64], strides = [1, 1]} : vector<40x64xf32> to vector<1x64xf32>
    %142 = vector.shape_cast %141 : vector<1x64xf32> to vector<1x1x64xf32>
    %143 = vector.broadcast %140 : vector<8x8x1xf32> to vector<8x8x64xf32>
    %144 = vector.broadcast %142 : vector<1x1x64xf32> to vector<8x8x64xf32>
    %145 = arith.mulf %143, %144 : vector<8x8x64xf32>
    %146 = arith.addf %137, %145 : vector<8x8x64xf32>
    %147 = vector.extract_strided_slice %0 {offsets = [0, 0, 0, 2, 0], sizes = [1, 1, 1, 8, 8], strides = [1, 1, 1, 1, 1]} : vector<1x2x2x13x10xf32> to vector<1x1x1x8x8xf32>
    %148 = vector.shape_cast %147 : vector<1x1x1x8x8xf32> to vector<8x8xf32>
    %149 = vector.shape_cast %148 : vector<8x8xf32> to vector<8x8x1xf32>
    %150 = vector.extract_strided_slice %1 {offsets = [16, 0], sizes = [1, 64], strides = [1, 1]} : vector<40x64xf32> to vector<1x64xf32>
    %151 = vector.shape_cast %150 : vector<1x64xf32> to vector<1x1x64xf32>
    %152 = vector.broadcast %149 : vector<8x8x1xf32> to vector<8x8x64xf32>
    %153 = vector.broadcast %151 : vector<1x1x64xf32> to vector<8x8x64xf32>
    %154 = arith.mulf %152, %153 : vector<8x8x64xf32>
    %155 = arith.addf %146, %154 : vector<8x8x64xf32>
    %156 = vector.extract_strided_slice %0 {offsets = [0, 0, 1, 2, 0], sizes = [1, 1, 1, 8, 8], strides = [1, 1, 1, 1, 1]} : vector<1x2x2x13x10xf32> to vector<1x1x1x8x8xf32>
    %157 = vector.shape_cast %156 : vector<1x1x1x8x8xf32> to vector<8x8xf32>
    %158 = vector.shape_cast %157 : vector<8x8xf32> to vector<8x8x1xf32>
    %159 = vector.extract_strided_slice %1 {offsets = [17, 0], sizes = [1, 64], strides = [1, 1]} : vector<40x64xf32> to vector<1x64xf32>
    %160 = vector.shape_cast %159 : vector<1x64xf32> to vector<1x1x64xf32>
    %161 = vector.broadcast %158 : vector<8x8x1xf32> to vector<8x8x64xf32>
    %162 = vector.broadcast %160 : vector<1x1x64xf32> to vector<8x8x64xf32>
    %163 = arith.mulf %161, %162 : vector<8x8x64xf32>
    %164 = arith.addf %155, %163 : vector<8x8x64xf32>
    %165 = vector.extract_strided_slice %0 {offsets = [0, 0, 0, 2, 1], sizes = [1, 1, 1, 8, 8], strides = [1, 1, 1, 1, 1]} : vector<1x2x2x13x10xf32> to vector<1x1x1x8x8xf32>
    %166 = vector.shape_cast %165 : vector<1x1x1x8x8xf32> to vector<8x8xf32>
    %167 = vector.shape_cast %166 : vector<8x8xf32> to vector<8x8x1xf32>
    %168 = vector.extract_strided_slice %1 {offsets = [18, 0], sizes = [1, 64], strides = [1, 1]} : vector<40x64xf32> to vector<1x64xf32>
    %169 = vector.shape_cast %168 : vector<1x64xf32> to vector<1x1x64xf32>
    %170 = vector.broadcast %167 : vector<8x8x1xf32> to vector<8x8x64xf32>
    %171 = vector.broadcast %169 : vector<1x1x64xf32> to vector<8x8x64xf32>
    %172 = arith.mulf %170, %171 : vector<8x8x64xf32>
    %173 = arith.addf %164, %172 : vector<8x8x64xf32>
    %174 = vector.extract_strided_slice %0 {offsets = [0, 0, 1, 2, 1], sizes = [1, 1, 1, 8, 8], strides = [1, 1, 1, 1, 1]} : vector<1x2x2x13x10xf32> to vector<1x1x1x8x8xf32>
    %175 = vector.shape_cast %174 : vector<1x1x1x8x8xf32> to vector<8x8xf32>
    %176 = vector.shape_cast %175 : vector<8x8xf32> to vector<8x8x1xf32>
    %177 = vector.extract_strided_slice %1 {offsets = [19, 0], sizes = [1, 64], strides = [1, 1]} : vector<40x64xf32> to vector<1x64xf32>
    %178 = vector.shape_cast %177 : vector<1x64xf32> to vector<1x1x64xf32>
    %179 = vector.broadcast %176 : vector<8x8x1xf32> to vector<8x8x64xf32>
    %180 = vector.broadcast %178 : vector<1x1x64xf32> to vector<8x8x64xf32>
    %181 = arith.mulf %179, %180 : vector<8x8x64xf32>
    %182 = arith.addf %173, %181 : vector<8x8x64xf32>
    %183 = vector.extract_strided_slice %0 {offsets = [0, 1, 0, 2, 0], sizes = [1, 1, 1, 8, 8], strides = [1, 1, 1, 1, 1]} : vector<1x2x2x13x10xf32> to vector<1x1x1x8x8xf32>
    %184 = vector.shape_cast %183 : vector<1x1x1x8x8xf32> to vector<8x8xf32>
    %185 = vector.shape_cast %184 : vector<8x8xf32> to vector<8x8x1xf32>
    %186 = vector.extract_strided_slice %1 {offsets = [20, 0], sizes = [1, 64], strides = [1, 1]} : vector<40x64xf32> to vector<1x64xf32>
    %187 = vector.shape_cast %186 : vector<1x64xf32> to vector<1x1x64xf32>
    %188 = vector.broadcast %185 : vector<8x8x1xf32> to vector<8x8x64xf32>
    %189 = vector.broadcast %187 : vector<1x1x64xf32> to vector<8x8x64xf32>
    %190 = arith.mulf %188, %189 : vector<8x8x64xf32>
    %191 = arith.addf %182, %190 : vector<8x8x64xf32>
    %192 = vector.extract_strided_slice %0 {offsets = [0, 1, 1, 2, 0], sizes = [1, 1, 1, 8, 8], strides = [1, 1, 1, 1, 1]} : vector<1x2x2x13x10xf32> to vector<1x1x1x8x8xf32>
    %193 = vector.shape_cast %192 : vector<1x1x1x8x8xf32> to vector<8x8xf32>
    %194 = vector.shape_cast %193 : vector<8x8xf32> to vector<8x8x1xf32>
    %195 = vector.extract_strided_slice %1 {offsets = [21, 0], sizes = [1, 64], strides = [1, 1]} : vector<40x64xf32> to vector<1x64xf32>
    %196 = vector.shape_cast %195 : vector<1x64xf32> to vector<1x1x64xf32>
    %197 = vector.broadcast %194 : vector<8x8x1xf32> to vector<8x8x64xf32>
    %198 = vector.broadcast %196 : vector<1x1x64xf32> to vector<8x8x64xf32>
    %199 = arith.mulf %197, %198 : vector<8x8x64xf32>
    %200 = arith.addf %191, %199 : vector<8x8x64xf32>
    %201 = vector.extract_strided_slice %0 {offsets = [0, 1, 0, 2, 1], sizes = [1, 1, 1, 8, 8], strides = [1, 1, 1, 1, 1]} : vector<1x2x2x13x10xf32> to vector<1x1x1x8x8xf32>
    %202 = vector.shape_cast %201 : vector<1x1x1x8x8xf32> to vector<8x8xf32>
    %203 = vector.shape_cast %202 : vector<8x8xf32> to vector<8x8x1xf32>
    %204 = vector.extract_strided_slice %1 {offsets = [22, 0], sizes = [1, 64], strides = [1, 1]} : vector<40x64xf32> to vector<1x64xf32>
    %205 = vector.shape_cast %204 : vector<1x64xf32> to vector<1x1x64xf32>
    %206 = vector.broadcast %203 : vector<8x8x1xf32> to vector<8x8x64xf32>
    %207 = vector.broadcast %205 : vector<1x1x64xf32> to vector<8x8x64xf32>
    %208 = arith.mulf %206, %207 : vector<8x8x64xf32>
    %209 = arith.addf %200, %208 : vector<8x8x64xf32>
    %210 = vector.extract_strided_slice %0 {offsets = [0, 1, 1, 2, 1], sizes = [1, 1, 1, 8, 8], strides = [1, 1, 1, 1, 1]} : vector<1x2x2x13x10xf32> to vector<1x1x1x8x8xf32>
    %211 = vector.shape_cast %210 : vector<1x1x1x8x8xf32> to vector<8x8xf32>
    %212 = vector.shape_cast %211 : vector<8x8xf32> to vector<8x8x1xf32>
    %213 = vector.extract_strided_slice %1 {offsets = [23, 0], sizes = [1, 64], strides = [1, 1]} : vector<40x64xf32> to vector<1x64xf32>
    %214 = vector.shape_cast %213 : vector<1x64xf32> to vector<1x1x64xf32>
    %215 = vector.broadcast %212 : vector<8x8x1xf32> to vector<8x8x64xf32>
    %216 = vector.broadcast %214 : vector<1x1x64xf32> to vector<8x8x64xf32>
    %217 = arith.mulf %215, %216 : vector<8x8x64xf32>
    %218 = arith.addf %209, %217 : vector<8x8x64xf32>
    %219 = vector.extract_strided_slice %0 {offsets = [0, 0, 0, 3, 0], sizes = [1, 1, 1, 8, 8], strides = [1, 1, 1, 1, 1]} : vector<1x2x2x13x10xf32> to vector<1x1x1x8x8xf32>
    %220 = vector.shape_cast %219 : vector<1x1x1x8x8xf32> to vector<8x8xf32>
    %221 = vector.shape_cast %220 : vector<8x8xf32> to vector<8x8x1xf32>
    %222 = vector.extract_strided_slice %1 {offsets = [24, 0], sizes = [1, 64], strides = [1, 1]} : vector<40x64xf32> to vector<1x64xf32>
    %223 = vector.shape_cast %222 : vector<1x64xf32> to vector<1x1x64xf32>
    %224 = vector.broadcast %221 : vector<8x8x1xf32> to vector<8x8x64xf32>
    %225 = vector.broadcast %223 : vector<1x1x64xf32> to vector<8x8x64xf32>
    %226 = arith.mulf %224, %225 : vector<8x8x64xf32>
    %227 = arith.addf %218, %226 : vector<8x8x64xf32>
    %228 = vector.extract_strided_slice %0 {offsets = [0, 0, 1, 3, 0], sizes = [1, 1, 1, 8, 8], strides = [1, 1, 1, 1, 1]} : vector<1x2x2x13x10xf32> to vector<1x1x1x8x8xf32>
    %229 = vector.shape_cast %228 : vector<1x1x1x8x8xf32> to vector<8x8xf32>
    %230 = vector.shape_cast %229 : vector<8x8xf32> to vector<8x8x1xf32>
    %231 = vector.extract_strided_slice %1 {offsets = [25, 0], sizes = [1, 64], strides = [1, 1]} : vector<40x64xf32> to vector<1x64xf32>
    %232 = vector.shape_cast %231 : vector<1x64xf32> to vector<1x1x64xf32>
    %233 = vector.broadcast %230 : vector<8x8x1xf32> to vector<8x8x64xf32>
    %234 = vector.broadcast %232 : vector<1x1x64xf32> to vector<8x8x64xf32>
    %235 = arith.mulf %233, %234 : vector<8x8x64xf32>
    %236 = arith.addf %227, %235 : vector<8x8x64xf32>
    %237 = vector.extract_strided_slice %0 {offsets = [0, 0, 0, 3, 1], sizes = [1, 1, 1, 8, 8], strides = [1, 1, 1, 1, 1]} : vector<1x2x2x13x10xf32> to vector<1x1x1x8x8xf32>
    %238 = vector.shape_cast %237 : vector<1x1x1x8x8xf32> to vector<8x8xf32>
    %239 = vector.shape_cast %238 : vector<8x8xf32> to vector<8x8x1xf32>
    %240 = vector.extract_strided_slice %1 {offsets = [26, 0], sizes = [1, 64], strides = [1, 1]} : vector<40x64xf32> to vector<1x64xf32>
    %241 = vector.shape_cast %240 : vector<1x64xf32> to vector<1x1x64xf32>
    %242 = vector.broadcast %239 : vector<8x8x1xf32> to vector<8x8x64xf32>
    %243 = vector.broadcast %241 : vector<1x1x64xf32> to vector<8x8x64xf32>
    %244 = arith.mulf %242, %243 : vector<8x8x64xf32>
    %245 = arith.addf %236, %244 : vector<8x8x64xf32>
    %246 = vector.extract_strided_slice %0 {offsets = [0, 0, 1, 3, 1], sizes = [1, 1, 1, 8, 8], strides = [1, 1, 1, 1, 1]} : vector<1x2x2x13x10xf32> to vector<1x1x1x8x8xf32>
    %247 = vector.shape_cast %246 : vector<1x1x1x8x8xf32> to vector<8x8xf32>
    %248 = vector.shape_cast %247 : vector<8x8xf32> to vector<8x8x1xf32>
    %249 = vector.extract_strided_slice %1 {offsets = [27, 0], sizes = [1, 64], strides = [1, 1]} : vector<40x64xf32> to vector<1x64xf32>
    %250 = vector.shape_cast %249 : vector<1x64xf32> to vector<1x1x64xf32>
    %251 = vector.broadcast %248 : vector<8x8x1xf32> to vector<8x8x64xf32>
    %252 = vector.broadcast %250 : vector<1x1x64xf32> to vector<8x8x64xf32>
    %253 = arith.mulf %251, %252 : vector<8x8x64xf32>
    %254 = arith.addf %245, %253 : vector<8x8x64xf32>
    %255 = vector.extract_strided_slice %0 {offsets = [0, 1, 0, 3, 0], sizes = [1, 1, 1, 8, 8], strides = [1, 1, 1, 1, 1]} : vector<1x2x2x13x10xf32> to vector<1x1x1x8x8xf32>
    %256 = vector.shape_cast %255 : vector<1x1x1x8x8xf32> to vector<8x8xf32>
    %257 = vector.shape_cast %256 : vector<8x8xf32> to vector<8x8x1xf32>
    %258 = vector.extract_strided_slice %1 {offsets = [28, 0], sizes = [1, 64], strides = [1, 1]} : vector<40x64xf32> to vector<1x64xf32>
    %259 = vector.shape_cast %258 : vector<1x64xf32> to vector<1x1x64xf32>
    %260 = vector.broadcast %257 : vector<8x8x1xf32> to vector<8x8x64xf32>
    %261 = vector.broadcast %259 : vector<1x1x64xf32> to vector<8x8x64xf32>
    %262 = arith.mulf %260, %261 : vector<8x8x64xf32>
    %263 = arith.addf %254, %262 : vector<8x8x64xf32>
    %264 = vector.extract_strided_slice %0 {offsets = [0, 1, 1, 3, 0], sizes = [1, 1, 1, 8, 8], strides = [1, 1, 1, 1, 1]} : vector<1x2x2x13x10xf32> to vector<1x1x1x8x8xf32>
    %265 = vector.shape_cast %264 : vector<1x1x1x8x8xf32> to vector<8x8xf32>
    %266 = vector.shape_cast %265 : vector<8x8xf32> to vector<8x8x1xf32>
    %267 = vector.extract_strided_slice %1 {offsets = [29, 0], sizes = [1, 64], strides = [1, 1]} : vector<40x64xf32> to vector<1x64xf32>
    %268 = vector.shape_cast %267 : vector<1x64xf32> to vector<1x1x64xf32>
    %269 = vector.broadcast %266 : vector<8x8x1xf32> to vector<8x8x64xf32>
    %270 = vector.broadcast %268 : vector<1x1x64xf32> to vector<8x8x64xf32>
    %271 = arith.mulf %269, %270 : vector<8x8x64xf32>
    %272 = arith.addf %263, %271 : vector<8x8x64xf32>
    %273 = vector.extract_strided_slice %0 {offsets = [0, 1, 0, 3, 1], sizes = [1, 1, 1, 8, 8], strides = [1, 1, 1, 1, 1]} : vector<1x2x2x13x10xf32> to vector<1x1x1x8x8xf32>
    %274 = vector.shape_cast %273 : vector<1x1x1x8x8xf32> to vector<8x8xf32>
    %275 = vector.shape_cast %274 : vector<8x8xf32> to vector<8x8x1xf32>
    %276 = vector.extract_strided_slice %1 {offsets = [30, 0], sizes = [1, 64], strides = [1, 1]} : vector<40x64xf32> to vector<1x64xf32>
    %277 = vector.shape_cast %276 : vector<1x64xf32> to vector<1x1x64xf32>
    %278 = vector.broadcast %275 : vector<8x8x1xf32> to vector<8x8x64xf32>
    %279 = vector.broadcast %277 : vector<1x1x64xf32> to vector<8x8x64xf32>
    %280 = arith.mulf %278, %279 : vector<8x8x64xf32>
    %281 = arith.addf %272, %280 : vector<8x8x64xf32>
    %282 = vector.extract_strided_slice %0 {offsets = [0, 1, 1, 3, 1], sizes = [1, 1, 1, 8, 8], strides = [1, 1, 1, 1, 1]} : vector<1x2x2x13x10xf32> to vector<1x1x1x8x8xf32>
    %283 = vector.shape_cast %282 : vector<1x1x1x8x8xf32> to vector<8x8xf32>
    %284 = vector.shape_cast %283 : vector<8x8xf32> to vector<8x8x1xf32>
    %285 = vector.extract_strided_slice %1 {offsets = [31, 0], sizes = [1, 64], strides = [1, 1]} : vector<40x64xf32> to vector<1x64xf32>
    %286 = vector.shape_cast %285 : vector<1x64xf32> to vector<1x1x64xf32>
    %287 = vector.broadcast %284 : vector<8x8x1xf32> to vector<8x8x64xf32>
    %288 = vector.broadcast %286 : vector<1x1x64xf32> to vector<8x8x64xf32>
    %289 = arith.mulf %287, %288 : vector<8x8x64xf32>
    %290 = arith.addf %281, %289 : vector<8x8x64xf32>
    %291 = vector.extract_strided_slice %0 {offsets = [0, 0, 0, 4, 0], sizes = [1, 1, 1, 8, 8], strides = [1, 1, 1, 1, 1]} : vector<1x2x2x13x10xf32> to vector<1x1x1x8x8xf32>
    %292 = vector.shape_cast %291 : vector<1x1x1x8x8xf32> to vector<8x8xf32>
    %293 = vector.shape_cast %292 : vector<8x8xf32> to vector<8x8x1xf32>
    %294 = vector.extract_strided_slice %1 {offsets = [32, 0], sizes = [1, 64], strides = [1, 1]} : vector<40x64xf32> to vector<1x64xf32>
    %295 = vector.shape_cast %294 : vector<1x64xf32> to vector<1x1x64xf32>
    %296 = vector.broadcast %293 : vector<8x8x1xf32> to vector<8x8x64xf32>
    %297 = vector.broadcast %295 : vector<1x1x64xf32> to vector<8x8x64xf32>
    %298 = arith.mulf %296, %297 : vector<8x8x64xf32>
    %299 = arith.addf %290, %298 : vector<8x8x64xf32>
    %300 = vector.extract_strided_slice %0 {offsets = [0, 0, 1, 4, 0], sizes = [1, 1, 1, 8, 8], strides = [1, 1, 1, 1, 1]} : vector<1x2x2x13x10xf32> to vector<1x1x1x8x8xf32>
    %301 = vector.shape_cast %300 : vector<1x1x1x8x8xf32> to vector<8x8xf32>
    %302 = vector.shape_cast %301 : vector<8x8xf32> to vector<8x8x1xf32>
    %303 = vector.extract_strided_slice %1 {offsets = [33, 0], sizes = [1, 64], strides = [1, 1]} : vector<40x64xf32> to vector<1x64xf32>
    %304 = vector.shape_cast %303 : vector<1x64xf32> to vector<1x1x64xf32>
    %305 = vector.broadcast %302 : vector<8x8x1xf32> to vector<8x8x64xf32>
    %306 = vector.broadcast %304 : vector<1x1x64xf32> to vector<8x8x64xf32>
    %307 = arith.mulf %305, %306 : vector<8x8x64xf32>
    %308 = arith.addf %299, %307 : vector<8x8x64xf32>
    %309 = vector.extract_strided_slice %0 {offsets = [0, 0, 0, 4, 1], sizes = [1, 1, 1, 8, 8], strides = [1, 1, 1, 1, 1]} : vector<1x2x2x13x10xf32> to vector<1x1x1x8x8xf32>
    %310 = vector.shape_cast %309 : vector<1x1x1x8x8xf32> to vector<8x8xf32>
    %311 = vector.shape_cast %310 : vector<8x8xf32> to vector<8x8x1xf32>
    %312 = vector.extract_strided_slice %1 {offsets = [34, 0], sizes = [1, 64], strides = [1, 1]} : vector<40x64xf32> to vector<1x64xf32>
    %313 = vector.shape_cast %312 : vector<1x64xf32> to vector<1x1x64xf32>
    %314 = vector.broadcast %311 : vector<8x8x1xf32> to vector<8x8x64xf32>
    %315 = vector.broadcast %313 : vector<1x1x64xf32> to vector<8x8x64xf32>
    %316 = arith.mulf %314, %315 : vector<8x8x64xf32>
    %317 = arith.addf %308, %316 : vector<8x8x64xf32>
    %318 = vector.extract_strided_slice %0 {offsets = [0, 0, 1, 4, 1], sizes = [1, 1, 1, 8, 8], strides = [1, 1, 1, 1, 1]} : vector<1x2x2x13x10xf32> to vector<1x1x1x8x8xf32>
    %319 = vector.shape_cast %318 : vector<1x1x1x8x8xf32> to vector<8x8xf32>
    %320 = vector.shape_cast %319 : vector<8x8xf32> to vector<8x8x1xf32>
    %321 = vector.extract_strided_slice %1 {offsets = [35, 0], sizes = [1, 64], strides = [1, 1]} : vector<40x64xf32> to vector<1x64xf32>
    %322 = vector.shape_cast %321 : vector<1x64xf32> to vector<1x1x64xf32>
    %323 = vector.broadcast %320 : vector<8x8x1xf32> to vector<8x8x64xf32>
    %324 = vector.broadcast %322 : vector<1x1x64xf32> to vector<8x8x64xf32>
    %325 = arith.mulf %323, %324 : vector<8x8x64xf32>
    %326 = arith.addf %317, %325 : vector<8x8x64xf32>
    %327 = vector.extract_strided_slice %0 {offsets = [0, 1, 0, 4, 0], sizes = [1, 1, 1, 8, 8], strides = [1, 1, 1, 1, 1]} : vector<1x2x2x13x10xf32> to vector<1x1x1x8x8xf32>
    %328 = vector.shape_cast %327 : vector<1x1x1x8x8xf32> to vector<8x8xf32>
    %329 = vector.shape_cast %328 : vector<8x8xf32> to vector<8x8x1xf32>
    %330 = vector.extract_strided_slice %1 {offsets = [36, 0], sizes = [1, 64], strides = [1, 1]} : vector<40x64xf32> to vector<1x64xf32>
    %331 = vector.shape_cast %330 : vector<1x64xf32> to vector<1x1x64xf32>
    %332 = vector.broadcast %329 : vector<8x8x1xf32> to vector<8x8x64xf32>
    %333 = vector.broadcast %331 : vector<1x1x64xf32> to vector<8x8x64xf32>
    %334 = arith.mulf %332, %333 : vector<8x8x64xf32>
    %335 = arith.addf %326, %334 : vector<8x8x64xf32>
    %336 = vector.extract_strided_slice %0 {offsets = [0, 1, 1, 4, 0], sizes = [1, 1, 1, 8, 8], strides = [1, 1, 1, 1, 1]} : vector<1x2x2x13x10xf32> to vector<1x1x1x8x8xf32>
    %337 = vector.shape_cast %336 : vector<1x1x1x8x8xf32> to vector<8x8xf32>
    %338 = vector.shape_cast %337 : vector<8x8xf32> to vector<8x8x1xf32>
    %339 = vector.extract_strided_slice %1 {offsets = [37, 0], sizes = [1, 64], strides = [1, 1]} : vector<40x64xf32> to vector<1x64xf32>
    %340 = vector.shape_cast %339 : vector<1x64xf32> to vector<1x1x64xf32>
    %341 = vector.broadcast %338 : vector<8x8x1xf32> to vector<8x8x64xf32>
    %342 = vector.broadcast %340 : vector<1x1x64xf32> to vector<8x8x64xf32>
    %343 = arith.mulf %341, %342 : vector<8x8x64xf32>
    %344 = arith.addf %335, %343 : vector<8x8x64xf32>
    %345 = vector.extract_strided_slice %0 {offsets = [0, 1, 0, 4, 1], sizes = [1, 1, 1, 8, 8], strides = [1, 1, 1, 1, 1]} : vector<1x2x2x13x10xf32> to vector<1x1x1x8x8xf32>
    %346 = vector.shape_cast %345 : vector<1x1x1x8x8xf32> to vector<8x8xf32>
    %347 = vector.shape_cast %346 : vector<8x8xf32> to vector<8x8x1xf32>
    %348 = vector.extract_strided_slice %1 {offsets = [38, 0], sizes = [1, 64], strides = [1, 1]} : vector<40x64xf32> to vector<1x64xf32>
    %349 = vector.shape_cast %348 : vector<1x64xf32> to vector<1x1x64xf32>
    %350 = vector.broadcast %347 : vector<8x8x1xf32> to vector<8x8x64xf32>
    %351 = vector.broadcast %349 : vector<1x1x64xf32> to vector<8x8x64xf32>
    %352 = arith.mulf %350, %351 : vector<8x8x64xf32>
    %353 = arith.addf %344, %352 : vector<8x8x64xf32>
    %354 = vector.extract_strided_slice %0 {offsets = [0, 1, 1, 4, 1], sizes = [1, 1, 1, 8, 8], strides = [1, 1, 1, 1, 1]} : vector<1x2x2x13x10xf32> to vector<1x1x1x8x8xf32>
    %355 = vector.shape_cast %354 : vector<1x1x1x8x8xf32> to vector<8x8xf32>
    %356 = vector.shape_cast %355 : vector<8x8xf32> to vector<8x8x1xf32>
    %357 = vector.extract_strided_slice %1 {offsets = [39, 0], sizes = [1, 64], strides = [1, 1]} : vector<40x64xf32> to vector<1x64xf32>
    %358 = vector.shape_cast %357 : vector<1x64xf32> to vector<1x1x64xf32>
    %359 = vector.broadcast %356 : vector<8x8x1xf32> to vector<8x8x64xf32>
    %360 = vector.broadcast %358 : vector<1x1x64xf32> to vector<8x8x64xf32>
    %361 = arith.mulf %359, %360 : vector<8x8x64xf32>
    %362 = arith.addf %353, %361 : vector<8x8x64xf32>
    %c0_6 = arith.constant 0 : index
    %c0_7 = arith.constant 0 : index
    %363 = vector.load %arg3[%c0_6, %c0_7] : memref<1x64xf32, #tpu.memory_space<vmem>>, vector<1x64xf32>
    %364 = vector.shape_cast %363 : vector<1x64xf32> to vector<1x1x64xf32>
    %365 = vector.broadcast %364 : vector<1x1x64xf32> to vector<8x8x64xf32>
    %366 = arith.addf %362, %365 : vector<8x8x64xf32>
    %cst_8 = arith.constant 0.000000e+00 : f32
    %367 = vector.broadcast %cst_8 : f32 to vector<8x8x64xf32>
    %368 = arith.maximumf %366, %367 : vector<8x8x64xf32>
    %cst_9 = arith.constant 0.000000e+00 : f32
    %369 = vector.broadcast %cst_9 : f32 to vector<10x10x64xf32>
    %c0_10 = arith.constant 0 : index
    %c0_11 = arith.constant 0 : index
    %c0_12 = arith.constant 0 : index
    %370 = vector.load %arg11[%c0_10, %c0_11, %c0_12] : memref<10x10x64xf32, #tpu.memory_space<vmem>>, vector<10x10x64xf32>
    tpu.vector_store %arg11[%c0_10, %c0_11, %c0_12], %369 {strides = array<i32>} : memref<10x10x64xf32, #tpu.memory_space<vmem>>, vector<10x10x64xf32>,
    %c1 = arith.constant 1 : index
    %c1_13 = arith.constant 1 : index
    %c0_14 = arith.constant 0 : index
    %371 = vector.load %arg11[%c1, %c1_13, %c0_14] : memref<10x10x64xf32, #tpu.memory_space<vmem>>, vector<8x8x64xf32>
    tpu.vector_store %arg11[%c1, %c1_13, %c0_14], %368 {strides = array<i32>} : memref<10x10x64xf32, #tpu.memory_space<vmem>>, vector<8x8x64xf32>,
    %c0_15 = arith.constant 0 : index
    %c0_16 = arith.constant 0 : index
    %c0_17 = arith.constant 0 : index
    %372 = vector.load %arg11[%c0_15, %c0_16, %c0_17] : memref<10x10x64xf32, #tpu.memory_space<vmem>>, vector<10x10x64xf32>
    %c0_18 = arith.constant 0 : index
    %c0_19 = arith.constant 0 : index
    %373 = vector.load %arg4[%c0_18, %c0_19] : memref<9x64xf32, #tpu.memory_space<vmem>>, vector<9x64xf32>
    %cst_20 = arith.constant 0.000000e+00 : f32
    %374 = vector.broadcast %cst_20 : f32 to vector<8x8x64xf32>
    %375 = vector.extract_strided_slice %372 {offsets = [0, 0, 0], sizes = [8, 8, 64], strides = [1, 1, 1]} : vector<10x10x64xf32> to vector<8x8x64xf32>
    %376 = vector.extract_strided_slice %373 {offsets = [0, 0], sizes = [1, 64], strides = [1, 1]} : vector<9x64xf32> to vector<1x64xf32>
    %377 = vector.shape_cast %376 : vector<1x64xf32> to vector<1x1x64xf32>
    %378 = vector.broadcast %377 : vector<1x1x64xf32> to vector<8x8x64xf32>
    %379 = arith.mulf %375, %378 : vector<8x8x64xf32>
    %380 = arith.addf %374, %379 : vector<8x8x64xf32>
    %381 = vector.extract_strided_slice %372 {offsets = [0, 1, 0], sizes = [8, 8, 64], strides = [1, 1, 1]} : vector<10x10x64xf32> to vector<8x8x64xf32>
    %382 = vector.extract_strided_slice %373 {offsets = [1, 0], sizes = [1, 64], strides = [1, 1]} : vector<9x64xf32> to vector<1x64xf32>
    %383 = vector.shape_cast %382 : vector<1x64xf32> to vector<1x1x64xf32>
    %384 = vector.broadcast %383 : vector<1x1x64xf32> to vector<8x8x64xf32>
    %385 = arith.mulf %381, %384 : vector<8x8x64xf32>
    %386 = arith.addf %380, %385 : vector<8x8x64xf32>
    %387 = vector.extract_strided_slice %372 {offsets = [0, 2, 0], sizes = [8, 8, 64], strides = [1, 1, 1]} : vector<10x10x64xf32> to vector<8x8x64xf32>
    %388 = vector.extract_strided_slice %373 {offsets = [2, 0], sizes = [1, 64], strides = [1, 1]} : vector<9x64xf32> to vector<1x64xf32>
    %389 = vector.shape_cast %388 : vector<1x64xf32> to vector<1x1x64xf32>
    %390 = vector.broadcast %389 : vector<1x1x64xf32> to vector<8x8x64xf32>
    %391 = arith.mulf %387, %390 : vector<8x8x64xf32>
    %392 = arith.addf %386, %391 : vector<8x8x64xf32>
    %393 = vector.extract_strided_slice %372 {offsets = [1, 0, 0], sizes = [8, 8, 64], strides = [1, 1, 1]} : vector<10x10x64xf32> to vector<8x8x64xf32>
    %394 = vector.extract_strided_slice %373 {offsets = [3, 0], sizes = [1, 64], strides = [1, 1]} : vector<9x64xf32> to vector<1x64xf32>
    %395 = vector.shape_cast %394 : vector<1x64xf32> to vector<1x1x64xf32>
    %396 = vector.broadcast %395 : vector<1x1x64xf32> to vector<8x8x64xf32>
    %397 = arith.mulf %393, %396 : vector<8x8x64xf32>
    %398 = arith.addf %392, %397 : vector<8x8x64xf32>
    %399 = vector.extract_strided_slice %372 {offsets = [1, 1, 0], sizes = [8, 8, 64], strides = [1, 1, 1]} : vector<10x10x64xf32> to vector<8x8x64xf32>
    %400 = vector.extract_strided_slice %373 {offsets = [4, 0], sizes = [1, 64], strides = [1, 1]} : vector<9x64xf32> to vector<1x64xf32>
    %401 = vector.shape_cast %400 : vector<1x64xf32> to vector<1x1x64xf32>
    %402 = vector.broadcast %401 : vector<1x1x64xf32> to vector<8x8x64xf32>
    %403 = arith.mulf %399, %402 : vector<8x8x64xf32>
    %404 = arith.addf %398, %403 : vector<8x8x64xf32>
    %405 = vector.extract_strided_slice %372 {offsets = [1, 2, 0], sizes = [8, 8, 64], strides = [1, 1, 1]} : vector<10x10x64xf32> to vector<8x8x64xf32>
    %406 = vector.extract_strided_slice %373 {offsets = [5, 0], sizes = [1, 64], strides = [1, 1]} : vector<9x64xf32> to vector<1x64xf32>
    %407 = vector.shape_cast %406 : vector<1x64xf32> to vector<1x1x64xf32>
    %408 = vector.broadcast %407 : vector<1x1x64xf32> to vector<8x8x64xf32>
    %409 = arith.mulf %405, %408 : vector<8x8x64xf32>
    %410 = arith.addf %404, %409 : vector<8x8x64xf32>
    %411 = vector.extract_strided_slice %372 {offsets = [2, 0, 0], sizes = [8, 8, 64], strides = [1, 1, 1]} : vector<10x10x64xf32> to vector<8x8x64xf32>
    %412 = vector.extract_strided_slice %373 {offsets = [6, 0], sizes = [1, 64], strides = [1, 1]} : vector<9x64xf32> to vector<1x64xf32>
    %413 = vector.shape_cast %412 : vector<1x64xf32> to vector<1x1x64xf32>
    %414 = vector.broadcast %413 : vector<1x1x64xf32> to vector<8x8x64xf32>
    %415 = arith.mulf %411, %414 : vector<8x8x64xf32>
    %416 = arith.addf %410, %415 : vector<8x8x64xf32>
    %417 = vector.extract_strided_slice %372 {offsets = [2, 1, 0], sizes = [8, 8, 64], strides = [1, 1, 1]} : vector<10x10x64xf32> to vector<8x8x64xf32>
    %418 = vector.extract_strided_slice %373 {offsets = [7, 0], sizes = [1, 64], strides = [1, 1]} : vector<9x64xf32> to vector<1x64xf32>
    %419 = vector.shape_cast %418 : vector<1x64xf32> to vector<1x1x64xf32>
    %420 = vector.broadcast %419 : vector<1x1x64xf32> to vector<8x8x64xf32>
    %421 = arith.mulf %417, %420 : vector<8x8x64xf32>
    %422 = arith.addf %416, %421 : vector<8x8x64xf32>
    %423 = vector.extract_strided_slice %372 {offsets = [2, 2, 0], sizes = [8, 8, 64], strides = [1, 1, 1]} : vector<10x10x64xf32> to vector<8x8x64xf32>
    %424 = vector.extract_strided_slice %373 {offsets = [8, 0], sizes = [1, 64], strides = [1, 1]} : vector<9x64xf32> to vector<1x64xf32>
    %425 = vector.shape_cast %424 : vector<1x64xf32> to vector<1x1x64xf32>
    %426 = vector.broadcast %425 : vector<1x1x64xf32> to vector<8x8x64xf32>
    %427 = arith.mulf %423, %426 : vector<8x8x64xf32>
    %428 = arith.addf %422, %427 : vector<8x8x64xf32>
    %c0_21 = arith.constant 0 : index
    %c0_22 = arith.constant 0 : index
    %429 = vector.load %arg5[%c0_21, %c0_22] : memref<1x64xf32, #tpu.memory_space<vmem>>, vector<1x64xf32>
    %430 = vector.shape_cast %429 : vector<1x64xf32> to vector<1x1x64xf32>
    %431 = vector.broadcast %430 : vector<1x1x64xf32> to vector<8x8x64xf32>
    %432 = arith.addf %428, %431 : vector<8x8x64xf32>
    %cst_23 = arith.constant 0.000000e+00 : f32
    %433 = vector.broadcast %cst_23 : f32 to vector<8x8x64xf32>
    %434 = arith.maximumf %432, %433 : vector<8x8x64xf32>
    %435 = vector.shape_cast %434 : vector<8x8x64xf32> to vector<64x64xf32>
    %c0_24 = arith.constant 0 : index
    %c0_25 = arith.constant 0 : index
    %436 = vector.load %arg6[%c0_24, %c0_25] : memref<64x64xf32, #tpu.memory_space<vmem>>, vector<64x64xf32>
    %cst_26 = arith.constant dense<0.000000e+00> : vector<64x64xf32>
    %437 = tpu.matmul %435, %436, %cst_26 {dimension_numbers = #tpu.dot_dimension_numbers<[1], [0], [0], [1], [0, 0, 1, 1], [], []>} : vector<64x64xf32>, vector<64x64xf32>, vector<64x64xf32> -> vector<64x64xf32>
    %c0_27 = arith.constant 0 : index
    %c0_28 = arith.constant 0 : index
    %438 = vector.load %arg7[%c0_27, %c0_28] : memref<1x64xf32, #tpu.memory_space<vmem>>, vector<1x64xf32>
    %439 = vector.broadcast %438 : vector<1x64xf32> to vector<64x64xf32>
    %440 = arith.addf %437, %439 : vector<64x64xf32>
    %cst_29 = arith.constant 0.000000e+00 : f32
    %441 = vector.broadcast %cst_29 : f32 to vector<64x64xf32>
    %442 = arith.maximumf %440, %441 : vector<64x64xf32>
    %cst_30 = arith.constant dense<0.000000e+00> : vector<64xf32>
    %443 = vector.multi_reduction <add>, %442, %cst_30 [0] : vector<64x64xf32> to vector<64xf32>
    %444 = vector.shape_cast %443 : vector<64xf32> to vector<1x64xf32>
    %cst_31 = arith.constant 6.400000e+01 : f32
    %445 = vector.broadcast %cst_31 : f32 to vector<1x64xf32>
    %446 = arith.divf %444, %445 : vector<1x64xf32>
    %c0_32 = arith.constant 0 : index
    %c0_33 = arith.constant 0 : index
    %447 = vector.load %arg8[%c0_32, %c0_33] : memref<64x2xf32, #tpu.memory_space<vmem>>, vector<64x2xf32>
    %cst_34 = arith.constant dense<0.000000e+00> : vector<1x2xf32>
    %448 = tpu.matmul %446, %447, %cst_34 {dimension_numbers = #tpu.dot_dimension_numbers<[1], [0], [0], [1], [0, 0, 1, 1], [], []>} : vector<1x64xf32>, vector<64x2xf32>, vector<1x2xf32> -> vector<1x2xf32>
    %c0_35 = arith.constant 0 : index
    %c0_36 = arith.constant 0 : index
    %449 = vector.load %arg9[%c0_35, %c0_36] : memref<1x2xf32, #tpu.memory_space<vmem>>, vector<1x2xf32>
    %450 = arith.addf %448, %449 : vector<1x2xf32>
    %451 = vector.shape_cast %450 : vector<1x2xf32> to vector<1x1x2xf32>
    %c0_37 = arith.constant 0 : index
    %c0_38 = arith.constant 0 : index
    %c0_39 = arith.constant 0 : index
    %452 = vector.load %arg10[%c0_37, %c0_38, %c0_39] : memref<1x1x2xf32, #tpu.memory_space<vmem>>, vector<1x1x2xf32>
    tpu.vector_store %arg10[%c0_37, %c0_38, %c0_39], %451 {strides = array<i32>} : memref<1x1x2xf32, #tpu.memory_space<vmem>>, vector<1x1x2xf32>,
    return
  }
  func.func @transform_0(%arg0: i32) -> (i32, i32, i32, i32, i32) {
    %c0_i32 = arith.constant 0 : i32
    %c0_i32_0 = arith.constant 0 : i32
    %c0_i32_1 = arith.constant 0 : i32
    %c0_i32_2 = arith.constant 0 : i32
    %c0_i32_3 = arith.constant 0 : i32
    return %arg0, %c0_i32, %c0_i32_0, %c0_i32_1, %c0_i32_2 : i32, i32, i32, i32, i32
  }
  func.func @transform_1(%arg0: i32) -> (i32, i32) {
    %c0_i32 = arith.constant 0 : i32
    %c0_i32_0 = arith.constant 0 : i32
    %c0_i32_1 = arith.constant 0 : i32
    return %c0_i32, %c0_i32_0 : i32, i32
  }
  func.func @transform_2(%arg0: i32) -> (i32, i32) {
    %c0_i32 = arith.constant 0 : i32
    %c0_i32_0 = arith.constant 0 : i32
    %c0_i32_1 = arith.constant 0 : i32
    return %c0_i32, %c0_i32_0 : i32, i32
  }
  func.func @transform_3(%arg0: i32) -> (i32, i32) {
    %c0_i32 = arith.constant 0 : i32
    %c0_i32_0 = arith.constant 0 : i32
    %c0_i32_1 = arith.constant 0 : i32
    return %c0_i32, %c0_i32_0 : i32, i32
  }
  func.func @transform_4(%arg0: i32) -> (i32, i32) {
    %c0_i32 = arith.constant 0 : i32
    %c0_i32_0 = arith.constant 0 : i32
    %c0_i32_1 = arith.constant 0 : i32
    return %c0_i32, %c0_i32_0 : i32, i32
  }
  func.func @transform_5(%arg0: i32) -> (i32, i32) {
    %c0_i32 = arith.constant 0 : i32
    %c0_i32_0 = arith.constant 0 : i32
    %c0_i32_1 = arith.constant 0 : i32
    return %c0_i32, %c0_i32_0 : i32, i32
  }
  func.func @transform_6(%arg0: i32) -> (i32, i32) {
    %c0_i32 = arith.constant 0 : i32
    %c0_i32_0 = arith.constant 0 : i32
    %c0_i32_1 = arith.constant 0 : i32
    return %c0_i32, %c0_i32_0 : i32, i32
  }
  func.func @transform_7(%arg0: i32) -> (i32, i32) {
    %c0_i32 = arith.constant 0 : i32
    %c0_i32_0 = arith.constant 0 : i32
    %c0_i32_1 = arith.constant 0 : i32
    return %c0_i32, %c0_i32_0 : i32, i32
  }
  func.func @transform_8(%arg0: i32) -> (i32, i32) {
    %c0_i32 = arith.constant 0 : i32
    %c0_i32_0 = arith.constant 0 : i32
    %c0_i32_1 = arith.constant 0 : i32
    return %c0_i32, %c0_i32_0 : i32, i32
  }
  func.func @transform_9(%arg0: i32) -> (i32, i32, i32) {
    %c0_i32 = arith.constant 0 : i32
    %c0_i32_0 = arith.constant 0 : i32
    %c0_i32_1 = arith.constant 0 : i32
    return %arg0, %c0_i32, %c0_i32_0 : i32, i32, i32
  }
}

</mosaic_0001>

<bundles_post_ra>
// kernel: dscnn_forward.1
= control target key start
LH: loop header
LB: loop body
LE: loop exit
PB: predicated region body
PF: predicated region fallthrough
CT: control target
= control target key end

     0   :  { %14 = vsyncpa [#allocation4], 0  ;;  %s4918_s0 = inlined_call_operand.vmem [shape: f32[2,2,2,13,10], index: 0, kind: input, shape index: {}]   ;;  %s4919_s1 = inlined_call_operand.vmem [shape: f32[40,64], index: 1, kind: input, shape index: {}]   ;;  %s4920_s2 = inlined_call_operand.vmem [shape: f32[1,64], index: 2, kind: input, shape index: {}]   ;;  %s4921_s3 = inlined_call_operand.vmem [shape: f32[9,64], index: 3, kind: input, shape index: {}]   ;;  %s4922_s4 = inlined_call_operand.vmem [shape: f32[1,64], index: 4, kind: input, shape index: {}]   ;;  %s4923_s5 = inlined_call_operand.vmem [shape: f32[64,64], index: 5, kind: input, shape index: {}]   ;;  %s4924_s6 = inlined_call_operand.vmem [shape: f32[1,64], index: 6, kind: input, shape index: {}]   ;;  %s4925_s7 = inlined_call_operand.vmem [shape: f32[64,2], index: 7, kind: input, shape index: {}]   ;;  %s4926_s8 = inlined_call_operand.vmem [shape: f32[1,2], index: 8, kind: input, shape index: {}]   ;;  %s4927_s9 = inlined_call_operand.hbm [shape: f32[2,1,2], index: 9, kind: output, shape index: {}]  }
   0x1   :  { %16 = vsyncpa [#allocation4 + $0x1], 0  ;;  %s2898_s30 = smov 0   ;;  %s2900_s10 = smov 0  }
   0x2   :  { %s2902_s11 = smov 0   ;;  %s2904_s12 = smov 0  }
   0x3 LB: > { %s2919_s13 = sadd.s32 4294967295, %s2842_s12   ;;  %s2615_s14 = sadd.s32 4294967294, %s2842_s12   ;;  %s2842_s12 = sphi %s2904_s12, %s5366_s12   ;;  %s2838_s11 = sphi %s2902_s11, %s5365_s11   ;;  %s2834_s10 = sphi %s2900_s10, %s5364_s10   ;;  %s2830_s30 = sphi %s2898_s30, %s5363_s30  }
   0x4   : > { %s2923_s15 = sadd.s32 1, %s2842_s12   ;;  %s223_s16 = sadd.s32 1, %s2838_s11 }
   0x5   : > { %s220_s17 = ssub.s32 %s2842_s12, %s2923_s15  ;;  %p233_p0 = scmp.ne.s32.totalorder %s2838_s11, %s2834_s10 }
   0x6   : > { %p221_p1 = scmp.eq.s32.totalorder %s220_s17, 0  ;;  %p234_p2 = scmp.eq.s32.totalorder %s2919_s13, 1 }
   0x7   : > { %p239_p3 = scmp.ne.s32.totalorder %s2834_s10, %s2830_s30  ;;  %p240_p4 = scmp.eq.s32.totalorder %s2615_s14, 1 }
   0x8   : > { %s2934_s18 = scalar_select %p221_p1, %s2838_s11, %s223_s16  }
   0x9   : > { %p2936_p5 = por %p234_p2, %p233_p0  ;;  %p2940_p6 = por %p240_p4, %p239_p3 }
   0xa   : > { %p2618_p7 = scmp.ge.s32.totalorder %s2842_s12, 1  ;;  %p290_p8 = scmp.lt.s32.totalorder %s2842_s12, 3 }
   0xc   : > { %p291_p9 = pnand %p2618_p7, %p290_p8 }
   0xe   : > { %294 = sbr.rel (%p291_p9) target bundleno = 915 (0x393), region = 56 }
  0x15   : > { %p325_p10 = scmp.lt.s32.totalorder %s2919_s13, 1  ;;  %v343_v0 = vlaneseq  ;;  %vm1694_vm0 = vcmask 523264   ;;  %vm1696_vm1 = vcmask 517120   ;;  %v4928_v48 = vmov 0.0   ;;  %v338_v63 = vld [vmem:[%s4919_s1] sm:$0xff]  ;;  %s323_s14 = sand.u32 1, %s2834_s10  }
  0x16   : > { %1698 = vst.msk [vmem:[#allocation2 + $0x10] sm:$0xff] %vm1694_vm0, %v4928_v48  ;;  %1695 = vst.msk [vmem:[#allocation2] sm:$0xff] %vm1694_vm0, %v4928_v48  ;;  %vm1803_vm2 = vcmask 1046528   ;;  %vm1880_vm3 = vcmask 1045504   ;;  %vm2846_vm4 = vmmov 0   ;;  %vm2545_vm5 = vcmask 8192  }
  0x17   : > { %s326_s21 = scalar_select %p325_p10, %s2919_s13, 1  ;;  %v2948_v1 = vshrl.u32 %v343_v0, 7  ;;  %1700 = vst.msk [vmem:[#allocation2 + $0x20] sm:$0xff] %vm1694_vm0, %v4928_v48  ;;  %1702 = vst.msk [vmem:[#allocation2 + $0x30] sm:$0xff] %vm1694_vm0, %v4928_v48 }
  0x18   : > { %1704 = vst.msk [vmem:[#allocation2 + $0x40] sm:$0xff] %vm1694_vm0, %v4928_v48  ;;  %1706 = vst.msk [vmem:[#allocation2 + $0x50] sm:$0xff] %vm1694_vm0, %v4928_v48  ;;  %s2548_s27 = scalar_lea.sflag [#allocation4], %s323_s14 }
  0x19   : > { %s2637_s22 = sshll.u32 %s326_s21, 6  ;;  %v2951_v2 = vsub.s32 0, %v2948_v1  ;;  %v2959_v3 = vsub.s32 1, %v2948_v1  ;;  %v2974_v9 = vsub.s32 2, %v2948_v1  ;;  %v2983_v13 = vsub.s32 3, %v2948_v1  ;;  %1708 = vst.msk [vmem:[#allocation2 + $0x60] sm:$0xff] %vm1694_vm0, %v4928_v48 }
  0x1a   : > { %s2956_s25 = scalar_lea.vmem %s4918_s0, %s2637_s22  ;;  %v2995_v18 = vsub.s32 4, %v2948_v1  ;;  %v3011_v25 = vsub.s32 5, %v2948_v1  ;;  %v3018_v28 = vsub.s32 6, %v2948_v1  ;;  %v3039_v38 = vsub.s32 7, %v2948_v1  ;;  %1710 = vst.msk [vmem:[#allocation2 + $0x70] sm:$0xff] %vm1694_vm0, %v4928_v48  ;;  %1712 = vst.msk [vmem:[#allocation2 + $0x80] sm:$0xff] %vm1694_vm0, %v4928_v48 }
  0x1b   : > { %5010 = vst [vmem:[#allocation6_spill] sm:$0xff] %v2951_v2  ;;  %5011 = vst [vmem:[#allocation7_spill] sm:$0xff] %v2959_v3  ;;  %v2962_v4 = vld [vmem:[%s2956_s25] sm:$0xff]  ;;  %v2965_v5 = vld [vmem:[%s2956_s25 + $0x10] sm:$0xff]  ;;  %s2634_s21 = sshll.u32 %s2919_s13, 4  ;;  %s324_s22 = scalar_lea.vmem [#allocation3], %s323_s14 }
  0x1c   : > { %v346_v6 = vrot.slane %v2962_v4, %v2951_v2  ;;  %v353_v7 = vrot.slane %v2962_v4, %v2959_v3  ;;  %v422_v8 = vrot.slane %v2965_v5, %v2951_v2  ;;  %5012 = vst [vmem:[#allocation8_spill] sm:$0xff] %v2974_v9  ;;  %v360_v10 = vrot.slane %v2962_v4, %v2974_v9  ;;  %v2986_v14 = vld [vmem:[%s2956_s25 + $0x20] sm:$0xff]  ;;  %v3002_v21 = vld [vmem:[%s2956_s25 + $0x30] sm:$0xff]  ;;  %v3104_v51 = vld [vmem:[%s2956_s25 + $0x8] sm:$0x1f]  ;;  %s2560_s23 = sshll.u32 %s324_s22, 4  ;;  %s4876_s26 = scalar_lea.hbm %s4927_s9, %s2634_s21  ;;  %s4878_s23 = int_to_ptr.vmem [resolvable:$true] %s2560_s23 }
  0x1d   : > { %v429_v11 = vrot.slane %v2965_v5, %v2959_v3  ;;  %v436_v12 = vrot.slane %v2965_v5, %v2974_v9  ;;  %v367_v15 = vrot.slane %v2962_v4, %v2983_v13  ;;  %v602_v16 = vrot.slane %v2986_v14, %v2951_v2  ;;  %5013 = vst [vmem:[#allocation9_spill] sm:$0xff] %v2995_v18  ;;  %v3107_v52 = vld [vmem:[%s2956_s25 + $0x18] sm:$0x1f]  ;;  %v3122_v59 = vld [vmem:[%s2956_s25 + $0x28] sm:$0x1f]  ;;  %s2780_s28 = scalar_lea.vmem %s4878_s23, 16 }
  0x1e   : > { %497 = vbcast.lane.b32.xlu1 %v346_v6, 257  ;;  %348 = vbcast.lane.b32.xlu0 %v346_v6, 256  ;;  %v443_v17 = vrot.slane %v2965_v5, %v2983_v13  ;;  %v450_v19 = vrot.slane %v2965_v5, %v2995_v18  ;;  %v374_v20 = vrot.slane %v2962_v4, %v2995_v18  ;;  %v3125_v60 = vld [vmem:[%s2956_s25 + $0x38] sm:$0x1f]  ;;  %p2781_p11 = scmp.ne.s32.totalorder %s4878_s23, %s2780_s28  ;;  %s2847_s13 = smov [#allocation3]  }
  0x1f   : > { %v678_v22 = vrot.slane %v3002_v21, %v2951_v2  ;;  %v609_v23 = vrot.slane %v2986_v14, %v2959_v3  ;;  %v616_v24 = vrot.slane %v2986_v14, %v2974_v9  ;;  %5014 = vst [vmem:[#allocation10_spill] sm:$0xff] %v3011_v25  ;;  %v381_v26 = vrot.slane %v2962_v4, %v3011_v25  ;;  %s2784_s29 = sshll.u32 %s2847_s13, 4  ;;  %s2785_s29 = int_to_ptr.vmem [resolvable:$false] %s2784_s29 }
  0x20   : > { %v457_v27 = vrot.slane %v2965_v5, %v3011_v25  ;;  %5015 = vst [vmem:[#allocation11_spill] sm:$0xff] %v3018_v28  ;;  %v388_v29 = vrot.slane %v2962_v4, %v3018_v28  ;;  %v685_v30 = vrot.slane %v3002_v21, %v2959_v3  ;;  %v464_v31 = vrot.slane %v2965_v5, %v3018_v28  ;;  %p2782_p12 = pnand %p2781_p11, %p2936_p5  ;;  %s2786_s16 = scalar_lea.vmem %s2785_s29, 32 }
  0x21   : > { %v692_v32 = vrot.slane %v3002_v21, %v2974_v9  ;;  %v623_v33 = vrot.slane %v2986_v14, %v2983_v13  ;;  %v630_v34 = vrot.slane %v2986_v14, %v2995_v18  ;;  %v699_v35 = vrot.slane %v3002_v21, %v2983_v13  ;;  %5016 = vst [vmem:[#allocation12_spill] sm:$0xff] %v3039_v38  ;;  %p2787_p0 = scmp.lt.s32.totalorder %s4878_s23, %s2785_s29  ;;  %p2788_p1 = scmp.lt.s32.totalorder %s2786_s16, %s2780_s28 }
  0x22   : > { %355 = vbcast.lane.b32.xlu1 %v353_v7, 256  ;;  %424 = vbcast.lane.b32.xlu0 %v422_v8, 256  ;;  %v706_v36 = vrot.slane %v3002_v21, %v2995_v18  ;;  %v637_v37 = vrot.slane %v2986_v14, %v3011_v25  ;;  %v471_v39 = vrot.slane %v2965_v5, %v3039_v38  ;;  %v3146_v5 = vld [vmem:[%s4919_s1 + $0x10] sm:$0xff]  ;;  %p2783_p13 = pneg %p2782_p12 }
  0x23   : > { %v395_v40 = vrot.slane %v2962_v4, %v3039_v38  ;;  %v644_v41 = vrot.slane %v2986_v14, %v3018_v28  ;;  %v713_v42 = vrot.slane %v3002_v21, %v3011_v25  ;;  %v720_v43 = vrot.slane %v3002_v21, %v3018_v28  ;;  %1714 = vst.msk [vmem:[#allocation2 + $0x90] sm:$0xff] %vm1694_vm0, %v4928_v48  ;;  %v3141_v4 = vld [vmem:[%s4919_s1 + $0x8] sm:$0xff]  ;;  %p2789_p2 = por %p2788_p1, %p2787_p0 }
  0x24   : > { %v651_v44 = vrot.slane %v2986_v14, %v3039_v38  ;;  %v727_v47 = vrot.slane %v3002_v21, %v3039_v38  ;;  %1699 = vst.msk [vmem:[#allocation2 + $0x18] sm:$0x3] %vm1696_vm1, %v4928_v48  ;;  %1697 = vst.msk [vmem:[#allocation2 + $0x8] sm:$0x3] %vm1696_vm1, %v4928_v48  ;;  %v858_v55 = vrot.slane %v3104_v51, %v2951_v2  ;;  %v3192_v21 = vld [vmem:[%s4919_s1 + $0x20] sm:$0xff] }
  0x25   : > { %1701 = vst.msk [vmem:[#allocation2 + $0x28] sm:$0x3] %vm1696_vm1, %v4928_v48  ;;  %1703 = vst.msk [vmem:[#allocation2 + $0x38] sm:$0x3] %vm1696_vm1, %v4928_v48  ;;  %v885_v56 = vrot.slane %v3107_v52, %v2951_v2  ;;  %v960_v0 = vrot.slane %v3122_v59, %v2951_v2  ;;  %v987_v1 = vrot.slane %v3125_v60, %v2951_v2  ;;  %p2790_p3 = pnand %p2789_p2, %p2783_p13 }
  0x26   : > { %362 = vbcast.lane.b32.xlu1 %v360_v10, 256  ;;  %431 = vbcast.lane.b32.xlu0 %v429_v11, 256  ;;  %1705 = vst.msk [vmem:[#allocation2 + $0x48] sm:$0x3] %vm1696_vm1, %v4928_v48  ;;  %1707 = vst.msk [vmem:[#allocation2 + $0x58] sm:$0x3] %vm1696_vm1, %v4928_v48  ;;  %v3168_v14 = vrot.slane %v338_v63, %v2959_v3 }
  0x27   : > { %1709 = vst.msk [vmem:[#allocation2 + $0x68] sm:$0x3] %vm1696_vm1, %v4928_v48  ;;  %1711 = vst.msk [vmem:[#allocation2 + $0x78] sm:$0x3] %vm1696_vm1, %v4928_v48 }
  0x28   : > { %1713 = vst.msk [vmem:[#allocation2 + $0x88] sm:$0x3] %vm1696_vm1, %v4928_v48  ;;  %1715 = vst.msk [vmem:[#allocation2 + $0x98] sm:$0x3] %vm1696_vm1, %v4928_v48 }
  0x2a   : > { %549 = vbcast.lane.b32.xlu1 %v422_v8, 257  ;;  %438 = vbcast.lane.b32.xlu0 %v436_v12, 256  ;;  %v3153_v8 = vrot.slane %v338_v63, %v2974_v9 }
  0x2c   : > { %5017 = vst [vmem:[#allocation13_spill] sm:$0xff] %v3153_v8 }
  0x2e   : > { %505 = vbcast.lane.b32.xlu1 %v360_v10, 257  ;;  %501 = vbcast.lane.b32.xlu0 %v353_v7, 257  ;;  %v3156_v10 = vrot.slane %v338_v63, %v2951_v2 }
  0x32   : > { %369 = vbcast.lane.b32.xlu1 %v367_v15, 256  ;;  %604 = vbcast.lane.b32.xlu0 %v602_v16, 256 }
  0x36   : > { %553 = vbcast.lane.b32.xlu1 %v429_v11, 257  ;;  %445 = vbcast.lane.b32.xlu0 %v443_v17, 256  ;;  %v3161_v11 = vld [vmem:[%s4919_s1 + $0x18] sm:$0xff] }
  0x3a   : > { %452 = vbcast.lane.b32.xlu1 %v450_v19, 256  ;;  %376 = vbcast.lane.b32.xlu0 %v374_v20, 256 }
  0x3e   : > { %680 = vbcast.lane.b32.xlu1 %v678_v22, 256  ;;  %557 = vbcast.lane.b32.xlu0 %v436_v12, 257  ;;  %v3165_v12 = vrot.slane %v3141_v4, %v2951_v2 }
  0x40   : > { %5018 = vst [vmem:[#allocation14_spill] sm:$0xff] %v3165_v12 }
  0x42   : > { %611 = vbcast.lane.b32.xlu1 %v609_v23, 256  ;;  %509 = vbcast.lane.b32.xlu0 %v367_v15, 257  ;;  %v3172_v15 = vrot.slane %v3146_v5, %v2951_v2 }
  0x44   : > { %5019 = vst [vmem:[#allocation15_spill] sm:$0xff] %v3172_v15 }
  0x46   : > { %618 = vbcast.lane.b32.xlu1 %v616_v24, 256  ;;  %513 = vbcast.lane.b32.xlu0 %v374_v20, 257  ;;  %v3187_v20 = vrot.slane %v3141_v4, %v2974_v9 }
  0x48   : > { %5023 = vst [vmem:[#allocation19_spill] sm:$0xff] %v3187_v20 }
  0x4a   : > { %383 = vbcast.lane.b32.xlu1 %v381_v26, 256  ;;  %753 = vbcast.lane.b32.xlu0 %v602_v16, 257  ;;  %v3176_v16 = vrot.slane %v3141_v4, %v2959_v3 }
  0x4c   : > { %5020 = vst [vmem:[#allocation16_spill] sm:$0xff] %v3176_v16 }
  0x4e   : > { %561 = vbcast.lane.b32.xlu1 %v443_v17, 257  ;;  %459 = vbcast.lane.b32.xlu0 %v457_v27, 256  ;;  %v3179_v17 = vrot.slane %v338_v63, %v2983_v13 }
  0x50   : > { %5021 = vst [vmem:[#allocation17_spill] sm:$0xff] %v3179_v17 }
  0x52   : > { %390 = vbcast.lane.b32.xlu1 %v388_v29, 256  ;;  %687 = vbcast.lane.b32.xlu0 %v685_v30, 256 }
  0x56   : > { %565 = vbcast.lane.b32.xlu1 %v450_v19, 257  ;;  %466 = vbcast.lane.b32.xlu0 %v464_v31, 256  ;;  %v3183_v19 = vrot.slane %v3146_v5, %v2959_v3 }
  0x58   : > { %5022 = vst [vmem:[#allocation18_spill] sm:$0xff] %v3183_v19 }
  0x5a   : > { %805 = vbcast.lane.b32.xlu1 %v678_v22, 257  ;;  %694 = vbcast.lane.b32.xlu0 %v692_v32, 256  ;;  %v3196_v22 = vrot.slane %v3146_v5, %v2974_v9 }
  0x5c   : > { %5024 = vst [vmem:[#allocation20_spill] sm:$0xff] %v3196_v22 }
  0x5e   : > { %625 = vbcast.lane.b32.xlu1 %v623_v33, 256  ;;  %517 = vbcast.lane.b32.xlu0 %v381_v26, 257  ;;  %v3207_v26 = vrot.slane %v3141_v4, %v2983_v13 }
  0x60   : > { %5026 = vst [vmem:[#allocation22_spill] sm:$0xff] %v3207_v26 }
  0x62   : > { %521 = vbcast.lane.b32.xlu1 %v388_v29, 257  ;;  %757 = vbcast.lane.b32.xlu0 %v609_v23, 257  ;;  %v3200_v23 = vrot.slane %v3161_v11, %v2951_v2 }
  0x64   : > { %5025 = vst [vmem:[#allocation21_spill] sm:$0xff] %v3200_v23 }
  0x66   : > { %761 = vbcast.lane.b32.xlu1 %v616_v24, 257  ;;  %632 = vbcast.lane.b32.xlu0 %v630_v34, 256  ;;  %v3203_v24 = vrot.slane %v338_v63, %v2995_v18 }
  0x6a   : > { %701 = vbcast.lane.b32.xlu1 %v699_v35, 256  ;;  %569 = vbcast.lane.b32.xlu0 %v457_v27, 257 }
  0x6e   : > { %573 = vbcast.lane.b32.xlu1 %v464_v31, 257  ;;  %809 = vbcast.lane.b32.xlu0 %v685_v30, 257  ;;  %v3217_v31 = vrot.slane %v3161_v11, %v2959_v3 }
  0x70   : > { %5027 = vst [vmem:[#allocation23_spill] sm:$0xff] %v3217_v31 }
  0x72   : > { %813 = vbcast.lane.b32.xlu1 %v692_v32, 257  ;;  %708 = vbcast.lane.b32.xlu0 %v706_v36, 256 }
  0x76   : > { %765 = vbcast.lane.b32.xlu1 %v623_v33, 257  ;;  %639 = vbcast.lane.b32.xlu0 %v637_v37, 256  ;;  %v3223_v33 = vrot.slane %v3192_v21, %v2959_v3 }
  0x78   : > { %5028 = vst [vmem:[#allocation24_spill] sm:$0xff] %v3223_v33 }
  0x7a   : > { %473 = vbcast.lane.b32.xlu1 %v471_v39, 256  ;;  %397 = vbcast.lane.b32.xlu0 %v395_v40, 256 }
  0x7e   : > { %769 = vbcast.lane.b32.xlu1 %v630_v34, 257  ;;  %646 = vbcast.lane.b32.xlu0 %v644_v41, 256  ;;  %v3227_v34 = vrot.slane %v3192_v21, %v2951_v2  ;;  %v3283_v2 = vrot.slane %v3107_v52, %v2974_v9 }
  0x80   : > { %5029 = vst [vmem:[#allocation25_spill] sm:$0xff] %v3227_v34 }
  0x82   : > { %817 = vbcast.lane.b32.xlu1 %v699_v35, 257  ;;  %715 = vbcast.lane.b32.xlu0 %v713_v42, 256  ;;  %v1062_v35 = vrot.slane %v3104_v51, %v2959_v3 }
  0x86   : > { %722 = vbcast.lane.b32.xlu1 %v720_v43, 256  ;;  %525 = vbcast.lane.b32.xlu0 %v395_v40, 257  ;;  %v3240_v40 = vrot.slane %v3146_v5, %v2983_v13 }
  0x88   : > { %5031 = vst [vmem:[#allocation27_spill] sm:$0xff] %v3240_v40 }
  0x8a   : > { %773 = vbcast.lane.b32.xlu1 %v637_v37, 257  ;;  %821 = vbcast.lane.b32.xlu0 %v706_v36, 257  ;;  %v1089_v36 = vrot.slane %v3107_v52, %v2959_v3 }
  0x8e   : > { %777 = vbcast.lane.b32.xlu1 %v644_v41, 257  ;;  %577 = vbcast.lane.b32.xlu0 %v471_v39, 257  ;;  %v3236_v39 = vrot.slane %v338_v63, %v3011_v25  ;;  %v3244_v41 = vrot.slane %v3141_v4, %v2995_v18 }
  0x90   : > { %v3053_v45 = vpop.permute.xlu1 %497  ;;  %v3055_v46 = vpop.permute.xlu0 %348  ;;  %5032 = vst [vmem:[#allocation28_spill] sm:$0xff] %v3244_v41 }
  0x92   : > { %653 = vbcast.lane.b32.xlu1 %v651_v44, 256  ;;  %825 = vbcast.lane.b32.xlu0 %v713_v42, 257 }
  0x94   : > { %v3079_v49 = vpop.permute.xlu1 %355  ;;  %v3081_v50 = vpop.permute.xlu0 %424 }
  0x96   : > { %729 = vbcast.lane.b32.xlu1 %v727_v47, 256  ;;  %829 = vbcast.lane.b32.xlu0 %v720_v43, 257 }
  0x98   : > { %v3109_v53 = vpop.permute.xlu1 %362  ;;  %v3111_v54 = vpop.permute.xlu0 %431 }
  0x9a   : > { %781 = vbcast.lane.b32.xlu0 %v651_v44, 257  ;;  %833 = vbcast.lane.b32.xlu1 %v727_v47, 257  ;;  %v3252_v44 = vrot.slane %v3161_v11, %v2974_v9  ;;  %v3256_v47 = vrot.slane %v3122_v59, %v2959_v3 }
  0x9c   : > { %v3117_v57 = vpop.permute.xlu1 %549  ;;  %v3119_v58 = vpop.permute.xlu0 %438  ;;  %5033 = vst [vmem:[#allocation29_spill] sm:$0xff] %v3252_v44  ;;  %v3299_v44 = vrot.slane %v3125_v60, %v2974_v9 }
  0x9e   : > { %860 = vbcast.lane.b32.xlu0 %v858_v55, 256  ;;  %887 = vbcast.lane.b32.xlu1 %v885_v56, 256 }
  0xa0   : > { %v3127_v61 = vpop.permute.xlu1 %505  ;;  %v3129_v62 = vpop.permute.xlu0 %501 }
  0xa2   : > { %911 = vbcast.lane.b32.xlu0 %v858_v55, 257  ;;  %935 = vbcast.lane.b32.xlu1 %v885_v56, 257  ;;  %v3260_v55 = vrot.slane %v3125_v60, %v2959_v3  ;;  %v3264_v56 = vrot.slane %v3146_v5, %v2995_v18  ;;  %v3306_v3 = vrot.slane %v338_v63, %v3039_v38 }
  0xa4   : > { %v3148_v6 = vpop.permute.xlu1 %369  ;;  %v3150_v7 = vpop.permute.xlu0 %604  ;;  %5034 = vst [vmem:[#allocation30_spill] sm:$0xff] %v3264_v56  ;;  %v3287_v56 = vrot.slane %v3161_v11, %v2983_v13 }
  0xa5   : > { %v406_v30 = vmul.f32 %v3156_v10, %v3148_v6 }
  0xa6   : > { %962 = vbcast.lane.b32.xlu0 %v960_v0, 256  ;;  %989 = vbcast.lane.b32.xlu1 %v987_v1, 256  ;;  %5037 = vst [vmem:[#allocation33_spill] sm:$0xff] %v3287_v56  ;;  %v479_v56 = vmul.f32 %v3168_v14, %v3081_v50  ;;  %v3328_v50 = vrot.slane %v3161_v11, %v2995_v18 }
  0xa8   : > { %v3209_v27 = vpop.permute.xlu1 %553  ;;  %v3211_v29 = vpop.permute.xlu0 %445  ;;  %5042 = vst [vmem:[#allocation38_spill] sm:$0xff] %v3328_v50  ;;  %v3350_v50 = vrot.slane %v3192_v21, %v2995_v18 }
  0xa9   : > { %v482_v32 = vmul.f32 %v3168_v14, %v3211_v29 }
  0xaa   : > { %1013 = vbcast.lane.b32.xlu0 %v960_v0, 257  ;;  %1037 = vbcast.lane.b32.xlu1 %v987_v1, 257  ;;  %v3270_v1 = vrot.slane %v3192_v21, %v2974_v9  ;;  %5045 = vst [vmem:[#allocation41_spill] sm:$0xff] %v3350_v50 }
  0xab   : > { %v3233_v37 = vadd.f32 %v482_v32, %v406_v30  ;;  %v3273_v30 = vrot.slane %v338_v63, %v3018_v28  ;;  %v3277_v32 = vrot.slane %v3104_v51, %v2974_v9  ;;  %v3324_v63 = vrot.slane %v3107_v52, %v2983_v13 }
  0xac   : > { %v3246_v42 = vpop.permute.xlu1 %452  ;;  %v3248_v43 = vpop.permute.xlu0 %376  ;;  %5035 = vst [vmem:[#allocation31_spill] sm:$0xff] %v3270_v1  ;;  %v3291_v1 = vrot.slane %v3141_v4, %v3011_v25  ;;  %v3342_v52 = vrot.slane %v3125_v60, %v2983_v13  ;;  %v3362_v60 = vrot.slane %v3146_v5, %v3039_v38 }
  0xad   : > { %5030 = vst [vmem:[#allocation26_spill] sm:$0xff] %v3233_v37  ;;  %v483_v0 = vmul.f32 %v3168_v14, %v3246_v42  ;;  %5036 = vst [vmem:[#allocation32_spill] sm:$0xff] %v3273_v30  ;;  %v407_v48 = vmul.f32 %v3156_v10, %v3248_v43  ;;  %v3295_v30 = vrot.slane %v3122_v59, %v2974_v9 }
  0xae   : > { %1064 = vbcast.lane.b32.xlu0 %v1062_v35, 256  ;;  %5038 = vst [vmem:[#allocation34_spill] sm:$0xff] %v3291_v1  ;;  %1091 = vbcast.lane.b32.xlu1 %v1089_v36, 256  ;;  %v3303_v37 = vrot.slane %v3192_v21, %v2983_v13  ;;  %v3320_v9 = vrot.slane %v3104_v51, %v2983_v13  ;;  %5048 = vst [vmem:[#allocation44_spill] sm:$0xff] %v3362_v60 }
  0xaf   : > { %5039 = vst [vmem:[#allocation35_spill] sm:$0xff] %v3295_v30  ;;  %v491_v1 = vadd.f32 %v483_v0, %v407_v48  ;;  %v3316_v30 = vrot.slane %v3146_v5, %v3011_v25  ;;  %v3332_v48 = vrot.slane %v3141_v4, %v3018_v28  ;;  %v3336_v0 = vrot.slane %v3122_v59, %v2983_v13 }
  0xb0   : > { %5040 = vst [vmem:[#allocation36_spill] sm:$0xff] %v3303_v37  ;;  %v3310_v41 = vpop.permute.xlu1 %680  ;;  %v3312_v40 = vpop.permute.xlu0 %557  ;;  %v403_v51 = vmul.f32 %v3156_v10, %v3055_v46  ;;  %v3354_v59 = vrot.slane %v3161_v11, %v3011_v25  ;;  %v3358_v46 = vrot.slane %v3141_v4, %v3039_v38  ;;  %v3376_v4 = vrot.slane %v3161_v11, %v3018_v28 }
  0xb1   : > { %5041 = vst [vmem:[#allocation37_spill] sm:$0xff] %v3316_v30  ;;  %5043 = vst [vmem:[#allocation39_spill] sm:$0xff] %v3332_v48  ;;  %v3346_v30 = vrot.slane %v3146_v5, %v3018_v28  ;;  %v3380_v5 = vrot.slane %v3192_v21, %v3018_v28  ;;  %v531_v60 = vmul.f32 %v3153_v8, %v3053_v45 }
  0xb2   : > { %1115 = vbcast.lane.b32.xlu0 %v1062_v35, 257  ;;  %1139 = vbcast.lane.b32.xlu1 %v1089_v36, 257  ;;  %5046 = vst [vmem:[#allocation42_spill] sm:$0xff] %v3354_v59  ;;  %5047 = vst [vmem:[#allocation43_spill] sm:$0xff] %v3358_v46  ;;  %v3366_v35 = vrot.slane %v3192_v21, %v3011_v25  ;;  %v480_v36 = vmul.f32 %v3168_v14, %v3111_v54 }
  0xb3   : > { %5044 = vst [vmem:[#allocation40_spill] sm:$0xff] %v3346_v30  ;;  %v487_v30 = vadd.f32 %v479_v56, %v403_v51  ;;  %5050 = vst [vmem:[#allocation46_spill] sm:$0xff] %v3376_v4  ;;  %v481_v56 = vmul.f32 %v3168_v14, %v3119_v58  ;;  %v3388_v51 = vrot.slane %v3161_v11, %v3039_v38 }
  0xb4   : > { %5049 = vst [vmem:[#allocation45_spill] sm:$0xff] %v3366_v35  ;;  %v3370_v50 = vpop.permute.xlu1 %611  ;;  %v3372_v18 = vpop.permute.xlu0 %509  ;;  %5051 = vst [vmem:[#allocation47_spill] sm:$0xff] %v3380_v5  ;;  %v3392_v35 = vrot.slane %v3192_v21, %v3039_v38  ;;  %v404_v4 = vmul.f32 %v3156_v10, %v3079_v49  ;;  %v3398_v5 = vmul.f32 %v3165_v12, %v3079_v49 }
  0xb5   : > { %5052 = vst [vmem:[#allocation48_spill] sm:$0xff] %v3388_v51  ;;  %v405_v45 = vmul.f32 %v3156_v10, %v3109_v53  ;;  %v583_v28 = vmul.f32 %v3179_v17, %v3117_v57  ;;  %v3407_v11 = vmul.f32 %v3165_v12, %v3109_v53  ;;  %v3411_v21 = vmul.f32 %v3172_v15, %v3109_v53 }
  0xb6   : > { %5053 = vst [vmem:[#allocation49_spill] sm:$0xff] %v3392_v35  ;;  %1166 = vbcast.lane.b32.xlu0 %v3256_v47, 256  ;;  %v533_v49 = vmul.f32 %v3153_v8, %v3127_v61  ;;  %v532_v35 = vmul.f32 %v3153_v8, %v3129_v62  ;;  %1193 = vbcast.lane.b32.xlu1 %v3260_v55, 256 }
  0xb7   : > { %5054 = vst [vmem:[#allocation50_spill] sm:$0xff] %v3407_v11  ;;  %5055 = vst [vmem:[#allocation51_spill] sm:$0xff] %v3411_v21  ;;  %v488_v51 = vadd.f32 %v480_v36, %v404_v4  ;;  %v3420_v57 = vmul.f32 %v3176_v16, %v3111_v54  ;;  %v539_v38 = vadd.f32 %v531_v60, %v487_v30 }
  0xb8   : > { %v659_v11 = vmul.f32 %v3203_v24, %v3150_v7  ;;  %v3424_v46 = vpop.permute.xlu1 %618  ;;  %v3426_v53 = vpop.permute.xlu0 %513  ;;  %v489_v21 = vadd.f32 %v481_v56, %v405_v45  ;;  %v3430_v59 = vmul.f32 %v3176_v16, %v3119_v58  ;;  %v3434_v36 = vmul.f32 %v3183_v19, %v3119_v58 }
  0xb9   : > { %v535_v54 = vmul.f32 %v3153_v8, %v3426_v53  ;;  %v591_v30 = vadd.f32 %v583_v28, %v539_v38  ;;  %v3440_v7 = vmul.f32 %v3187_v20, %v3127_v61  ;;  %v3444_v60 = vmul.f32 %v3196_v22, %v3127_v61 }
  0xba   : > { %5056 = vst [vmem:[#allocation52_spill] sm:$0xff] %v3430_v59  ;;  %5057 = vst [vmem:[#allocation53_spill] sm:$0xff] %v3434_v36  ;;  %v584_v4 = vmul.f32 %v3179_v17, %v3209_v27  ;;  %1217 = vbcast.lane.b32.xlu0 %v3256_v47, 257  ;;  %v541_v56 = vadd.f32 %v533_v49, %v489_v21  ;;  %v540_v58 = vadd.f32 %v532_v35, %v488_v51  ;;  %v3568_v36 = vld [vmem:[#allocation2] sm:$0xff]  ;;  %v3570_v59 = vld [vmem:[#allocation2 + $0x8] sm:$0x3] }
  0xbb   : > { %5058 = vst [vmem:[#allocation54_spill] sm:$0xff] %v3440_v7  ;;  %5059 = vst [vmem:[#allocation55_spill] sm:$0xff] %v3444_v60  ;;  %v3451_v45 = vmul.f32 %v3187_v20, %v3129_v62  ;;  %v3453_v28 = vadd.f32 %v535_v54, %v491_v1  ;;  %1241 = vbcast.lane.b32.xlu1 %v3260_v55, 257  ;;  %v3458_v38 = vmul.f32 %v3165_v12, %v3148_v6 }
  0xbc   : > { %v3462_v61 = vmul.f32 %v3172_v15, %v3148_v6  ;;  %v3466_v47 = vmul.f32 %v3200_v23, %v3148_v6  ;;  %v667_v35 = vadd.f32 %v659_v11, %v591_v30  ;;  %v384_v51 = vpop.permute.xlu1 %383  ;;  %v754_v62 = vpop.permute.xlu0 %753  ;;  %v3470_v1 = vmul.f32 %v3207_v26, %v3209_v27 }
  0xbd   : > { %5060 = vst [vmem:[#allocation56_spill] sm:$0xff] %v3458_v38  ;;  %v3474_v55 = vmul.f32 %v3176_v16, %v3211_v29  ;;  %v3478_v21 = vmul.f32 %v3183_v19, %v3211_v29  ;;  %v735_v49 = vmul.f32 %v3236_v39, %v3310_v41  ;;  %v592_v6 = vadd.f32 %v584_v4, %v540_v58 }
  0xbe   : > { %5061 = vst [vmem:[#allocation57_spill] sm:$0xff] %v3462_v61  ;;  %5062 = vst [vmem:[#allocation58_spill] sm:$0xff] %v3466_v47  ;;  %v3484_v11 = vmul.f32 %v3217_v31, %v3211_v29  ;;  %v3488_v27 = vmul.f32 %v3176_v16, %v3246_v42  ;;  %v585_v54 = vmul.f32 %v3179_v17, %v3312_v40  ;;  %1268 = vbcast.lane.b32.xlu0 %v3277_v32, 256 }
  0xbf   : > { %5063 = vst [vmem:[#allocation59_spill] sm:$0xff] %v3474_v55  ;;  %5064 = vst [vmem:[#allocation60_spill] sm:$0xff] %v3478_v21  ;;  %v3495_v30 = vmul.f32 %v3183_v19, %v3246_v42  ;;  %v3499_v41 = vmul.f32 %v3217_v31, %v3246_v42  ;;  %v3503_v29 = vmul.f32 %v3223_v33, %v3246_v42  ;;  %1295 = vbcast.lane.b32.xlu1 %v3283_v2, 256  ;;  %v5075_v21 = vld [vmem:[#allocation27_spill] sm:$0xff]  ;;  %v5077_v55 = vld [vmem:[#allocation28_spill] sm:$0xff] }
  0xc0   : > { %5065 = vst [vmem:[#allocation61_spill] sm:$0xff] %v3484_v11  ;;  %5066 = vst [vmem:[#allocation62_spill] sm:$0xff] %v3488_v27  ;;  %v3507_v4 = vmul.f32 %v3165_v12, %v3248_v43  ;;  %v3512_v58 = vmul.f32 %v3172_v15, %v3248_v43  ;;  %v534_v42 = vmul.f32 %v3153_v8, %v3372_v18  ;;  %v460_v27 = vpop.permute.xlu0 %459 }
  0xc1   : > { %5067 = vst [vmem:[#allocation63_spill] sm:$0xff] %v3495_v30  ;;  %5068 = vst [vmem:[#allocation64_spill] sm:$0xff] %v3499_v41  ;;  %v3516_v30 = vmul.f32 %v3200_v23, %v3248_v43  ;;  %v660_v41 = vmul.f32 %v3203_v24, %v3370_v50  ;;  %v743_v11 = vadd.f32 %v735_v49, %v667_v35 }
  0xc2   : > { %5069 = vst [vmem:[#allocation65_spill] sm:$0xff] %v3503_v29  ;;  %5070 = vst [vmem:[#allocation66_spill] sm:$0xff] %v3507_v4  ;;  %v562_v29 = vpop.permute.xlu1 %561  ;;  %v3525_v4 = vld [vmem:[%s4921_s3] sm:$0xff]  ;;  %v3537_v47 = vmul.f32 %v5075_v21, %v3312_v40  ;;  %v593_v61 = vadd.f32 %v585_v54, %v541_v56  ;;  %v3541_v60 = vmul.f32 %v5077_v55, %v3370_v50  ;;  %1319 = vbcast.lane.b32.xlu0 %v3277_v32, 257  ;;  %v5081_v50 = vld [vmem:[#allocation7_spill] sm:$0xff] }
  0xc3   : > { %5071 = vst [vmem:[#allocation67_spill] sm:$0xff] %v3512_v58  ;;  %5072 = vst [vmem:[#allocation68_spill] sm:$0xff] %v3516_v30  ;;  %v3529_v58 = vmul.f32 %v3227_v34, %v3248_v43  ;;  %v3533_v30 = vmul.f32 %v3207_v26, %v3312_v40  ;;  %v408_v7 = vmul.f32 %v3156_v10, %v384_v51  ;;  %1343 = vbcast.lane.b32.xlu1 %v3283_v2, 257  ;;  %v5083_v54 = vld [vmem:[#allocation26_spill] sm:$0xff] }
  0xc4   : > { %5076 = vst [vmem:[#allocation71_spill] sm:$0xff] %v3537_v47  ;;  %5078 = vst [vmem:[#allocation72_spill] sm:$0xff] %v3541_v60  ;;  %v484_v38 = vmul.f32 %v3168_v14, %v460_v27  ;;  %v3548_v43 = vmul.f32 %v3187_v20, %v3372_v18  ;;  %v3552_v35 = vmul.f32 %v3196_v22, %v3372_v18 }
  0xc5   : > { %5073 = vst [vmem:[#allocation69_spill] sm:$0xff] %v3529_v58  ;;  %5074 = vst [vmem:[#allocation70_spill] sm:$0xff] %v3533_v30  ;;  %v661_v40 = vmul.f32 %v3203_v24, %v3424_v46  ;;  %v3559_v56 = vrot.slane %v3525_v4, %v5081_v50  ;;  %v668_v49 = vadd.f32 %v660_v41, %v592_v6  ;;  %v5084_v58 = vld [vmem:[#allocation29_spill] sm:$0xff]  ;;  %v5087_v6 = vld [vmem:[#allocation30_spill] sm:$0xff] }
  0xc6   : > { %5079 = vst [vmem:[#allocation73_spill] sm:$0xff] %v3548_v43  ;;  %5080 = vst [vmem:[#allocation74_spill] sm:$0xff] %v3552_v35  ;;  %v542_v32 = vadd.f32 %v534_v42, %v5083_v54  ;;  %v3564_v47 = vmul.f32 %v5084_v58, %v3372_v18  ;;  %v3566_v43 = vadd.f32 %v484_v38, %v408_v7  ;;  %v391_v30 = vpop.permute.xlu1 %390  ;;  %v688_v35 = vpop.permute.xlu0 %687  ;;  %v5089_v42 = vld [vmem:[#allocation32_spill] sm:$0xff]  ;;  %v5090_v18 = vld [vmem:[#allocation6_spill] sm:$0xff] }
  0xc7   : > { %5082 = vst [vmem:[#allocation7_spill] sm:$0xff] %v3559_v56  ;;  %v3574_v2 = vmul.f32 %v5077_v55, %v3424_v46  ;;  %v3578_v41 = vmul.f32 %v5087_v6, %v3424_v46  ;;  %v787_v50 = vmul.f32 %v5089_v42, %v754_v62  ;;  %v3583_v7 = vrot.slane %v3525_v4, %v5090_v18  ;;  %v5095_v46 = vld [vmem:[#allocation31_spill] sm:$0xff] }
  0xc8   : > { %5085 = vst [vmem:[#allocation26_spill] sm:$0xff] %v3564_v47  ;;  %v3587_v38 = vmul.f32 %v3187_v20, %v3426_v53  ;;  %v3591_v54 = vmul.f32 %v3196_v22, %v3426_v53  ;;  %v3595_v47 = vmul.f32 %v5084_v58, %v3426_v53  ;;  %v5097_v62 = vld [vmem:[#allocation35_spill] sm:$0xff]  ;;  %v3602_v18 = vadd.f32 %v661_v40, %v593_v61 }
  0xc9   : > { %5086 = vst [vmem:[#allocation75_spill] sm:$0xff] %v3574_v2  ;;  %5088 = vst [vmem:[#allocation76_spill] sm:$0xff] %v3578_v41  ;;  %v3599_v41 = vmul.f32 %v5095_v46, %v3426_v53  ;;  %1370 = vbcast.lane.b32.xlu0 %v5097_v62, 256  ;;  %v586_v2 = vmul.f32 %v3179_v17, %v562_v29  ;;  %1397 = vbcast.lane.b32.xlu1 %v3299_v44, 256 }
  0xca   : > { %5091 = vst [vmem:[#allocation32_spill] sm:$0xff] %v3583_v7  ;;  %5092 = vst [vmem:[#allocation6_spill] sm:$0xff] %v3587_v38  ;;  %v3608_v38 = vmul.f32 %v3559_v56, %v3568_v36  ;;  %v3618_v53 = vmul.f32 %v3172_v15, %v384_v51  ;;  %v3621_v61 = vmul.f32 %v3200_v23, %v384_v51  ;;  %v467_v25 = vpop.permute.xlu0 %466 }
  0xcb   : > { %5093 = vst [vmem:[#allocation77_spill] sm:$0xff] %v3591_v54  ;;  %5094 = vst [vmem:[#allocation78_spill] sm:$0xff] %v3595_v47  ;;  %v3612_v54 = vmul.f32 %v3559_v56, %v3570_v59  ;;  %v3615_v47 = vmul.f32 %v3165_v12, %v384_v51  ;;  %v3624_v40 = vmul.f32 %v3227_v34, %v384_v51 }
  0xcc   : > { %5096 = vst [vmem:[#allocation79_spill] sm:$0xff] %v3599_v41  ;;  %5099 = vst [vmem:[#allocation80_spill] sm:$0xff] %v3618_v53  ;;  %v566_v41 = vpop.permute.xlu1 %565  ;;  %v795_v48 = vadd.f32 %v787_v50, %v743_v11  ;;  %v3627_v60 = vmul.f32 %v3207_v26, %v562_v29  ;;  %v3630_v56 = vmul.f32 %v5075_v21, %v562_v29  ;;  %v5103_v53 = vld [vmem:[#allocation33_spill] sm:$0xff] }
  0xcd   : > { %5098 = vst [vmem:[#allocation35_spill] sm:$0xff] %v3615_v47  ;;  %5100 = vst [vmem:[#allocation81_spill] sm:$0xff] %v3621_v61  ;;  %v3634_v47 = vmul.f32 %v3583_v7, %v3568_v36  ;;  %v3637_v46 = vmul.f32 %v5103_v53, %v562_v29  ;;  %v409_v61 = vmul.f32 %v3156_v10, %v391_v30  ;;  %1421 = vbcast.lane.b32.xlu0 %v5097_v62, 257 }
  0xce   : > { %5101 = vst [vmem:[#allocation82_spill] sm:$0xff] %v3624_v40  ;;  %5102 = vst [vmem:[#allocation83_spill] sm:$0xff] %v3630_v56  ;;  %v736_v51 = vmul.f32 %v3236_v39, %v688_v35  ;;  %v485_v40 = vmul.f32 %v3168_v14, %v467_v25  ;;  %v3643_v11 = vadd.f32 %v586_v2, %v542_v32  ;;  %1445 = vbcast.lane.b32.xlu1 %v3299_v44, 257 }
  0xcf   : > { %5104 = vst [vmem:[#allocation84_spill] sm:$0xff] %v3637_v46  ;;  %v3646_v50 = vmul.f32 %v3176_v16, %v460_v27  ;;  %v3649_v56 = vmul.f32 %v3183_v19, %v460_v27  ;;  %v3652_v7 = vmul.f32 %v3217_v31, %v460_v27  ;;  %v3656_v29 = vmul.f32 %v3223_v33, %v460_v27 }
  0xd0   : > { %v3659_v46 = vmul.f32 %v3165_v12, %v391_v30  ;;  %v3662_v32 = vmul.f32 %v3172_v15, %v391_v30  ;;  %v3664_v2 = vadd.f32 %v485_v40, %v409_v61  ;;  %v806_v62 = vpop.permute.xlu1 %805  ;;  %v587_v44 = vmul.f32 %v3179_v17, %v566_v41 }
  0xd1   : > { %5105 = vst [vmem:[#allocation85_spill] sm:$0xff] %v3646_v50  ;;  %5106 = vst [vmem:[#allocation86_spill] sm:$0xff] %v3649_v56  ;;  %v695_v50 = vpop.permute.xlu0 %694  ;;  %v3667_v56 = vmul.f32 %v3200_v23, %v391_v30  ;;  %v839_v27 = vmul.f32 %v3306_v3, %v806_v62  ;;  %v3680_v61 = vmul.f32 %v3207_v26, %v566_v41  ;;  %1472 = vbcast.lane.b32.xlu0 %v3320_v9, 256 }
  0xd2   : > { %5107 = vst [vmem:[#allocation87_spill] sm:$0xff] %v3652_v7  ;;  %5108 = vst [vmem:[#allocation88_spill] sm:$0xff] %v3656_v29  ;;  %v3670_v7 = vmul.f32 %v3227_v34, %v391_v30  ;;  %v3674_v29 = vadd.f32 %v736_v51, %v668_v49  ;;  %v3683_v40 = vmul.f32 %v5075_v21, %v566_v41  ;;  %1499 = vbcast.lane.b32.xlu1 %v3324_v63, 256  ;;  %v5117_v49 = vld [vmem:[#allocation8_spill] sm:$0xff] }
  0xd3   : > { %5109 = vst [vmem:[#allocation89_spill] sm:$0xff] %v3659_v46  ;;  %5110 = vst [vmem:[#allocation90_spill] sm:$0xff] %v3662_v32  ;;  %v5113_v46 = vld [vmem:[#allocation34_spill] sm:$0xff]  ;;  %v3687_v30 = vmul.f32 %v5103_v53, %v566_v41  ;;  %v3696_v51 = vmul.f32 %v3303_v37, %v566_v41  ;;  %v3699_v62 = vmul.f32 %v3176_v16, %v467_v25 }
  0xd4   : > { %5111 = vst [vmem:[#allocation91_spill] sm:$0xff] %v3667_v56  ;;  %5112 = vst [vmem:[#allocation92_spill] sm:$0xff] %v3670_v7  ;;  %v3677_v12 = vmul.f32 %v5113_v46, %v688_v35  ;;  %v847_v7 = vadd.f32 %v839_v27, %v795_v48  ;;  %v737_v56 = vmul.f32 %v3236_v39, %v695_v50  ;;  %v626_v32 = vpop.permute.xlu1 %625  ;;  %v1805_v48 = vrot.slane %v3612_v54, 1  ;;  %v2288_v41 = vld [vmem:[%s4923_s5] sm:$0xff] }
  0xd5   : > { %5114 = vst [vmem:[#allocation93_spill] sm:$0xff] %v3680_v61  ;;  %5115 = vst [vmem:[#allocation94_spill] sm:$0xff] %v3683_v40  ;;  %v3693_v35 = vrot.slane %v3525_v4, %v5117_v49  ;;  %v518_v40 = vpop.permute.xlu0 %517  ;;  %v1804_v61 = vrot.slane %v3608_v38, 1  ;;  %v3704_v27 = vadd.f32 %v587_v44, %v3453_v28  ;;  %v3717_v38 = vmul.f32 %v3217_v31, %v467_v25  ;;  %v5124_v44 = vld [vmem:[#allocation37_spill] sm:$0xff] }
  0xd6   : > { %5116 = vst [vmem:[#allocation95_spill] sm:$0xff] %v3687_v30  ;;  %5119 = vst [vmem:[#allocation96_spill] sm:$0xff] %v3696_v51  ;;  %v3707_v30 = vmul.f32 %v3183_v19, %v467_v25  ;;  %v874_v49 = vadd.f32 %v3398_v5, %v847_v7  ;;  %v3720_v28 = vmul.f32 %v3223_v33, %v467_v25  ;;  %1523 = vbcast.lane.b32.xlu0 %v3320_v9, 257  ;;  %v2291_v9 = vld [vmem:[%s4923_s5 + $0x18] sm:$0xff] }
  0xd7   : > { %5118 = vst [vmem:[#allocation8_spill] sm:$0xff] %v3693_v35  ;;  %5120 = vst [vmem:[#allocation97_spill] sm:$0xff] %v3699_v62  ;;  %v2289_v62 = vld [vmem:[%s4923_s5 + $0x8] sm:$0xff]  ;;  %v3723_v54 = vmul.f32 %v5113_v46, %v695_v50  ;;  %v3726_v5 = vmul.f32 %v5124_v44, %v695_v50  ;;  %v662_v51 = vmul.f32 %v3203_v24, %v626_v32  ;;  %1547 = vbcast.lane.b32.xlu1 %v3324_v63, 257  ;;  %v2290_v50 = vld [vmem:[%s4923_s5 + $0x10] sm:$0xff] }
  0xd8   : > { %5121 = vst [vmem:[#allocation98_spill] sm:$0xff] %v3707_v30  ;;  %5122 = vst [vmem:[#allocation99_spill] sm:$0xff] %v3717_v38  ;;  %v901_v7 = vadd.f32 %v3420_v57, %v874_v49  ;;  %v3731_v30 = vadd.f32 %v737_v56, %v3602_v18  ;;  %v1848_v25 = vmul.f32 %v3693_v35, %v3568_v36 }
  0xd9   : > { %5123 = vst [vmem:[#allocation100_spill] sm:$0xff] %v3720_v28  ;;  %v522_v28 = vpop.permute.xlu1 %521  ;;  %v758_v38 = vpop.permute.xlu0 %757  ;;  %v2710_v34 = vpack.c.bf16 %v2289_v62, %v2288_v41  ;;  %v1806_v57 = vsel %vm1803_vm2, %v1804_v61, %v1805_v48  ;;  %v1849_v56 = vmul.f32 %v3693_v35, %v3570_v59  ;;  %v3748_v36 = vmul.f32 %v5077_v55, %v626_v32  ;;  %v5127_v41 = vld [vmem:[#allocation38_spill] sm:$0xff] }
  0xda   : > { %v925_v63 = vadd.f32 %v3451_v45, %v901_v7  ;;  %v536_v18 = vmul.f32 %v3153_v8, %v518_v40  ;;  %v3753_v62 = vrot.slane %v3525_v4, %v2983_v13  ;;  %v3756_v49 = vmul.f32 %v5087_v6, %v626_v32  ;;  %1574 = vbcast.lane.b32.xlu0 %v3336_v0, 256 }
  0xdb   : > { %v3759_v61 = vmul.f32 %v5127_v41, %v626_v32  ;;  %v3762_v59 = vmul.f32 %v3187_v20, %v518_v40  ;;  %v3765_v45 = vmul.f32 %v3196_v22, %v518_v40  ;;  %v670_v48 = vadd.f32 %v662_v51, %v3643_v11  ;;  %1601 = vbcast.lane.b32.xlu1 %v3342_v52, 256  ;;  %v2292_v11 = vld [vmem:[%s4923_s5 + $0x20] sm:$0xff] }
  0xdc   : > { %5125 = vst [vmem:[#allocation101_spill] sm:$0xff] %v3753_v62  ;;  %5126 = vst [vmem:[#allocation102_spill] sm:$0xff] %v3756_v49  ;;  %v949_v7 = vadd.f32 %v3470_v1, %v925_v63  ;;  %2711 = vmatprep.subr.bf16.mxu0 %v2710_v34  ;;  %v2714_v13 = vpack.c.bf16 %v2291_v9, %v2290_v50  ;;  %v1881_v35 = vrot.slane %v1848_v25, 2  ;;  %v2293_v1 = vld [vmem:[%s4923_s5 + $0x28] sm:$0xff]  ;;  %v1882_v51 = vrot.slane %v1849_v56, 2  ;;  %v5134_v63 = vld [vmem:[#allocation72_spill] sm:$0xff] }
  0xdd   : > { %5128 = vst [vmem:[#allocation38_spill] sm:$0xff] %v3759_v61  ;;  %5129 = vst [vmem:[#allocation103_spill] sm:$0xff] %v3762_v59  ;;  %v3772_v32 = vmul.f32 %v5084_v58, %v518_v40  ;;  %v537_v62 = vmul.f32 %v3153_v8, %v522_v28  ;;  %v788_v59 = vmul.f32 %v5089_v42, %v758_v38  ;;  %v762_v61 = vpop.permute.xlu1 %761  ;;  %2713 = vmatpush3.bf16.msra.mxu0 %v2710_v34  ;;  %v5132_v50 = vld [vmem:[#allocation31_spill] sm:$0xff] }
  0xde   : > { %5130 = vst [vmem:[#allocation104_spill] sm:$0xff] %v3765_v45  ;;  %v633_v45 = vpop.permute.xlu0 %632  ;;  %v544_v25 = vadd.f32 %v536_v18, %v3566_v43  ;;  %v3784_v9 = vmul.f32 %v5132_v50, %v518_v40  ;;  %2715 = vmatprep.subr.bf16.mxu0 %v2714_v13  ;;  %v1836_v49 = vadd.f32 %v1806_v57, %v3634_v47  ;;  %v5139_v43 = vld [vmem:[#allocation39_spill] sm:$0xff] }
  0xdf   : > { %5131 = vst [vmem:[#allocation105_spill] sm:$0xff] %v3772_v32  ;;  %v976_v32 = vadd.f32 %v5134_v63, %v949_v7  ;;  %v3789_v34 = vmul.f32 %v3187_v20, %v522_v28  ;;  %v3792_v8 = vmul.f32 %v3196_v22, %v522_v28  ;;  %v3795_v23 = vmul.f32 %v5084_v58, %v522_v28 }
  0xe0   : > { %5133 = vst [vmem:[#allocation106_spill] sm:$0xff] %v3784_v9  ;;  %v3798_v56 = vmul.f32 %v5132_v50, %v522_v28  ;;  %1625 = vbcast.lane.b32.xlu0 %v3336_v0, 257  ;;  %v1019_v40 = vmul.f32 %v5139_v43, %v758_v38  ;;  %v789_v18 = vmul.f32 %v5089_v42, %v762_v61  ;;  %v5183_v50 = vld [vmem:[#allocation73_spill] sm:$0xff] }
  0xe1   : > { %5135 = vst [vmem:[#allocation72_spill] sm:$0xff] %v3789_v34  ;;  %5136 = vst [vmem:[#allocation107_spill] sm:$0xff] %v3792_v8  ;;  %v663_v47 = vmul.f32 %v3203_v24, %v633_v45  ;;  %1649 = vbcast.lane.b32.xlu1 %v3342_v52, 257  ;;  %v2718_v57 = vpack.c.bf16 %v2293_v1, %v2292_v11  ;;  %v545_v7 = vadd.f32 %v537_v62, %v3664_v2  ;;  %v702_v8 = vpop.permute.xlu1 %701  ;;  %v5141_v52 = vld [vmem:[#allocation9_spill] sm:$0xff]  ;;  %v5143_v2 = vld [vmem:[#allocation10_spill] sm:$0xff] }
  0xe2   : > { %5137 = vst [vmem:[#allocation108_spill] sm:$0xff] %v3795_v23  ;;  %5138 = vst [vmem:[#allocation109_spill] sm:$0xff] %v3798_v56  ;;  %v1003_v63 = vadd.f32 %v3677_v12, %v976_v32  ;;  %v796_v23 = vadd.f32 %v788_v59, %v3674_v29  ;;  %v570_v28 = vpop.permute.xlu0 %569  ;;  %2717 = vmatpush3.bf16.msra.mxu0 %v2714_v13  ;;  %v1883_v0 = vsel %vm1880_vm3, %v1881_v35, %v1882_v51  ;;  %v5140_v56 = vld [vmem:[#allocation40_spill] sm:$0xff]  ;;  %v5148_v32 = vld [vmem:[#allocation41_spill] sm:$0xff] }
  0xe3   : > { %v3810_v38 = vmul.f32 %v5139_v43, %v762_v61  ;;  %v3813_v9 = vmul.f32 %v5140_v56, %v762_v61  ;;  %2719 = vmatprep.subr.bf16.mxu0 %v2718_v57  ;;  %v3817_v11 = vrot.slane %v3525_v4, %v5141_v52  ;;  %v3821_v12 = vrot.slane %v3525_v4, %v5143_v2 }
  0xe4   : > { %v3824_v29 = vmul.f32 %v5077_v55, %v633_v45  ;;  %v3827_v35 = vmul.f32 %v5087_v6, %v633_v45  ;;  %v3830_v62 = vmul.f32 %v5127_v41, %v633_v45  ;;  %v738_v61 = vmul.f32 %v3236_v39, %v702_v8 }
  0xe5   : > { %5142 = vst [vmem:[#allocation40_spill] sm:$0xff] %v3817_v11  ;;  %5144 = vst [vmem:[#allocation9_spill] sm:$0xff] %v3821_v12  ;;  %v797_v59 = vadd.f32 %v789_v18, %v3731_v30  ;;  %v671_v13 = vadd.f32 %v663_v47, %v3704_v27  ;;  %v3836_v1 = vmul.f32 %v5148_v32, %v633_v45  ;;  %v574_v11 = vpop.permute.xlu1 %573  ;;  %v5151_v30 = vld [vmem:[#allocation42_spill] sm:$0xff] }
  0xe6   : > { %5145 = vst [vmem:[#allocation10_spill] sm:$0xff] %v3824_v29  ;;  %5146 = vst [vmem:[#allocation110_spill] sm:$0xff] %v3827_v35  ;;  %v588_v51 = vmul.f32 %v3179_v17, %v570_v28  ;;  %v1027_v52 = vadd.f32 %v1019_v40, %v1003_v63  ;;  %v3840_v2 = vmul.f32 %v5113_v46, %v702_v8  ;;  %v810_v34 = vpop.permute.xlu0 %809  ;;  %2721 = vmatpush3.bf16.msra.mxu0 %v2718_v57  ;;  %v5155_v57 = vld [vmem:[#allocation43_spill] sm:$0xff] }
  0xe7   : > { %5147 = vst [vmem:[#allocation111_spill] sm:$0xff] %v3830_v62  ;;  %5149 = vst [vmem:[#allocation41_spill] sm:$0xff] %v3836_v1  ;;  %v3843_v12 = vmul.f32 %v5124_v44, %v702_v8  ;;  %v3845_v62 = vadd.f32 %v1883_v0, %v1836_v49  ;;  %v3848_v18 = vmul.f32 %v5151_v30, %v702_v8  ;;  %v5182_v29 = vld [vmem:[#allocation71_spill] sm:$0xff] }
  0xe8   : > { %v3851_v27 = vmul.f32 %v3207_v26, %v570_v28  ;;  %v3854_v45 = vmul.f32 %v5075_v21, %v570_v28  ;;  %v589_v40 = vmul.f32 %v3179_v17, %v574_v11  ;;  %v746_v47 = vadd.f32 %v738_v61, %v670_v48 }
  0xe9   : > { %5150 = vst [vmem:[#allocation112_spill] sm:$0xff] %v3845_v62  ;;  %v3858_v63 = vmul.f32 %v5103_v53, %v570_v28  ;;  %v840_v1 = vmul.f32 %v3306_v3, %v810_v34  ;;  %v1043_v49 = vmul.f32 %v5155_v57, %v810_v34  ;;  %v596_v0 = vadd.f32 %v588_v51, %v544_v25  ;;  %v814_v17 = vpop.permute.xlu1 %813 }
  0xea   : > { %5152 = vst [vmem:[#allocation113_spill] sm:$0xff] %v3851_v27  ;;  %5153 = vst [vmem:[#allocation114_spill] sm:$0xff] %v3854_v45  ;;  %v3863_v8 = vmul.f32 %v3303_v37, %v570_v28  ;;  %v3866_v62 = vmul.f32 %v3207_v26, %v574_v11  ;;  %v3869_v27 = vmul.f32 %v5075_v21, %v574_v11  ;;  %v709_v34 = vpop.permute.xlu0 %708 }
  0xeb   : > { %5154 = vst [vmem:[#allocation115_spill] sm:$0xff] %v3858_v63  ;;  %v3872_v45 = vmul.f32 %v5103_v53, %v574_v11  ;;  %v3875_v48 = vmul.f32 %v3303_v37, %v574_v11  ;;  %v848_v61 = vadd.f32 %v840_v1, %v796_v23  ;;  %v1051_v63 = vadd.f32 %v1043_v49, %v1027_v52  ;;  %v5165_v23 = vld [vmem:[#allocation12_spill] sm:$0xff] }
  0xec   : > { %5156 = vst [vmem:[#allocation43_spill] sm:$0xff] %v3863_v8  ;;  %5157 = vst [vmem:[#allocation116_spill] sm:$0xff] %v3866_v62  ;;  %v3877_v25 = vadd.f32 %v589_v40, %v545_v7  ;;  %v841_v28 = vmul.f32 %v3306_v3, %v814_v17  ;;  %v739_v51 = vmul.f32 %v3236_v39, %v709_v34  ;;  %v5161_v8 = vld [vmem:[#allocation11_spill] sm:$0xff]  ;;  %v5167_v52 = vld [vmem:[#allocation44_spill] sm:$0xff] }
  0xed   : > { %5158 = vst [vmem:[#allocation117_spill] sm:$0xff] %v3869_v27  ;;  %5159 = vst [vmem:[#allocation118_spill] sm:$0xff] %v3872_v45  ;;  %v3883_v62 = vrot.slane %v3525_v4, %v5161_v8  ;;  %v5163_v27 = vld [vmem:[#allocation50_spill] sm:$0xff]  ;;  %v5164_v45 = vld [vmem:[#allocation51_spill] sm:$0xff]  ;;  %v1044_v11 = vmul.f32 %v5155_v57, %v814_v17  ;;  %v3890_v1 = vrot.slane %v3525_v4, %v5165_v23  ;;  %v766_v37 = vpop.permute.xlu1 %765 }
  0xee   : > { %5160 = vst [vmem:[#allocation119_spill] sm:$0xff] %v3875_v48  ;;  %v875_v53 = vadd.f32 %v5163_v27, %v848_v61  ;;  %v1078_v21 = vadd.f32 %v5164_v45, %v1051_v63  ;;  %v849_v7 = vadd.f32 %v841_v28, %v797_v59  ;;  %v1247_v40 = vmul.f32 %v5167_v52, %v814_v17  ;;  %v5170_v8 = vld [vmem:[#allocation52_spill] sm:$0xff]  ;;  %v5171_v27 = vld [vmem:[#allocation53_spill] sm:$0xff]  ;;  %v640_v4 = vpop.permute.xlu0 %639 }
  0xef   : > { %5162 = vst [vmem:[#allocation11_spill] sm:$0xff] %v3883_v62  ;;  %5166 = vst [vmem:[#allocation50_spill] sm:$0xff] %v3890_v1  ;;  %v3894_v49 = vmul.f32 %v5113_v46, %v709_v34  ;;  %v3897_v48 = vmul.f32 %v5124_v44, %v709_v34  ;;  %v747_v45 = vadd.f32 %v739_v51, %v671_v13  ;;  %v5173_v23 = vld [vmem:[#allocation56_spill] sm:$0xff]  ;;  %v5174_v28 = vld [vmem:[#allocation45_spill] sm:$0xff] }
  0xf0   : > { %v902_v62 = vadd.f32 %v5170_v8, %v875_v53  ;;  %v1105_v61 = vadd.f32 %v5171_v27, %v1078_v21  ;;  %v3902_v63 = vmul.f32 %v5151_v30, %v709_v34  ;;  %v876_v59 = vadd.f32 %v5173_v23, %v849_v7  ;;  %v5177_v53 = vld [vmem:[#allocation55_spill] sm:$0xff]  ;;  %v5180_v7 = vld [vmem:[#allocation46_spill] sm:$0xff] }
  0xf1   : > { %5168 = vst [vmem:[#allocation51_spill] sm:$0xff] %v3894_v49  ;;  %5169 = vst [vmem:[#allocation12_spill] sm:$0xff] %v3897_v48  ;;  %v3906_v17 = vmul.f32 %v5174_v28, %v709_v34  ;;  %v790_v1 = vmul.f32 %v5089_v42, %v766_v37  ;;  %v1021_v26 = vmul.f32 %v5139_v43, %v766_v37  ;;  %v5176_v48 = vld [vmem:[#allocation54_spill] sm:$0xff]  ;;  %v5179_v51 = vld [vmem:[#allocation59_spill] sm:$0xff] }
  0xf2   : > { %5172 = vst [vmem:[#allocation44_spill] sm:$0xff] %v3902_v63  ;;  %v926_v49 = vadd.f32 %v5176_v48, %v902_v62  ;;  %v1129_v8 = vadd.f32 %v5177_v53, %v1105_v61  ;;  %v3913_v21 = vmul.f32 %v5140_v56, %v766_v37  ;;  %v664_v13 = vmul.f32 %v3203_v24, %v640_v4  ;;  %v474_v53 = vpop.permute.xlu1 %473 }
  0xf3   : > { %5175 = vst [vmem:[#allocation52_spill] sm:$0xff] %v3906_v17  ;;  %v903_v27 = vadd.f32 %v5179_v51, %v876_v59  ;;  %v798_v63 = vadd.f32 %v790_v1, %v746_v47  ;;  %v3918_v23 = vmul.f32 %v5180_v7, %v766_v37  ;;  %v3921_v34 = vmul.f32 %v5077_v55, %v640_v4  ;;  %v5181_v17 = vld [vmem:[#allocation70_spill] sm:$0xff]  ;;  %v5185_v59 = vld [vmem:[#allocation75_spill] sm:$0xff] }
  0xf4   : > { %5178 = vst [vmem:[#allocation53_spill] sm:$0xff] %v3913_v21  ;;  %v950_v35 = vadd.f32 %v5181_v17, %v926_v49  ;;  %v1153_v62 = vadd.f32 %v5182_v29, %v1129_v8  ;;  %v672_v48 = vadd.f32 %v664_v13, %v596_v0  ;;  %v3926_v61 = vmul.f32 %v5087_v6, %v640_v4  ;;  %v398_v21 = vpop.permute.xlu0 %397  ;;  %v5186_v17 = vld [vmem:[#allocation76_spill] sm:$0xff] }
  0xf5   : > { %v927_v58 = vadd.f32 %v5183_v50, %v903_v27  ;;  %v3930_v47 = vmul.f32 %v5127_v41, %v640_v4  ;;  %v3933_v37 = vmul.f32 %v5148_v32, %v640_v4  ;;  %v486_v1 = vmul.f32 %v3168_v14, %v474_v53  ;;  %v5191_v27 = vld [vmem:[#allocation14_spill] sm:$0xff] }
  0xf6   : > { %v977_v49 = vadd.f32 %v5185_v59, %v950_v35  ;;  %v1180_v29 = vadd.f32 %v5186_v17, %v1153_v62  ;;  %v3939_v0 = vmul.f32 %v3176_v16, %v474_v53  ;;  %v3942_v8 = vmul.f32 %v3183_v19, %v474_v53  ;;  %v770_v17 = vpop.permute.xlu1 %769  ;;  %v5194_v19 = vld [vmem:[#allocation21_spill] sm:$0xff] }
  0xf7   : > { %5184 = vst [vmem:[#allocation56_spill] sm:$0xff] %v3933_v37  ;;  %v951_v50 = vadd.f32 %v3627_v60, %v927_v58  ;;  %v3946_v13 = vmul.f32 %v3217_v31, %v474_v53  ;;  %v3949_v4 = vmul.f32 %v3223_v33, %v474_v53  ;;  %v410_v14 = vmul.f32 %v3156_v10, %v398_v21 }
  0xf8   : > { %5187 = vst [vmem:[#allocation54_spill] sm:$0xff] %v3939_v0  ;;  %5188 = vst [vmem:[#allocation55_spill] sm:$0xff] %v3942_v8  ;;  %v1004_v35 = vadd.f32 %v3723_v54, %v977_v49  ;;  %v1207_v51 = vadd.f32 %v3726_v5, %v1180_v29  ;;  %v3955_v62 = vmul.f32 %v5191_v27, %v398_v21  ;;  %v647_v60 = vpop.permute.xlu0 %646  ;;  %v5196_v49 = vld [vmem:[#allocation25_spill] sm:$0xff] }
  0xf9   : > { %5189 = vst [vmem:[#allocation59_spill] sm:$0xff] %v3946_v13  ;;  %5190 = vst [vmem:[#allocation46_spill] sm:$0xff] %v3949_v4  ;;  %v3958_v59 = vmul.f32 %v3172_v15, %v398_v21  ;;  %v978_v58 = vadd.f32 %v3748_v36, %v951_v50  ;;  %v494_v31 = vadd.f32 %v486_v1, %v410_v14  ;;  %v5198_v14 = vld [vmem:[#allocation47_spill] sm:$0xff]  ;;  %v5205_v15 = vld [vmem:[#allocation60_spill] sm:$0xff] }
  0xfa   : > { %5192 = vst [vmem:[#allocation70_spill] sm:$0xff] %v3955_v62  ;;  %v3962_v53 = vmul.f32 %v5194_v19, %v398_v21  ;;  %v791_v10 = vmul.f32 %v5089_v42, %v770_v17  ;;  %v1028_v54 = vadd.f32 %v3810_v38, %v1004_v35  ;;  %v1231_v5 = vadd.f32 %v3813_v9, %v1207_v51  ;;  %v818_v35 = vpop.permute.xlu1 %817  ;;  %v5220_v62 = vld [vmem:[#allocation13_spill] sm:$0xff] }
  0xfb   : > { %5193 = vst [vmem:[#allocation71_spill] sm:$0xff] %v3958_v59  ;;  %v3968_v29 = vmul.f32 %v5196_v49, %v398_v21  ;;  %v3971_v33 = vmul.f32 %v5139_v43, %v770_v17  ;;  %v1005_v16 = vadd.f32 %v3840_v2, %v978_v58  ;;  %v3977_v36 = vmul.f32 %v5140_v56, %v770_v17 }
  0xfc   : > { %5195 = vst [vmem:[#allocation73_spill] sm:$0xff] %v3962_v53  ;;  %v3974_v4 = vadd.f32 %v791_v10, %v747_v45  ;;  %v3980_v1 = vmul.f32 %v5180_v7, %v770_v17  ;;  %v1052_v50 = vadd.f32 %v1044_v11, %v1028_v54  ;;  %v1255_v38 = vadd.f32 %v1247_v40, %v1231_v5  ;;  %v716_v51 = vpop.permute.xlu0 %715  ;;  %v5202_v10 = vld [vmem:[#allocation57_spill] sm:$0xff]  ;;  %v5203_v40 = vld [vmem:[#allocation58_spill] sm:$0xff] }
  0xfd   : > { %5197 = vst [vmem:[#allocation75_spill] sm:$0xff] %v3968_v29  ;;  %v3983_v9 = vmul.f32 %v5198_v14, %v770_v17  ;;  %v665_v21 = vmul.f32 %v3203_v24, %v647_v60  ;;  %v1029_v49 = vadd.f32 %v1021_v26, %v1005_v16  ;;  %v3987_v2 = vmul.f32 %v5077_v55, %v647_v60  ;;  %v5206_v53 = vld [vmem:[#allocation61_spill] sm:$0xff] }
  0xfe   : > { %v3990_v45 = vmul.f32 %v5087_v6, %v647_v60  ;;  %v3993_v58 = vmul.f32 %v5127_v41, %v647_v60  ;;  %v1079_v11 = vadd.f32 %v5202_v10, %v1052_v50  ;;  %v1282_v54 = vadd.f32 %v5203_v40, %v1255_v38  ;;  %v5207_v10 = vld [vmem:[#allocation48_spill] sm:$0xff]  ;;  %v723_v40 = vpop.permute.xlu1 %722 }
  0xff   : > { %5199 = vst [vmem:[#allocation76_spill] sm:$0xff] %v3987_v2  ;;  %v3998_v17 = vmul.f32 %v5148_v32, %v647_v60  ;;  %v842_v5 = vmul.f32 %v3306_v3, %v818_v35  ;;  %v673_v16 = vadd.f32 %v665_v21, %v3877_v25  ;;  %v1045_v26 = vmul.f32 %v5155_v57, %v818_v35  ;;  %v5208_v21 = vld [vmem:[#allocation74_spill] sm:$0xff] }
 0x100   : > { %5200 = vst [vmem:[#allocation47_spill] sm:$0xff] %v3990_v45  ;;  %5201 = vst [vmem:[#allocation120_spill] sm:$0xff] %v3993_v58  ;;  %v1248_v19 = vmul.f32 %v5167_v52, %v818_v35  ;;  %v740_v13 = vmul.f32 %v3236_v39, %v716_v51  ;;  %v1106_v29 = vadd.f32 %v5205_v15, %v1079_v11  ;;  %v526_v60 = vpop.permute.xlu0 %525  ;;  %v5209_v45 = vld [vmem:[#allocation26_spill] sm:$0xff] }
 0x101   : > { %5204 = vst [vmem:[#allocation57_spill] sm:$0xff] %v3998_v17  ;;  %v1309_v27 = vadd.f32 %v5206_v53, %v1282_v54  ;;  %v850_v50 = vadd.f32 %v842_v5, %v798_v63  ;;  %v1451_v38 = vmul.f32 %v5207_v10, %v818_v35  ;;  %v1053_v8 = vadd.f32 %v1045_v26, %v1029_v49  ;;  %v5210_v15 = vld [vmem:[#allocation66_spill] sm:$0xff]  ;;  %v5211_v53 = vld [vmem:[#allocation67_spill] sm:$0xff] }
 0x102   : > { %v748_v59 = vadd.f32 %v740_v13, %v672_v48  ;;  %v4009_v17 = vmul.f32 %v5113_v46, %v716_v51  ;;  %v4012_v25 = vmul.f32 %v5124_v44, %v716_v51  ;;  %v1130_v58 = vadd.f32 %v5208_v21, %v1106_v29  ;;  %v5214_v54 = vld [vmem:[#allocation83_spill] sm:$0xff]  ;;  %v5215_v29 = vld [vmem:[#allocation84_spill] sm:$0xff]  ;;  %v774_v21 = vpop.permute.xlu1 %773 }
 0x103   : > { %v1333_v0 = vadd.f32 %v5209_v45, %v1309_v27  ;;  %v877_v11 = vadd.f32 %v5210_v15, %v850_v50  ;;  %v4018_v63 = vmul.f32 %v5151_v30, %v716_v51  ;;  %v1080_v35 = vadd.f32 %v5211_v53, %v1053_v8  ;;  %v5216_v27 = vld [vmem:[#allocation62_spill] sm:$0xff]  ;;  %v5218_v8 = vld [vmem:[#allocation63_spill] sm:$0xff] }
 0x104   : > { %v4022_v49 = vmul.f32 %v5174_v28, %v716_v51  ;;  %v741_v48 = vmul.f32 %v3236_v39, %v723_v40  ;;  %v4026_v13 = vmul.f32 %v5113_v46, %v723_v40  ;;  %v1154_v5 = vadd.f32 %v5214_v54, %v1130_v58  ;;  %v822_v15 = vpop.permute.xlu0 %821  ;;  %v5222_v58 = vld [vmem:[#allocation38_spill] sm:$0xff] }
 0x105   : > { %v1357_v26 = vadd.f32 %v5215_v29, %v1333_v0  ;;  %v904_v45 = vadd.f32 %v5216_v27, %v877_v11  ;;  %v4032_v50 = vmul.f32 %v5124_v44, %v723_v40  ;;  %v1107_v53 = vadd.f32 %v5218_v8, %v1080_v35  ;;  %v5223_v0 = vld [vmem:[#allocation6_spill] sm:$0xff]  ;;  %v5225_v27 = vld [vmem:[#allocation77_spill] sm:$0xff] }
 0x106   : > { %5212 = vst [vmem:[#allocation58_spill] sm:$0xff] %v4022_v49  ;;  %5213 = vst [vmem:[#allocation60_spill] sm:$0xff] %v4026_v13  ;;  %v749_v51 = vadd.f32 %v741_v48, %v673_v16  ;;  %v4036_v49 = vmul.f32 %v5151_v30, %v723_v40  ;;  %v538_v37 = vmul.f32 %v5220_v62, %v526_v60  ;;  %v5221_v13 = vld [vmem:[#allocation102_spill] sm:$0xff] }
 0x107   : > { %5217 = vst [vmem:[#allocation61_spill] sm:$0xff] %v4032_v50  ;;  %v1181_v2 = vadd.f32 %v5221_v13, %v1154_v5  ;;  %v1384_v54 = vadd.f32 %v5222_v58, %v1357_v26  ;;  %v928_v29 = vadd.f32 %v5223_v0, %v904_v45  ;;  %v4043_v11 = vmul.f32 %v5174_v28, %v723_v40  ;;  %v5228_v13 = vld [vmem:[#allocation93_spill] sm:$0xff]  ;;  %v778_v40 = vpop.permute.xlu1 %777  ;;  %v5231_v58 = vld [vmem:[#allocation94_spill] sm:$0xff] }
 0x108   : > { %5219 = vst [vmem:[#allocation48_spill] sm:$0xff] %v4036_v49  ;;  %v1131_v50 = vadd.f32 %v5225_v27, %v1107_v53  ;;  %v546_v44 = vadd.f32 %v538_v37, %v494_v31  ;;  %v4047_v35 = vmul.f32 %v3187_v20, %v526_v60  ;;  %v4050_v16 = vmul.f32 %v3196_v22, %v526_v60  ;;  %v5229_v26 = vld [vmem:[#allocation29_spill] sm:$0xff]  ;;  %v578_v8 = vpop.permute.xlu0 %577  ;;  %v5232_v31 = vld [vmem:[#allocation31_spill] sm:$0xff] }
 0x109   : > { %5224 = vst [vmem:[#allocation74_spill] sm:$0xff] %v4043_v11  ;;  %v1208_v62 = vadd.f32 %v3843_v12, %v1181_v2  ;;  %v1411_v48 = vadd.f32 %v3848_v18, %v1384_v54  ;;  %v952_v5 = vadd.f32 %v5228_v13, %v928_v29  ;;  %v4056_v45 = vmul.f32 %v5229_v26, %v526_v60  ;;  %v5234_v12 = vld [vmem:[#allocation53_spill] sm:$0xff] }
 0x10a   : > { %5226 = vst [vmem:[#allocation26_spill] sm:$0xff] %v4047_v35  ;;  %5227 = vst [vmem:[#allocation66_spill] sm:$0xff] %v4050_v16  ;;  %v1155_v53 = vadd.f32 %v5231_v58, %v1131_v50  ;;  %v4060_v37 = vmul.f32 %v5232_v31, %v526_v60  ;;  %v792_v0 = vmul.f32 %v5089_v42, %v774_v21  ;;  %v5236_v60 = vld [vmem:[#allocation10_spill] sm:$0xff]  ;;  %v5239_v16 = vld [vmem:[#allocation12_spill] sm:$0xff] }
 0x10b   : > { %5230 = vst [vmem:[#allocation67_spill] sm:$0xff] %v4056_v45  ;;  %v4064_v27 = vmul.f32 %v5139_v43, %v774_v21  ;;  %v1232_v2 = vadd.f32 %v5234_v12, %v1208_v62  ;;  %v1435_v18 = vadd.f32 %v3918_v23, %v1411_v48  ;;  %v4069_v54 = vmul.f32 %v5140_v56, %v774_v21  ;;  %v5237_v58 = vld [vmem:[#allocation110_spill] sm:$0xff]  ;;  %v654_v48 = vpop.permute.xlu1 %653 }
 0x10c   : > { %5233 = vst [vmem:[#allocation83_spill] sm:$0xff] %v4060_v37  ;;  %v4072_v29 = vmul.f32 %v5180_v7, %v774_v21  ;;  %v4075_v50 = vmul.f32 %v5198_v14, %v774_v21  ;;  %v979_v13 = vadd.f32 %v5236_v60, %v952_v5  ;;  %v1182_v31 = vadd.f32 %v5237_v58, %v1155_v53  ;;  %v4083_v12 = vpop.permute.xlu0 %825  ;;  %v5238_v37 = vld [vmem:[#allocation51_spill] sm:$0xff]  ;;  %v5240_v53 = vld [vmem:[#allocation68_spill] sm:$0xff]  ;;  %v5241_v58 = vld [vmem:[#allocation69_spill] sm:$0xff] }
 0x10d   : > { %v843_v26 = vmul.f32 %v3306_v3, %v822_v15  ;;  %v1256_v22 = vadd.f32 %v1248_v19, %v1232_v2  ;;  %v1459_v20 = vadd.f32 %v1451_v38, %v1435_v18  ;;  %v4080_v62 = vadd.f32 %v792_v0, %v748_v59  ;;  %v5242_v18 = vld [vmem:[#allocation35_spill] sm:$0xff] }
 0x10e   : > { %5235 = vst [vmem:[#allocation84_spill] sm:$0xff] %v4075_v50  ;;  %v1046_v23 = vmul.f32 %v5155_v57, %v822_v15  ;;  %v1006_v45 = vadd.f32 %v5238_v37, %v979_v13  ;;  %v1209_v21 = vadd.f32 %v5239_v16, %v1182_v31  ;;  %v1249_v5 = vmul.f32 %v5167_v52, %v822_v15  ;;  %v5243_v13 = vld [vmem:[#allocation49_spill] sm:$0xff]  ;;  %v5244_v31 = vld [vmem:[#allocation64_spill] sm:$0xff] }
 0x10f   : > { %v851_v11 = vadd.f32 %v843_v26, %v3974_v4  ;;  %v1283_v60 = vadd.f32 %v5240_v53, %v1256_v22  ;;  %v1486_v19 = vadd.f32 %v5241_v58, %v1459_v20  ;;  %v1452_v59 = vmul.f32 %v5207_v10, %v822_v15  ;;  %v5245_v26 = vld [vmem:[#allocation65_spill] sm:$0xff]  ;;  %v4104_v22 = vpop.permute.xlu1 %729  ;;  %v5250_v58 = vld [vmem:[#allocation79_spill] sm:$0xff] }
 0x110   : > { %v793_v38 = vmul.f32 %v5089_v42, %v778_v40  ;;  %v1030_v0 = vadd.f32 %v3971_v33, %v1006_v45  ;;  %v1233_v2 = vadd.f32 %v3977_v36, %v1209_v21  ;;  %v1655_v16 = vmul.f32 %v5243_v13, %v822_v15  ;;  %v4106_v53 = vpop.permute.xlu0 %829  ;;  %v5247_v33 = vld [vmem:[#allocation85_spill] sm:$0xff]  ;;  %v5249_v15 = vld [vmem:[#allocation78_spill] sm:$0xff] }
 0x111   : > { %v878_v37 = vadd.f32 %v5242_v18, %v851_v11  ;;  %v1310_v4 = vadd.f32 %v5244_v31, %v1283_v60  ;;  %v1513_v49 = vadd.f32 %v5245_v26, %v1486_v19  ;;  %v4102_v20 = vmul.f32 %v5139_v43, %v778_v40  ;;  %v5253_v31 = vld [vmem:[#allocation103_spill] sm:$0xff]  ;;  %v5254_v43 = vld [vmem:[#allocation80_spill] sm:$0xff] }
 0x112   : > { %v4099_v35 = vadd.f32 %v793_v38, %v749_v51  ;;  %v1054_v36 = vadd.f32 %v1046_v23, %v1030_v0  ;;  %v1257_v21 = vadd.f32 %v1249_v5, %v1233_v2  ;;  %v4110_v11 = vmul.f32 %v5140_v56, %v778_v40  ;;  %v5252_v38 = vld [vmem:[#allocation17_spill] sm:$0xff]  ;;  %v5257_v5 = vld [vmem:[#allocation95_spill] sm:$0xff]  ;;  %v5258_v2 = vld [vmem:[#allocation96_spill] sm:$0xff] }
 0x113   : > { %5246 = vst [vmem:[#allocation62_spill] sm:$0xff] %v4102_v20  ;;  %v905_v45 = vadd.f32 %v5247_v33, %v878_v37  ;;  %v1334_v60 = vadd.f32 %v5249_v15, %v1310_v4  ;;  %v1537_v19 = vadd.f32 %v5250_v58, %v1513_v49  ;;  %v4115_v51 = vmul.f32 %v5180_v7, %v778_v40  ;;  %v5255_v20 = vld [vmem:[#allocation81_spill] sm:$0xff]  ;;  %v5259_v49 = vld [vmem:[#allocation22_spill] sm:$0xff] }
 0x114   : > { %5248 = vst [vmem:[#allocation63_spill] sm:$0xff] %v4110_v11  ;;  %v590_v18 = vmul.f32 %v5252_v38, %v578_v8  ;;  %v1081_v50 = vadd.f32 %v5254_v43, %v1054_v36  ;;  %v1284_v37 = vadd.f32 %v5255_v20, %v1257_v21  ;;  %v4122_v23 = vmul.f32 %v5198_v14, %v778_v40  ;;  %v4129_v58 = vpop.permute.xlu0 %781  ;;  %v4131_v38 = vpop.permute.xlu1 %833  ;;  %v5261_v43 = vld [vmem:[#allocation87_spill] sm:$0xff]  ;;  %v5263_v40 = vld [vmem:[#allocation33_spill] sm:$0xff] }
 0x115   : > { %5251 = vst [vmem:[#allocation13_spill] sm:$0xff] %v4115_v51  ;;  %v929_v26 = vadd.f32 %v5253_v31, %v905_v45  ;;  %v1358_v0 = vadd.f32 %v5257_v5, %v1334_v60  ;;  %v1561_v4 = vadd.f32 %v5258_v2, %v1537_v19  ;;  %v4127_v15 = vmul.f32 %v5259_v49, %v578_v8  ;;  %v5260_v45 = vld [vmem:[#allocation86_spill] sm:$0xff]  ;;  %v5262_v20 = vld [vmem:[#allocation27_spill] sm:$0xff]  ;;  %v5266_v5 = vld [vmem:[#allocation36_spill] sm:$0xff] }
 0x116   : > { %5256 = vst [vmem:[#allocation102_spill] sm:$0xff] %v4122_v23  ;;  %v598_v33 = vadd.f32 %v590_v18, %v546_v44  ;;  %v1108_v31 = vadd.f32 %v5260_v45, %v1081_v50  ;;  %v1311_v36 = vadd.f32 %v5261_v43, %v1284_v37  ;;  %v4136_v21 = vmul.f32 %v5262_v20, %v578_v8  ;;  %v5264_v60 = vld [vmem:[#allocation111_spill] sm:$0xff]  ;;  %v5265_v44 = vld [vmem:[#allocation41_spill] sm:$0xff]  ;;  %v5267_v51 = vld [vmem:[#allocation104_spill] sm:$0xff] }
 0x117   : > { %v4139_v23 = vmul.f32 %v5263_v40, %v578_v8  ;;  %v1385_v19 = vadd.f32 %v5264_v60, %v1358_v0  ;;  %v1588_v18 = vadd.f32 %v5265_v44, %v1561_v4  ;;  %v4144_v2 = vmul.f32 %v5266_v5, %v578_v8  ;;  %v5268_v50 = vld [vmem:[#allocation105_spill] sm:$0xff]  ;;  %v5269_v40 = vld [vmem:[#allocation44_spill] sm:$0xff]  ;;  %v5273_v5 = vld [vmem:[#allocation115_spill] sm:$0xff] }
 0x118   : > { %v666_v49 = vmul.f32 %v3203_v24, %v654_v48  ;;  %v1132_v11 = vadd.f32 %v5267_v51, %v1108_v31  ;;  %v1335_v45 = vadd.f32 %v5268_v50, %v1311_v36  ;;  %v4150_v37 = vmul.f32 %v5077_v55, %v654_v48  ;;  %v5270_v0 = vld [vmem:[#allocation52_spill] sm:$0xff]  ;;  %v4160_v44 = vpop.permute.xlu0 %860  ;;  %v4162_v24 = vpop.permute.xlu1 %887  ;;  %v5271_v51 = vld [vmem:[#allocation113_spill] sm:$0xff]  ;;  %v5272_v36 = vld [vmem:[#allocation114_spill] sm:$0xff] }
 0x119   : > { %v4153_v43 = vmul.f32 %v5087_v6, %v654_v48  ;;  %v1412_v20 = vadd.f32 %v5269_v40, %v1385_v19  ;;  %v1615_v60 = vadd.f32 %v5270_v0, %v1588_v18  ;;  %v4158_v8 = vmul.f32 %v5127_v41, %v654_v48 }
 0x11a   : > { %v674_v4 = vadd.f32 %v666_v49, %v598_v33  ;;  %v953_v31 = vadd.f32 %v5271_v51, %v929_v26  ;;  %v1156_v50 = vadd.f32 %v5272_v36, %v1132_v11  ;;  %v1359_v55 = vadd.f32 %v5273_v5, %v1335_v45  ;;  %v4179_v26 = vld [vmem:[%s4920_s2] ss:$0 sm:$0xff] }
 0x11b   : > { %v844_v6 = vmul.f32 %v3306_v3, %v4083_v12  ;;  %v1436_v40 = vadd.f32 %v3980_v1, %v1412_v20  ;;  %v1639_v33 = vadd.f32 %v3983_v9, %v1615_v60  ;;  %v4172_v49 = vmul.f32 %v5148_v32, %v654_v48 }
 0x11c   : > { %v1047_v19 = vmul.f32 %v5155_v57, %v4083_v12  ;;  %v980_v11 = vadd.f32 %v3921_v34, %v953_v31  ;;  %v1183_v18 = vadd.f32 %v3926_v61, %v1156_v50  ;;  %v1386_v5 = vadd.f32 %v3930_v47, %v1359_v55  ;;  %v4189_v0 = vpop.permute.xlu0 %911  ;;  %v4191_v60 = vpop.permute.xlu1 %935  ;;  %v5274_v47 = vld [vmem:[#allocation89_spill] sm:$0xff] }
 0x11d   : > { %v852_v1 = vadd.f32 %v844_v6, %v4080_v62  ;;  %v1460_v9 = vadd.f32 %v1452_v59, %v1436_v40  ;;  %v1663_v20 = vadd.f32 %v1655_v16, %v1639_v33  ;;  %v1250_v48 = vmul.f32 %v5167_v52, %v4083_v12  ;;  %v5275_v62 = vld [vmem:[#allocation82_spill] sm:$0xff]  ;;  %v5276_v50 = vld [vmem:[#allocation97_spill] sm:$0xff]  ;;  %v5277_v40 = vld [vmem:[#allocation88_spill] sm:$0xff] }
 0x11e   : > { %v1453_v45 = vmul.f32 %v5207_v10, %v4083_v12  ;;  %v1007_v34 = vadd.f32 %v4009_v17, %v980_v11  ;;  %v1210_v61 = vadd.f32 %v4012_v25, %v1183_v18  ;;  %v1413_v55 = vadd.f32 %v4018_v63, %v1386_v5 }
 0x11f   : > { %v879_v6 = vadd.f32 %v5274_v47, %v852_v1  ;;  %v1487_v59 = vadd.f32 %v5275_v62, %v1460_v9  ;;  %v1678_v16 = vadd.f32 %v4179_v26, %v1663_v20  ;;  %v1656_v51 = vmul.f32 %v5243_v13, %v4083_v12 }
 0x120   : > { %v742_v31 = vmul.f32 %v3236_v39, %v4104_v22  ;;  %v1031_v36 = vadd.f32 %v4064_v27, %v1007_v34  ;;  %v1234_v17 = vadd.f32 %v4069_v54, %v1210_v61  ;;  %v1437_v25 = vadd.f32 %v4072_v29, %v1413_v55  ;;  %v4212_v12 = vpop.permute.xlu0 %962  ;;  %v4214_v1 = vpop.permute.xlu1 %989  ;;  %v5278_v39 = vld [vmem:[#allocation72_spill] sm:$0xff]  ;;  %v5279_v29 = vld [vmem:[#allocation106_spill] sm:$0xff]  ;;  %v5280_v61 = vld [vmem:[#allocation37_spill] sm:$0xff] }
 0x121   : > { %v906_v63 = vadd.f32 %v5276_v50, %v879_v6  ;;  %v1514_v33 = vadd.f32 %v5277_v40, %v1487_v59  ;;  %v1686_v11 = vmax.f32 %v1678_v16, 0.0  ;;  %v4210_v5 = vmul.f32 %v5113_v46, %v4104_v22  ;;  %v5281_v6 = vld [vmem:[#allocation90_spill] sm:$0xff]  ;;  %v5284_v16 = vld [vmem:[#allocation116_spill] sm:$0xff]  ;;  %v5309_v46 = vld [vmem:[#allocation57_spill] sm:$0xff] }
 0x122   : > { %v750_v18 = vadd.f32 %v742_v31, %v674_v4  ;;  %v1055_v9 = vadd.f32 %v1047_v19, %v1031_v36  ;;  %v1258_v54 = vadd.f32 %v1250_v48, %v1234_v17  ;;  %v1461_v20 = vadd.f32 %v1453_v45, %v1437_v25  ;;  %v5282_v19 = vld [vmem:[#allocation91_spill] sm:$0xff]  ;;  %v5283_v45 = vld [vmem:[#allocation92_spill] sm:$0xff]  ;;  %v5286_v40 = vld [vmem:[#allocation98_spill] sm:$0xff] }
 0x123   : > { %v930_v27 = vadd.f32 %v5278_v39, %v906_v63  ;;  %v1538_v34 = vadd.f32 %v5279_v29, %v1514_v33  ;;  %1717 = vst.msk [vmem:[#allocation2 + $0x11] sm:$0xff] %vm1694_vm0, %v1686_v11  ;;  %v4221_v4 = vmul.f32 %v5280_v61, %v4104_v22  ;;  %v4225_v55 = vmul.f32 %v5151_v30, %v4104_v22  ;;  %v5285_v36 = vld [vmem:[#allocation43_spill] sm:$0xff]  ;;  %v5308_v61 = vld [vmem:[#allocation120_spill] sm:$0xff] }
 0x124   : > { %v845_v47 = vmul.f32 %v3306_v3, %v4106_v53  ;;  %v1082_v62 = vadd.f32 %v5281_v6, %v1055_v9  ;;  %v1285_v48 = vadd.f32 %v5282_v19, %v1258_v54  ;;  %v1488_v59 = vadd.f32 %v5283_v45, %v1461_v20  ;;  %v5287_v11 = vld [vmem:[#allocation99_spill] sm:$0xff]  ;;  %v5288_v9 = vld [vmem:[#allocation100_spill] sm:$0xff]  ;;  %v5292_v19 = vld [vmem:[#allocation70_spill] sm:$0xff]  ;;  %v4253_v45 = vpop.permute.xlu1 %1037 }
 0x125   : > { %v954_v31 = vadd.f32 %v5284_v16, %v930_v27  ;;  %v1562_v17 = vadd.f32 %v5285_v36, %v1538_v34  ;;  %v4236_v25 = vmul.f32 %v5174_v28, %v4104_v22  ;;  %v1048_v63 = vmul.f32 %v5155_v57, %v4106_v53  ;;  %v5289_v20 = vld [vmem:[#allocation76_spill] sm:$0xff]  ;;  %v4245_v27 = vpop.permute.xlu0 %1013  ;;  %5293 = vst [vmem:[#allocation6_spill] sm:$0xff] %v4253_v45  ;;  %v5296_v36 = vld [vmem:[#allocation109_spill] sm:$0xff]  ;;  %v5300_v28 = vld [vmem:[#allocation62_spill] sm:$0xff] }
 0x126   : > { %v853_v50 = vadd.f32 %v845_v47, %v4099_v35  ;;  %v1109_v33 = vadd.f32 %v5286_v40, %v1082_v62  ;;  %v1312_v39 = vadd.f32 %v5287_v11, %v1285_v48  ;;  %v1515_v54 = vadd.f32 %v5288_v9, %v1488_v59  ;;  %5290 = vst [vmem:[#allocation38_spill] sm:$0xff] %v4245_v27  ;;  %v5291_v34 = vld [vmem:[#allocation56_spill] sm:$0xff]  ;;  %v5294_v62 = vld [vmem:[#allocation107_spill] sm:$0xff]  ;;  %v5298_v9 = vld [vmem:[#allocation58_spill] sm:$0xff] }
 0x127   : > { %v981_v29 = vadd.f32 %v5289_v20, %v954_v31  ;;  %v1589_v6 = vadd.f32 %v5291_v34, %v1562_v17  ;;  %v1251_v35 = vmul.f32 %v5167_v52, %v4106_v53  ;;  %v1454_v47 = vmul.f32 %v5207_v10, %v4106_v53  ;;  %v5295_v16 = vld [vmem:[#allocation108_spill] sm:$0xff]  ;;  %v5299_v20 = vld [vmem:[#allocation54_spill] sm:$0xff]  ;;  %v5301_v27 = vld [vmem:[#allocation117_spill] sm:$0xff] }
 0x128   : > { %v880_v22 = vadd.f32 %v5292_v19, %v853_v50  ;;  %v1133_v48 = vadd.f32 %v5294_v62, %v1109_v33  ;;  %v1336_v59 = vadd.f32 %v5295_v16, %v1312_v39  ;;  %v1539_v31 = vadd.f32 %v5296_v36, %v1515_v54  ;;  %v5297_v40 = vld [vmem:[#allocation60_spill] sm:$0xff]  ;;  %v5302_v62 = vld [vmem:[#allocation118_spill] sm:$0xff]  ;;  %v5303_v16 = vld [vmem:[#allocation119_spill] sm:$0xff] }
 0x129   : > { %v1008_v11 = vadd.f32 %v5297_v40, %v981_v29  ;;  %v1616_v17 = vadd.f32 %v5298_v9, %v1589_v6  ;;  %v1657_v34 = vmul.f32 %v5243_v13, %v4106_v53  ;;  %v794_v19 = vmul.f32 %v5089_v42, %v4129_v58  ;;  %v5304_v36 = vld [vmem:[#allocation84_spill] sm:$0xff]  ;;  %v5305_v40 = vld [vmem:[#allocation26_spill] sm:$0xff]  ;;  %v5307_v53 = vld [vmem:[#allocation47_spill] sm:$0xff] }
 0x12a   : > { %v907_v50 = vadd.f32 %v5299_v20, %v880_v22  ;;  %v1157_v33 = vadd.f32 %v5301_v27, %v1133_v48  ;;  %v1360_v39 = vadd.f32 %v5302_v62, %v1336_v59  ;;  %v1563_v54 = vadd.f32 %v5303_v16, %v1539_v31  ;;  %v5306_v22 = vld [vmem:[#allocation39_spill] sm:$0xff]  ;;  %v4276_v27 = vpop.permute.xlu0 %1064 }
 0x12b   : > { %v1032_v45 = vadd.f32 %v5300_v28, %v1008_v11  ;;  %v1640_v29 = vadd.f32 %v5304_v36, %v1616_v17  ;;  %v802_v9 = vadd.f32 %v794_v19, %v750_v18  ;;  %v1025_v20 = vmul.f32 %v5306_v22, %v4129_v58  ;;  %v4285_v17 = vpop.permute.xlu1 %1091 }
 0x12c   : > { %v931_v6 = vadd.f32 %v5305_v40, %v907_v50  ;;  %v1184_v30 = vadd.f32 %v5307_v53, %v1157_v33  ;;  %v1387_v42 = vadd.f32 %v5308_v61, %v1360_v39  ;;  %v1590_v28 = vadd.f32 %v5309_v46, %v1563_v54  ;;  %v5310_v50 = vld [vmem:[#allocation61_spill] sm:$0xff]  ;;  %v5311_v61 = vld [vmem:[#allocation48_spill] sm:$0xff]  ;;  %v5312_v46 = vld [vmem:[#allocation74_spill] sm:$0xff] }
 0x12d   : > { %v1056_v11 = vadd.f32 %v1048_v63, %v1032_v45  ;;  %v1664_v48 = vadd.f32 %v1656_v51, %v1640_v29  ;;  %v1228_v31 = vmul.f32 %v5140_v56, %v4129_v58  ;;  %v4283_v18 = vmul.f32 %v5180_v7, %v4129_v58  ;;  %v5313_v45 = vld [vmem:[#allocation71_spill] sm:$0xff]  ;;  %v5316_v40 = vld [vmem:[#allocation102_spill] sm:$0xff] }
 0x12e   : > { %v955_v59 = vadd.f32 %v4127_v15, %v931_v6  ;;  %v1211_v19 = vadd.f32 %v5310_v50, %v1184_v30  ;;  %v1414_v33 = vadd.f32 %v5311_v61, %v1387_v42  ;;  %v1617_v63 = vadd.f32 %v5312_v46, %v1590_v28  ;;  %v5314_v54 = vld [vmem:[#allocation63_spill] sm:$0xff]  ;;  %v5315_v30 = vld [vmem:[#allocation13_spill] sm:$0xff]  ;;  %v4307_v46 = vpop.permute.xlu0 %1115 }
 0x12f   : > { %v1083_v62 = vadd.f32 %v5313_v45, %v1056_v11  ;;  %v1679_v51 = vadd.f32 %v4179_v26, %v1664_v48  ;;  %v4295_v39 = vmul.f32 %v5198_v14, %v4129_v58  ;;  %v846_v16 = vmul.f32 %v3306_v3, %v4131_v38  ;;  %v5317_v53 = vld [vmem:[#allocation55_spill] sm:$0xff]  ;;  %v5318_v58 = vld [vmem:[#allocation66_spill] sm:$0xff]  ;;  %v4318_v45 = vpop.permute.xlu1 %1139 }
 0x130   : > { %v982_v15 = vadd.f32 %v4150_v37, %v955_v59  ;;  %v1235_v36 = vadd.f32 %v5314_v54, %v1211_v19  ;;  %v1438_v29 = vadd.f32 %v5315_v30, %v1414_v33  ;;  %v1641_v6 = vadd.f32 %v5316_v40, %v1617_v63 }
 0x131   : > { %v1110_v42 = vadd.f32 %v5317_v53, %v1083_v62  ;;  %v1687_v28 = vmax.f32 %v1679_v51, 0.0  ;;  %v854_v48 = vadd.f32 %v846_v16, %v802_v9  ;;  %v1049_v37 = vmul.f32 %v5155_v57, %v4131_v38  ;;  %v5319_v9 = vld [vmem:[#allocation14_spill] sm:$0xff] }
 0x132   : > { %v1009_v11 = vadd.f32 %v4210_v5, %v982_v15  ;;  %v1259_v50 = vadd.f32 %v1251_v35, %v1235_v36  ;;  %v1462_v61 = vadd.f32 %v1454_v47, %v1438_v29  ;;  %v1665_v3 = vadd.f32 %v1657_v34, %v1641_v6  ;;  %v5320_v35 = vld [vmem:[#allocation73_spill] sm:$0xff]  ;;  %v5321_v34 = vld [vmem:[#allocation75_spill] sm:$0xff]  ;;  %v5324_v6 = vld [vmem:[#allocation46_spill] sm:$0xff] }
 0x133   : > { %v1134_v59 = vadd.f32 %v5318_v58, %v1110_v42  ;;  %1718 = vst.msk [vmem:[#allocation2 + $0x21] sm:$0xff] %vm1694_vm0, %v1687_v28  ;;  %v1252_v33 = vmul.f32 %v5167_v52, %v4131_v38  ;;  %v4314_v5 = vmul.f32 %v5207_v10, %v4131_v38  ;;  %v873_v63 = vmul.f32 %v5319_v9, %v4160_v44  ;;  %v5322_v36 = vld [vmem:[#allocation15_spill] sm:$0xff]  ;;  %v5325_v58 = vld [vmem:[#allocation21_spill] sm:$0xff] }
 0x134   : > { %v1033_v19 = vadd.f32 %v1025_v20, %v1009_v11  ;;  %v1286_v47 = vadd.f32 %v5320_v35, %v1259_v50  ;;  %v1489_v62 = vadd.f32 %v5321_v34, %v1462_v61  ;;  %v1680_v51 = vadd.f32 %v4179_v26, %v1665_v3  ;;  %v5323_v29 = vld [vmem:[#allocation59_spill] sm:$0xff]  ;;  %v4343_v35 = vpop.permute.xlu0 %1166 }
 0x135   : > { %v1158_v20 = vadd.f32 %v4136_v21, %v1134_v59  ;;  %v1658_v15 = vmul.f32 %v5243_v13, %v4131_v38  ;;  %v881_v54 = vadd.f32 %v873_v63, %v854_v48  ;;  %v1076_v30 = vmul.f32 %v5322_v36, %v4160_v44  ;;  %v5326_v21 = vld [vmem:[#allocation16_spill] sm:$0xff]  ;;  %v5327_v38 = vld [vmem:[#allocation18_spill] sm:$0xff]  ;;  %v5329_v3 = vld [vmem:[#allocation83_spill] sm:$0xff] }
 0x136   : > { %v1057_v16 = vadd.f32 %v1049_v37, %v1033_v19  ;;  %v1313_v40 = vadd.f32 %v5323_v29, %v1286_v47  ;;  %v1516_v53 = vadd.f32 %v5324_v6, %v1489_v62  ;;  %v1688_v42 = vmax.f32 %v1680_v51, 0.0  ;;  %v5328_v37 = vld [vmem:[#allocation67_spill] sm:$0xff]  ;;  %v5333_v6 = vld [vmem:[#allocation20_spill] sm:$0xff] }
 0x137   : > { %v1185_v28 = vadd.f32 %v4153_v43, %v1158_v20  ;;  %v1279_v50 = vmul.f32 %v5325_v58, %v4160_v44  ;;  %v900_v59 = vmul.f32 %v5326_v21, %v4162_v24  ;;  %v1103_v48 = vmul.f32 %v5327_v38, %v4162_v24  ;;  %v5330_v43 = vld [vmem:[#allocation25_spill] sm:$0xff]  ;;  %v5331_v62 = vld [vmem:[#allocation23_spill] sm:$0xff]  ;;  %v5336_v21 = vld [vmem:[#allocation22_spill] sm:$0xff] }
 0x138   : > { %v1084_v11 = vadd.f32 %v1076_v30, %v1057_v16  ;;  %v1337_v61 = vadd.f32 %v5328_v37, %v1313_v40  ;;  %v1540_v19 = vadd.f32 %v5329_v3, %v1516_v53  ;;  %1719 = vst.msk [vmem:[#allocation2 + $0x31] sm:$0xff] %vm1694_vm0, %v1688_v42  ;;  %v1482_v63 = vmul.f32 %v5330_v43, %v4160_v44  ;;  %v5332_v20 = vld [vmem:[#allocation19_spill] sm:$0xff]  ;;  %v4349_v30 = vpop.permute.xlu1 %1193  ;;  %v5334_v53 = vld [vmem:[#allocation24_spill] sm:$0xff] }
 0x139   : > { %v1212_v9 = vadd.f32 %v4221_v4, %v1185_v28  ;;  %v908_v47 = vadd.f32 %v900_v59, %v881_v54  ;;  %v1306_v51 = vmul.f32 %v5331_v62, %v4162_v24  ;;  %v924_v16 = vmul.f32 %v5332_v20, %v4189_v0  ;;  %v5335_v28 = vld [vmem:[#allocation29_spill] sm:$0xff] }
 0x13a   : > { %v1111_v34 = vadd.f32 %v1103_v48, %v1084_v11  ;;  %v1361_v29 = vadd.f32 %v4139_v23, %v1337_v61  ;;  %v1564_v40 = vadd.f32 %v4144_v2, %v1540_v19  ;;  %v1127_v44 = vmul.f32 %v5333_v6, %v4189_v0  ;;  %v5338_v19 = vld [vmem:[#allocation27_spill] sm:$0xff] }
 0x13b   : > { %v1236_v4 = vadd.f32 %v1228_v31, %v1212_v9  ;;  %v1509_v54 = vmul.f32 %v5334_v53, %v4162_v24  ;;  %v932_v42 = vadd.f32 %v924_v16, %v908_v47  ;;  %v1330_v11 = vmul.f32 %v5335_v28, %v4189_v0  ;;  %v5337_v31 = vld [vmem:[#allocation31_spill] sm:$0xff]  ;;  %v5339_v9 = vld [vmem:[#allocation33_spill] sm:$0xff] }
 0x13c   : > { %v948_v59 = vmul.f32 %v5336_v21, %v4191_v60  ;;  %v1388_v48 = vadd.f32 %v4158_v8, %v1361_v29  ;;  %v1591_v23 = vadd.f32 %v4172_v49, %v1564_v40  ;;  %v1135_v2 = vadd.f32 %v1127_v44, %v1111_v34  ;;  %v5340_v8 = vld [vmem:[#allocation28_spill] sm:$0xff]  ;;  %v5343_v40 = vld [vmem:[#allocation30_spill] sm:$0xff] }
 0x13d   : > { %v1260_v37 = vadd.f32 %v1252_v33, %v1236_v4  ;;  %v1533_v61 = vmul.f32 %v5337_v31, %v4189_v0  ;;  %v1151_v24 = vmul.f32 %v5338_v19, %v4191_v60  ;;  %v1354_v47 = vmul.f32 %v5339_v9, %v4191_v60  ;;  %v4373_v33 = vpop.permute.xlu0 %1217  ;;  %v5342_v0 = vld [vmem:[#allocation36_spill] sm:$0xff] }
 0x13e   : > { %v956_v3 = vadd.f32 %v948_v59, %v932_v42  ;;  %v1415_v20 = vadd.f32 %v4225_v55, %v1388_v48  ;;  %v1618_v16 = vadd.f32 %v4236_v25, %v1591_v23  ;;  %v975_v49 = vmul.f32 %v5340_v8, %v4212_v12  ;;  %5341 = vst [vmem:[#allocation77_spill] sm:$0xff] %v4373_v33  ;;  %v4381_v42 = vpop.permute.xlu1 %1241 }
 0x13f   : > { %v1287_v21 = vadd.f32 %v1279_v50, %v1260_v37  ;;  %v1159_v34 = vadd.f32 %v1151_v24, %v1135_v2  ;;  %v1557_v29 = vmul.f32 %v5342_v0, %v4191_v60  ;;  %v1178_v4 = vmul.f32 %v5343_v40, %v4212_v12  ;;  %5344 = vst [vmem:[#allocation93_spill] sm:$0xff] %v4381_v42  ;;  %v5345_v60 = vld [vmem:[#allocation34_spill] sm:$0xff]  ;;  %v5346_v2 = vld [vmem:[#allocation37_spill] sm:$0xff] }
 0x140   : > { %v1381_v44 = vmul.f32 %v5127_v41, %v4212_v12  ;;  %v1439_v55 = vadd.f32 %v4283_v18, %v1415_v20  ;;  %v1642_v25 = vadd.f32 %v4295_v39, %v1618_v16  ;;  %v983_v59 = vadd.f32 %v975_v49, %v956_v3  ;;  %v5347_v18 = vld [vmem:[#allocation42_spill] sm:$0xff] }
 0x141   : > { %v1314_v50 = vadd.f32 %v1306_v51, %v1287_v21  ;;  %v1186_v48 = vadd.f32 %v1178_v4, %v1159_v34  ;;  %v1584_v23 = vmul.f32 %v5148_v32, %v4212_v12  ;;  %v1002_v37 = vmul.f32 %v5345_v60, %v4214_v1  ;;  %v5348_v3 = vld [vmem:[#allocation38_spill] sm:$0xff] }
 0x142   : > { %v1205_v24 = vmul.f32 %v5346_v2, %v4214_v1  ;;  %v1666_v8 = vadd.f32 %v1658_v15, %v1642_v25  ;;  %v1463_v33 = vadd.f32 %v4314_v5, %v1439_v55  ;;  %v1408_v20 = vmul.f32 %v5347_v18, %v4214_v1  ;;  %v5349_v15 = vld [vmem:[#allocation45_spill] sm:$0xff]  ;;  %v4401_v5 = vpop.permute.xlu0 %1268 }
 0x143   : > { %v1338_v42 = vadd.f32 %v1330_v11, %v1314_v50  ;;  %v1010_v39 = vadd.f32 %v1002_v37, %v983_v59  ;;  %v1026_v16 = vmul.f32 %v5306_v22, %v5348_v3  ;;  %v1229_v12 = vmul.f32 %v5140_v56, %v5348_v3  ;;  %v5350_v50 = vld [vmem:[#allocation6_spill] sm:$0xff]  ;;  %v4407_v59 = vpop.permute.xlu1 %1295 }
 0x144   : > { %v1213_v51 = vadd.f32 %v1205_v24, %v1186_v48  ;;  %v1681_v21 = vadd.f32 %v4179_v26, %v1666_v8  ;;  %v1490_v49 = vadd.f32 %v1482_v63, %v1463_v33  ;;  %v1611_v4 = vmul.f32 %v5349_v15, %v4214_v1 }
 0x145   : > { %v1362_v34 = vadd.f32 %v1354_v47, %v1338_v42  ;;  %v1034_v11 = vadd.f32 %v1026_v16, %v1010_v39  ;;  %v1432_v25 = vmul.f32 %v5180_v7, %v5348_v3  ;;  %v1050_v22 = vmul.f32 %v5155_v57, %v5350_v50 }
 0x146   : > { %v1237_v55 = vadd.f32 %v1229_v12, %v1213_v51  ;;  %v1689_v48 = vmax.f32 %v1681_v21, 0.0  ;;  %v1517_v60 = vadd.f32 %v1509_v54, %v1490_v49  ;;  %v1253_v63 = vmul.f32 %v5167_v52, %v5350_v50 }
 0x147   : > { %v1389_v37 = vadd.f32 %v1381_v44, %v1362_v34  ;;  %v1635_v1 = vmul.f32 %v5198_v14, %v5348_v3  ;;  %v1456_v47 = vmul.f32 %v5207_v10, %v5350_v50  ;;  %v1058_v33 = vadd.f32 %v1050_v22, %v1034_v11  ;;  %v1344_v11 = vpop.permute.xlu1 %1343 }
 0x148   : > { %v1077_v42 = vmul.f32 %v5322_v36, %v4276_v27  ;;  %1720 = vst.msk [vmem:[#allocation2 + $0x41] sm:$0xff] %vm1694_vm0, %v1689_v48  ;;  %v1541_v57 = vadd.f32 %v1533_v61, %v1517_v60  ;;  %v1261_v8 = vadd.f32 %v1253_v63, %v1237_v55  ;;  %v1280_v54 = vmul.f32 %v5325_v58, %v4276_v27 }
 0x149   : > { %v1416_v24 = vadd.f32 %v1408_v20, %v1389_v37  ;;  %v1659_v44 = vmul.f32 %v5243_v13, %v5350_v50  ;;  %v1483_v51 = vmul.f32 %v5330_v43, %v4276_v27  ;;  %v1104_v3 = vmul.f32 %v5327_v38, %v4285_v17  ;;  %v1320_v20 = vpop.permute.xlu0 %1319 }
 0x14a   : > { %v1085_v39 = vadd.f32 %v1077_v42, %v1058_v33  ;;  %v1565_v16 = vadd.f32 %v1557_v29, %v1541_v57  ;;  %v1288_v12 = vadd.f32 %v1280_v54, %v1261_v8  ;;  %v1307_v61 = vmul.f32 %v5331_v62, %v4285_v17  ;;  %v5351_v8 = vld [vmem:[#allocation77_spill] sm:$0xff] }
 0x14b   : > { %v1440_v36 = vadd.f32 %v1432_v25, %v1416_v24  ;;  %v1510_v49 = vmul.f32 %v5334_v53, %v4285_v17  ;;  %v1128_v34 = vmul.f32 %v5333_v6, %v4307_v46  ;;  %v1331_v27 = vmul.f32 %v5335_v28, %v4307_v46 }
 0x14c   : > { %v1112_v21 = vadd.f32 %v1104_v3, %v1085_v39  ;;  %v1592_v55 = vadd.f32 %v1584_v23, %v1565_v16  ;;  %v1315_v29 = vadd.f32 %v1307_v61, %v1288_v12  ;;  %v1152_v25 = vmul.f32 %v5338_v19, %v4318_v45  ;;  %v1398_v39 = vpop.permute.xlu1 %1397 }
 0x14d   : > { %v1464_v38 = vadd.f32 %v1456_v47, %v1440_v36  ;;  %v1534_v22 = vmul.f32 %v5337_v31, %v4307_v46  ;;  %v1355_v17 = vmul.f32 %v5339_v9, %v4318_v45  ;;  %v1179_v6 = vmul.f32 %v5343_v40, %v4343_v35  ;;  %v5352_v36 = vld [vmem:[#allocation93_spill] sm:$0xff] }
 0x14e   : > { %v1136_v50 = vadd.f32 %v1128_v34, %v1112_v21  ;;  %v1619_v48 = vadd.f32 %v1611_v4, %v1592_v55  ;;  %v1339_v37 = vadd.f32 %v1331_v27, %v1315_v29  ;;  %v1558_v23 = vmul.f32 %v5342_v0, %v4318_v45  ;;  %v1371_v4 = vpop.permute.xlu0 %1370 }
 0x14f   : > { %v1491_v60 = vadd.f32 %v1483_v51, %v1464_v38  ;;  %v1382_v19 = vmul.f32 %v5127_v41, %v4343_v35  ;;  %v1585_v47 = vmul.f32 %v5148_v32, %v4343_v35  ;;  %v1206_v46 = vmul.f32 %v5346_v2, %v4349_v30 }
 0x150   : > { %v1160_v63 = vadd.f32 %v1152_v25, %v1136_v50  ;;  %v1643_v33 = vadd.f32 %v1635_v1, %v1619_v48  ;;  %v1363_v57 = vadd.f32 %v1355_v17, %v1339_v37  ;;  %v1409_v40 = vmul.f32 %v5347_v18, %v4349_v30 }
 0x151   : > { %v1518_v42 = vadd.f32 %v1510_v49, %v1491_v60  ;;  %v1612_v45 = vmul.f32 %v5349_v15, %v4349_v30  ;;  %v1230_v54 = vmul.f32 %v5140_v56, %v5351_v8  ;;  %v1433_v35 = vmul.f32 %v5180_v7, %v5351_v8 }
 0x152   : > { %v1187_v24 = vadd.f32 %v1179_v6, %v1160_v63  ;;  %v1667_v51 = vadd.f32 %v1659_v44, %v1643_v33  ;;  %v1390_v1 = vadd.f32 %v1382_v19, %v1363_v57  ;;  %v1636_v3 = vmul.f32 %v5198_v14, %v5351_v8  ;;  %v4482_v63 = vld [vmem:[#allocation2 + $0x28] sm:$0x3] }
 0x153   : > { %v1542_v2 = vadd.f32 %v1534_v22, %v1518_v42  ;;  %v1254_v12 = vmul.f32 %v5167_v52, %v5352_v36  ;;  %v1457_v30 = vmul.f32 %v5207_v10, %v5352_v36  ;;  %v1660_v56 = vmul.f32 %v5243_v13, %v5352_v36  ;;  %v1422_v22 = vpop.permute.xlu0 %1421 }
 0x154   : > { %v1214_v16 = vadd.f32 %v1206_v46, %v1187_v24  ;;  %v1682_v61 = vadd.f32 %v4179_v26, %v1667_v51  ;;  %v1417_v49 = vadd.f32 %v1409_v40, %v1390_v1  ;;  %v1281_v44 = vmul.f32 %v5325_v58, %v4401_v5  ;;  %v5353_v40 = vld [vmem:[#allocation7_spill] sm:$0xff]  ;;  %v5356_v1 = vld [vmem:[#allocation8_spill] sm:$0xff] }
 0x155   : > { %v1566_v21 = vadd.f32 %v1558_v23, %v1542_v2  ;;  %v1484_v27 = vmul.f32 %v5330_v43, %v4401_v5  ;;  %v1308_v52 = vmul.f32 %v5331_v62, %v4407_v59  ;;  %v1511_v55 = vmul.f32 %v5334_v53, %v4407_v59  ;;  %v1446_v5 = vpop.permute.xlu1 %1445  ;;  %v1728_v23 = vld [vmem:[#allocation2 + $0x18] sm:$0x3] }
 0x156   : > { %v1238_v34 = vadd.f32 %v1230_v54, %v1214_v16  ;;  %v1690_v38 = vmax.f32 %v1682_v61, 0.0  ;;  %v1441_v25 = vadd.f32 %v1433_v35, %v1417_v49  ;;  %v1332_v50 = vmul.f32 %v5335_v28, %v1320_v20  ;;  %v5355_v54 = vld [vmem:[#allocation40_spill] sm:$0xff]  ;;  %v4516_v49 = vld [vmem:[%s4921_s3 + $0x8] ss:$0 sm:$0xff] }
 0x157   : > { %v1593_v29 = vadd.f32 %v1585_v47, %v1566_v21  ;;  %v1535_v6 = vmul.f32 %v5337_v31, %v1320_v20  ;;  %v1356_v58 = vmul.f32 %v5339_v9, %v1344_v11  ;;  %v1559_v48 = vmul.f32 %v5342_v0, %v1344_v11  ;;  %v4487_v11 = vld [vmem:[#allocation2 + $0x10] sm:$0xff]  ;;  %v1473_v61 = vpop.permute.xlu0 %1472 }
 0x158   : > { %v1262_v17 = vadd.f32 %v1254_v12, %v1238_v34  ;;  %1721 = vst.msk [vmem:[#allocation2 + $0x51] sm:$0xff] %vm1694_vm0, %v1690_v38  ;;  %v1465_v60 = vadd.f32 %v1457_v30, %v1441_v25  ;;  %v1383_v59 = vmul.f32 %v5127_v41, %v1371_v4  ;;  %v1586_v37 = vmul.f32 %v5148_v32, %v1371_v4  ;;  %v5357_v12 = vld [vmem:[#allocation112_spill] sm:$0xff]  ;;  %v5358_v34 = vld [vmem:[#allocation9_spill] sm:$0xff] }
 0x159   : > { %v1620_v62 = vadd.f32 %v1612_v45, %v1593_v29  ;;  %v1410_v19 = vmul.f32 %v5347_v18, %v1398_v39  ;;  %v1613_v20 = vmul.f32 %v5349_v15, %v1398_v39  ;;  %v1434_v9 = vmul.f32 %v5180_v7, %v1422_v22  ;;  %v5354_v45 = vld [vmem:[#allocation101_spill] sm:$0xff] }
 0x15a   : > { %v1289_v28 = vadd.f32 %v1281_v44, %v1262_v17  ;;  %v1492_v46 = vadd.f32 %v1484_v27, %v1465_v60  ;;  %v1637_v33 = vmul.f32 %v5198_v14, %v1422_v22  ;;  %v1458_v41 = vmul.f32 %v5207_v10, %v1446_v5  ;;  %v4503_v10 = vld [vmem:[#allocation2 + $0x20] sm:$0xff] }
 0x15b   : > { %v1644_v47 = vadd.f32 %v1636_v3, %v1620_v62  ;;  %v1661_v57 = vmul.f32 %v5243_v13, %v1446_v5  ;;  %v4493_v4 = vmul.f32 %v5353_v40, %v1728_v23  ;;  %v4497_v18 = vmul.f32 %v5353_v40, %v4482_v63  ;;  %v5360_v5 = vld [vmem:[#allocation50_spill] sm:$0xff] }
 0x15c   : > { %v1316_v42 = vadd.f32 %v1308_v52, %v1289_v28  ;;  %v1519_v7 = vadd.f32 %v1511_v55, %v1492_v46  ;;  %v1925_v8 = vmul.f32 %v5354_v45, %v4487_v11  ;;  %v1945_v35 = vmul.f32 %v5355_v54, %v4487_v11  ;;  %v1500_v55 = vpop.permute.xlu1 %1499 }
 0x15d   : > { %v1668_v24 = vadd.f32 %v1660_v56, %v1644_v47  ;;  %v1808_v51 = vrot.slane %v4493_v4, 1  ;;  %v1811_v2 = vrot.slane %v4497_v18, 1  ;;  %v4508_v3 = vmul.f32 %v5356_v1, %v1728_v23  ;;  %v2295_v47 = vld [vmem:[%s4923_s5 + $0x38] sm:$0xff] }
 0x15e   : > { %v1340_v39 = vadd.f32 %v1332_v50, %v1316_v42  ;;  %v1543_v36 = vadd.f32 %v1535_v6, %v1519_v7  ;;  %v1933_v30 = vadd.f32 %v1925_v8, %v5357_v12  ;;  %v1946_v56 = vmul.f32 %v5355_v54, %v1728_v23  ;;  %v5359_v50 = vld [vmem:[#allocation11_spill] sm:$0xff] }
 0x15f   : > { %v1683_v16 = vadd.f32 %v4179_v26, %v1668_v24  ;;  %v1977_v44 = vrot.slane %v1945_v35, 1  ;;  %v2021_v27 = vmul.f32 %v5358_v34, %v4487_v11  ;;  %v2022_v52 = vmul.f32 %v5358_v34, %v1728_v23 }
 0x160   : > { %v1364_v21 = vadd.f32 %v1356_v58, %v1340_v39  ;;  %v1567_v29 = vadd.f32 %v1559_v48, %v1543_v36  ;;  %v1978_v25 = vrot.slane %v1946_v56, 1  ;;  %v2097_v22 = vmul.f32 %v5359_v50, %v4503_v10 }
 0x161   : > { %v1691_v38 = vmax.f32 %v1683_v16, 0.0  ;;  %v2053_v6 = vrot.slane %v2021_v27, 2  ;;  %v2054_v58 = vrot.slane %v2022_v52, 2  ;;  %v2117_v62 = vmul.f32 %v5360_v5, %v4503_v10  ;;  %v1524_v16 = vpop.permute.xlu0 %1523 }
 0x162   : > { %v1391_v17 = vadd.f32 %v1383_v59, %v1364_v21  ;;  %v1594_v60 = vadd.f32 %v1586_v37, %v1567_v29  ;;  %v1979_v28 = vsel %vm1803_vm2, %v1977_v44, %v1978_v25  ;;  %v2118_v23 = vmul.f32 %v5360_v5, %v4482_v63  ;;  %v2294_v59 = vld [vmem:[%s4923_s5 + $0x30] sm:$0xff]  ;;  %v1548_v44 = vpop.permute.xlu1 %1547 }
 0x163   : > { %1722 = vst.msk [vmem:[#allocation2 + $0x61] sm:$0xff] %vm1694_vm0, %v1691_v38  ;;  %v2193_v48 = vmul.f32 %v4516_v49, %v4503_v10  ;;  %v2009_v42 = vadd.f32 %v1979_v28, %v1933_v30  ;;  %v2055_v37 = vsel %vm1880_vm3, %v2053_v6, %v2054_v58  ;;  %v2149_v24 = vrot.slane %v2117_v62, 1  ;;  %v4563_v28 = vld [vmem:[#allocation2 + $0x30] sm:$0xff] }
 0x164   : > { %v1418_v46 = vadd.f32 %v1410_v19, %v1391_v17  ;;  %v1621_v7 = vadd.f32 %v1613_v20, %v1594_v60  ;;  %v2150_v8 = vrot.slane %v2118_v23, 1  ;;  %v2194_v35 = vmul.f32 %v4516_v49, %v4482_v63  ;;  %v4565_v23 = vld [vmem:[#allocation2 + $0x38] sm:$0x3] }
 0x165   : > { %v2225_v39 = vrot.slane %v2193_v48, 2  ;;  %v2085_v12 = vadd.f32 %v2055_v37, %v2009_v42  ;;  %v2722_v56 = vpack.c.bf16 %v2295_v47, %v2294_v59  ;;  %v1485_v21 = vmul.f32 %v5330_v43, %v1473_v61  ;;  %v5361_v43 = vld [vmem:[#allocation32_spill] sm:$0xff]  ;;  %v1575_v62 = vpop.permute.xlu0 %1574 }
 0x166   : > { %v1442_v36 = vadd.f32 %v1434_v9, %v1418_v46  ;;  %v1645_v27 = vadd.f32 %v1637_v33, %v1621_v7  ;;  %v1885_v19 = vrot.slane %v4508_v3, 2  ;;  %v2151_v30 = vsel %vm1803_vm2, %v2149_v24, %v2150_v8  ;;  %v1602_v46 = vpop.permute.xlu1 %1601 }
 0x167   : > { %v2226_v52 = vrot.slane %v2194_v35, 2  ;;  %v2105_v20 = vadd.f32 %v2097_v22, %v2085_v12  ;;  %2723 = vmatprep.subr.bf16.mxu0 %v2722_v56  ;;  %v1512_v29 = vmul.f32 %v5334_v53, %v1500_v55  ;;  %v1773_v25 = vmul.f32 %v5353_v40, %v4487_v11 }
 0x168   : > { %v1466_v38 = vadd.f32 %v1458_v41, %v1442_v36  ;;  %v1669_v9 = vadd.f32 %v1661_v57, %v1645_v27  ;;  %2725 = vmatpush3.bf16.msra.mxu0 %v2722_v56  ;;  %v1752_v33 = vmul.f32 %v5361_v43, %v4487_v11  ;;  %v1850_v3 = vmul.f32 %v5356_v1, %v4487_v11  ;;  %v4557_v57 = vld [vmem:[%s4922_s4] ss:$0 sm:$0xff] }
 0x169   : > { %v2227_v17 = vsel %vm1880_vm3, %v2225_v39, %v2226_v52  ;;  %v2181_v61 = vadd.f32 %v2151_v30, %v2105_v20  ;;  %v1807_v41 = vrot.slane %v1773_v25, 1  ;;  %v1947_v22 = vmul.f32 %v5355_v54, %v4503_v10  ;;  %v1626_v25 = vpop.permute.xlu0 %1625 }
 0x16a   : > { %v1493_v6 = vadd.f32 %v1485_v21, %v1466_v38  ;;  %v1684_v53 = vadd.f32 %v4179_v26, %v1669_v9  ;;  %v1884_v55 = vrot.slane %v1850_v3, 2  ;;  %v1948_v58 = vmul.f32 %v5355_v54, %v4482_v63 }
 0x16b   : > { %v2023_v11 = vmul.f32 %v5358_v34, %v4503_v10  ;;  %v2257_v60 = vadd.f32 %v2227_v17, %v2181_v61  ;;  %v1809_v48 = vsel %vm1803_vm2, %v1807_v41, %v1808_v51  ;;  %v1926_v59 = vmul.f32 %v5354_v45, %v4503_v10  ;;  %v1650_v61 = vpop.permute.xlu1 %1649 }
 0x16c   : > { %v1980_v47 = vrot.slane %v1947_v22, 1  ;;  %v1692_v42 = vmax.f32 %v1684_v53, 0.0  ;;  %v1520_v37 = vadd.f32 %v1512_v29, %v1493_v6  ;;  %v1837_v24 = vadd.f32 %v1809_v48, %v1752_v33 }
 0x16d   : > { %v1981_v7 = vrot.slane %v1948_v58, 1  ;;  %v2272_v8 = vadd.f32 %v4557_v57, %v2257_v60  ;;  %v1886_v35 = vsel %vm1880_vm3, %v1884_v55, %v1885_v19  ;;  %v2024_v39 = vmul.f32 %v5358_v34, %v4482_v63 }
 0x16e   : > { %v2056_v36 = vrot.slane %v2023_v11, 2  ;;  %1723 = vst.msk [vmem:[#allocation2 + $0x71] sm:$0xff] %vm1694_vm0, %v1692_v42  ;;  %v1914_v4 = vadd.f32 %v1886_v35, %v1837_v24  ;;  %v2119_v12 = vmul.f32 %v5360_v5, %v4563_v28  ;;  %v2120_v56 = vmul.f32 %v5360_v5, %v4565_v23 }
 0x16f   : > { %v1982_v51 = vsel %vm1803_vm2, %v1980_v47, %v1981_v7  ;;  %v2280_v21 = vmax.f32 %v2272_v8, 0.0  ;;  %v2057_v27 = vrot.slane %v2024_v39, 2  ;;  %v2195_v19 = vmul.f32 %v4516_v49, %v4563_v28  ;;  %v4612_v8 = vld [vmem:[#allocation2 + $0x40] sm:$0xff] }
 0x170   : > { %v2196_v30 = vmul.f32 %v4516_v49, %v4565_v23  ;;  %v1934_v52 = vadd.f32 %v1926_v59, %v1914_v4  ;;  %v2152_v38 = vrot.slane %v2119_v12, 1  ;;  %v2153_v20 = vrot.slane %v2120_v56, 1 }
 0x171   : > { %v1536_v29 = vmul.f32 %v5337_v31, %v1524_v16  ;;  %2679 = vmatprep.mubr.msk.f32.mxu0 %vm1694_vm0, %v2280_v21  ;;  %v2098_v9 = vmul.f32 %v5359_v50, %v4563_v28  ;;  %v2228_v17 = vrot.slane %v2195_v19, 2  ;;  %v1560_v3 = vmul.f32 %v5342_v0, %v1548_v44 }
 0x172   : > { %v2229_v33 = vrot.slane %v2196_v30, 2  ;;  %v2010_v6 = vadd.f32 %v1982_v51, %v1934_v52  ;;  %v2058_v41 = vsel %vm1880_vm3, %v2056_v36, %v2057_v27  ;;  %v1587_v53 = vmul.f32 %v5148_v32, %v1575_v62 }
 0x173   : > { %v1544_v22 = vadd.f32 %v1536_v29, %v1520_v37  ;;  %v2154_v55 = vsel %vm1803_vm2, %v2152_v38, %v2153_v20  ;;  %v1614_v16 = vmul.f32 %v5349_v15, %v1602_v46  ;;  %v1638_v58 = vmul.f32 %v5198_v14, %v1626_v25 }
 0x174   : > { %v2230_v31 = vsel %vm1880_vm3, %v2228_v17, %v2229_v33  ;;  %v2086_v11 = vadd.f32 %v2058_v41, %v2010_v6  ;;  %v1662_v48 = vmul.f32 %v5243_v13, %v1650_v61  ;;  %v1775_v0 = vmul.f32 %v5353_v40, %v4503_v10 }
 0x175   : > { %v1568_v60 = vadd.f32 %v1560_v3, %v1544_v22  ;;  %v1753_v44 = vmul.f32 %v5361_v43, %v4503_v10  ;;  %v1852_v32 = vmul.f32 %v5356_v1, %v4503_v10  ;;  %v1853_v62 = vmul.f32 %v5356_v1, %v4482_v63  ;;  %v4614_v63 = vld [vmem:[#allocation2 + $0x48] sm:$0x3] }
 0x176   : > { %v1949_v15 = vmul.f32 %v5355_v54, %v4563_v28  ;;  %v2106_v14 = vadd.f32 %v2098_v9, %v2086_v11  ;;  %v1810_v47 = vrot.slane %v1775_v0, 1  ;;  %v1950_v13 = vmul.f32 %v5355_v54, %v4565_v23 }
 0x177   : > { %v1595_v59 = vadd.f32 %v1587_v53, %v1568_v60  ;;  %v1887_v46 = vrot.slane %v1852_v32, 2  ;;  %v1888_v42 = vrot.slane %v1853_v62, 2  ;;  %v2025_v24 = vmul.f32 %v5358_v34, %v4563_v28  ;;  %v4652_v62 = vld [vmem:[#allocation2 + $0x50] sm:$0xff] }
 0x178   : > { %v1983_v37 = vrot.slane %v1949_v15, 1  ;;  %v2182_v7 = vadd.f32 %v2154_v55, %v2106_v14  ;;  %v1812_v35 = vsel %vm1803_vm2, %v1810_v47, %v1811_v2  ;;  %v1984_v39 = vrot.slane %v1950_v13, 1  ;;  %v4658_v13 = vld [vmem:[#allocation2 + $0x58] sm:$0x3] }
 0x179   : > { %v1622_v10 = vadd.f32 %v1614_v16, %v1595_v59  ;;  %v1838_v36 = vadd.f32 %v1812_v35, %v1753_v44  ;;  %v1889_v4 = vsel %vm1880_vm3, %v1887_v46, %v1888_v42  ;;  %v1927_v51 = vmul.f32 %v5354_v45, %v4563_v28 }
 0x17a   : > { %v2026_v12 = vmul.f32 %v5358_v34, %v4565_v23  ;;  %v2258_v56 = vadd.f32 %v2230_v31, %v2182_v7  ;;  %v1985_v27 = vsel %vm1803_vm2, %v1983_v37, %v1984_v39  ;;  %v2059_v19 = vrot.slane %v2025_v24, 2 }
 0x17b   : > { %v1646_v21 = vadd.f32 %v1638_v58, %v1622_v10  ;;  %v1915_v30 = vadd.f32 %v1889_v4, %v1838_v36  ;;  %v2121_v18 = vmul.f32 %v5360_v5, %v4612_v8  ;;  %v2122_v2 = vmul.f32 %v5360_v5, %v4614_v63 }
 0x17c   : > { %v2060_v52 = vrot.slane %v2026_v12, 2  ;;  %v2273_v38 = vadd.f32 %v4557_v57, %v2258_v56  ;;  %v2197_v29 = vmul.f32 %v4516_v49, %v4612_v8  ;;  %v2198_v25 = vmul.f32 %v4516_v49, %v4614_v63 }
 0x17d   : > { %v1670_v20 = vadd.f32 %v1662_v48, %v1646_v21  ;;  %v1935_v9 = vadd.f32 %v1927_v51, %v1915_v30  ;;  %v2099_v17 = vmul.f32 %v5359_v50, %v4612_v8  ;;  %v2155_v33 = vrot.slane %v2121_v18, 1 }
 0x17e   : > { %v2156_v3 = vrot.slane %v2122_v2, 1  ;;  %v2281_v61 = vmax.f32 %v2273_v38, 0.0  ;;  %v2231_v41 = vrot.slane %v2197_v29, 2  ;;  %v2232_v22 = vrot.slane %v2198_v25, 2 }
 0x17f   : > { %v1685_v6 = vadd.f32 %v4179_v26, %v1670_v20  ;;  %v2011_v53 = vadd.f32 %v1985_v27, %v1935_v9  ;;  %v2061_v55 = vsel %vm1880_vm3, %v2059_v19, %v2060_v52  ;;  %v1777_v16 = vmul.f32 %v5353_v40, %v4563_v28 }
 0x180   : > { %v2157_v31 = vsel %vm1803_vm2, %v2155_v33, %v2156_v3  ;;  %2680 = vmatmul.mubr.msk.f32.vlgmr.msra.gmra.mrb[0].mxu0 %vm1694_vm0, %v2281_v61  ;;  %v1754_v11 = vmul.f32 %v5361_v43, %v4563_v28  ;;  %v1778_v60 = vmul.f32 %v5353_v40, %v4565_v23  ;;  %v1854_v26 = vmul.f32 %v5356_v1, %v4563_v28 }
 0x181   : > { %v1693_v58 = vmax.f32 %v1685_v6, 0.0  ;;  %v2087_v48 = vadd.f32 %v2061_v55, %v2011_v53  ;;  %v2233_v0 = vsel %vm1880_vm3, %v2231_v41, %v2232_v22  ;;  %v1813_v44 = vrot.slane %v1777_v16, 1 }
 0x182   : > { %v1855_v32 = vmul.f32 %v5356_v1, %v4565_v23  ;;  %v1814_v15 = vrot.slane %v1778_v60, 1  ;;  %v1890_v14 = vrot.slane %v1854_v26, 2  ;;  %v1951_v59 = vmul.f32 %v5355_v54, %v4612_v8  ;;  %v4694_v26 = vld [vmem:[#allocation2 + $0x60] sm:$0xff] }
 0x183   : > { %1724 = vst.msk [vmem:[#allocation2 + $0x81] sm:$0xff] %vm1694_vm0, %v1693_v58  ;;  %v1952_v47 = vmul.f32 %v5355_v54, %v4614_v63  ;;  %v2107_v28 = vadd.f32 %v2099_v17, %v2087_v48  ;;  %v2027_v42 = vmul.f32 %v5358_v34, %v4612_v8  ;;  %v2028_v23 = vmul.f32 %v5358_v34, %v4614_v63 }
 0x184   : > { %v1891_v46 = vrot.slane %v1855_v32, 2  ;;  %v1815_v37 = vsel %vm1803_vm2, %v1813_v44, %v1814_v15  ;;  %v1928_v24 = vmul.f32 %v5354_v45, %v4612_v8  ;;  %v1986_v7 = vrot.slane %v1951_v59, 1  ;;  %v4700_v44 = vld [vmem:[#allocation2 + $0x68] sm:$0x3] }
 0x185   : > { %v1987_v10 = vrot.slane %v1952_v47, 1  ;;  %v2183_v35 = vadd.f32 %v2157_v31, %v2107_v28  ;;  %v1839_v39 = vadd.f32 %v1815_v37, %v1754_v11  ;;  %v2062_v36 = vrot.slane %v2027_v42, 2 }
 0x186   : > { %v2100_v4 = vmul.f32 %v5359_v50, %v4652_v62  ;;  %v1892_v51 = vsel %vm1880_vm3, %v1890_v14, %v1891_v46  ;;  %v2063_v12 = vrot.slane %v2028_v23, 2  ;;  %v2123_v56 = vmul.f32 %v5360_v5, %v4652_v62 }
 0x187   : > { %v2124_v21 = vmul.f32 %v5360_v5, %v4658_v13  ;;  %v2259_v27 = vadd.f32 %v2233_v0, %v2183_v35  ;;  %v1916_v19 = vadd.f32 %v1892_v51, %v1839_v39  ;;  %v2199_v30 = vmul.f32 %v4516_v49, %v4652_v62 }
 0x188   : > { %v2200_v52 = vmul.f32 %v4516_v49, %v4658_v13  ;;  %v1988_v18 = vsel %vm1803_vm2, %v1986_v7, %v1987_v10  ;;  %v2064_v2 = vsel %vm1880_vm3, %v2062_v36, %v2063_v12  ;;  %v2158_v38 = vrot.slane %v2123_v56, 1 }
 0x189   : > { %v2159_v20 = vrot.slane %v2124_v21, 1  ;;  %v2274_v29 = vadd.f32 %v4557_v57, %v2259_v27  ;;  %v1936_v25 = vadd.f32 %v1928_v24, %v1916_v19  ;;  %v2234_v9 = vrot.slane %v2199_v30, 2 }
 0x18a   : > { %v2235_v17 = vrot.slane %v2200_v52, 2  ;;  %v1755_v33 = vmul.f32 %v5361_v43, %v4612_v8  ;;  %v1779_v3 = vmul.f32 %v5353_v40, %v4612_v8  ;;  %v1780_v61 = vmul.f32 %v5353_v40, %v4614_v63 }
 0x18b   : > { %v1856_v6 = vmul.f32 %v5356_v1, %v4612_v8  ;;  %v2282_v41 = vmax.f32 %v2274_v29, 0.0  ;;  %v2012_v22 = vadd.f32 %v1988_v18, %v1936_v25  ;;  %v2160_v53 = vsel %vm1803_vm2, %v2158_v38, %v2159_v20 }
 0x18c   : > { %v1857_v55 = vmul.f32 %v5356_v1, %v4614_v63  ;;  %v2236_v31 = vsel %vm1880_vm3, %v2234_v9, %v2235_v17  ;;  %v1816_v16 = vrot.slane %v1779_v3, 1  ;;  %v1817_v58 = vrot.slane %v1780_v61, 1 }
 0x18d   : > { %v1893_v11 = vrot.slane %v1856_v6, 2  ;;  %2682 = vmatprep.mubr.msk.f32.mxu0 %vm1694_vm0, %v2282_v41  ;;  %v2088_v60 = vadd.f32 %v2064_v2, %v2012_v22  ;;  %v1953_v8 = vmul.f32 %v5355_v54, %v4652_v62  ;;  %v1954_v0 = vmul.f32 %v5355_v54, %v4658_v13 }
 0x18e   : > { %v1894_v48 = vrot.slane %v1857_v55, 2  ;;  %v1818_v63 = vsel %vm1803_vm2, %v1816_v16, %v1817_v58  ;;  %v1929_v32 = vmul.f32 %v5354_v45, %v4652_v62  ;;  %v2029_v15 = vmul.f32 %v5358_v34, %v4652_v62  ;;  %v4742_v58 = vld [vmem:[#allocation2 + $0x70] sm:$0xff] }
 0x18f   : > { %v2030_v14 = vmul.f32 %v5358_v34, %v4658_v13  ;;  %v2108_v59 = vadd.f32 %v2100_v4, %v2088_v60  ;;  %v1840_v47 = vadd.f32 %v1818_v63, %v1755_v33  ;;  %v1989_v46 = vrot.slane %v1953_v8, 1 }
 0x190   : > { %v1895_v28 = vsel %vm1880_vm3, %v1893_v11, %v1894_v48  ;;  %v1990_v42 = vrot.slane %v1954_v0, 1  ;;  %v2065_v23 = vrot.slane %v2029_v15, 2  ;;  %v2125_v24 = vmul.f32 %v5360_v5, %v4694_v26 }
 0x191   : > { %v2066_v37 = vrot.slane %v2030_v14, 2  ;;  %v2184_v7 = vadd.f32 %v2160_v53, %v2108_v59  ;;  %v1917_v10 = vadd.f32 %v1895_v28, %v1840_v47  ;;  %v2126_v35 = vmul.f32 %v5360_v5, %v4700_v44 }
 0x192   : > { %v2201_v39 = vmul.f32 %v4516_v49, %v4694_v26  ;;  %v1991_v36 = vsel %vm1803_vm2, %v1989_v46, %v1990_v42  ;;  %v2101_v4 = vmul.f32 %v5359_v50, %v4694_v26  ;;  %v2161_v51 = vrot.slane %v2125_v24, 1 }
 0x193   : > { %v2202_v12 = vmul.f32 %v4516_v49, %v4700_v44  ;;  %v2260_v56 = vadd.f32 %v2236_v31, %v2184_v7  ;;  %v1937_v21 = vadd.f32 %v1929_v32, %v1917_v10  ;;  %v2067_v27 = vsel %vm1880_vm3, %v2065_v23, %v2066_v37 }
 0x194   : > { %v2162_v19 = vrot.slane %v2126_v35, 1  ;;  %v2237_v30 = vrot.slane %v2201_v39, 2  ;;  %v1781_v18 = vmul.f32 %v5353_v40, %v4652_v62  ;;  %v1782_v2 = vmul.f32 %v5353_v40, %v4658_v13 }
 0x195   : > { %v2238_v52 = vrot.slane %v2202_v12, 2  ;;  %v2275_v38 = vadd.f32 %v4557_v57, %v2260_v56  ;;  %v2013_v20 = vadd.f32 %v1991_v36, %v1937_v21  ;;  %v1756_v29 = vmul.f32 %v5361_v43, %v4652_v62 }
 0x196   : > { %v1858_v25 = vmul.f32 %v5356_v1, %v4652_v62  ;;  %v2163_v9 = vsel %vm1803_vm2, %v2161_v51, %v2162_v19  ;;  %v1819_v17 = vrot.slane %v1781_v18, 1  ;;  %v1820_v33 = vrot.slane %v1782_v2, 1 }
 0x197   : > { %v1859_v3 = vmul.f32 %v5356_v1, %v4658_v13  ;;  %v2283_v61 = vmax.f32 %v2275_v38, 0.0  ;;  %v2089_v6 = vadd.f32 %v2067_v27, %v2013_v20  ;;  %v1930_v22 = vmul.f32 %v5354_v45, %v4694_v26  ;;  %v4744_v13 = vld [vmem:[#allocation2 + $0x78] sm:$0x3] }
 0x198   : > { %v1896_v41 = vrot.slane %v1858_v25, 2  ;;  %v1821_v53 = vsel %vm1803_vm2, %v1819_v17, %v1820_v33  ;;  %v1955_v31 = vmul.f32 %v5355_v54, %v4694_v26  ;;  %v1956_v62 = vmul.f32 %v5355_v54, %v4700_v44  ;;  %v1741_v33 = vld [vmem:[#allocation2 + $0x80] sm:$0xff] }
 0x199   : > { %v1897_v55 = vrot.slane %v1859_v3, 2  ;;  %2683 = vmatmul.mubr.msk.f32.gmra.mrb[2].mxu0 %vm1694_vm0, %v2283_v61  ;;  %v2109_v16 = vadd.f32 %v2101_v4, %v2089_v6  ;;  %v1841_v11 = vadd.f32 %v1821_v53, %v1756_v29  ;;  %v2031_v60 = vmul.f32 %v5358_v34, %v4694_v26  ;;  %v1742_v3 = vld [vmem:[#allocation2 + $0x88] sm:$0x3] }
 0x19a   : > { %v2032_v48 = vmul.f32 %v5358_v34, %v4700_v44  ;;  %v2239_v8 = vsel %vm1880_vm3, %v2237_v30, %v2238_v52  ;;  %v1992_v63 = vrot.slane %v1955_v31, 1  ;;  %v1993_v32 = vrot.slane %v1956_v62, 1 }
 0x19b   : > { %v1898_v0 = vsel %vm1880_vm3, %v1896_v41, %v1897_v55  ;;  %v2185_v15 = vadd.f32 %v2163_v9, %v2109_v16  ;;  %v2068_v59 = vrot.slane %v2031_v60, 2  ;;  %v2127_v46 = vmul.f32 %v5360_v5, %v4742_v58 }
 0x19c   : > { %v1918_v14 = vadd.f32 %v1898_v0, %v1841_v11  ;;  %v2069_v47 = vrot.slane %v2032_v48, 2  ;;  %v1994_v28 = vsel %vm1803_vm2, %v1992_v63, %v1993_v32  ;;  %v2128_v42 = vmul.f32 %v5360_v5, %v4744_v13 }
 0x19d   : > { %v2203_v23 = vmul.f32 %v4516_v49, %v4742_v58  ;;  %v2261_v37 = vadd.f32 %v2239_v8, %v2185_v15  ;;  %v2204_v7 = vmul.f32 %v4516_v49, %v4744_v13  ;;  %v2102_v35 = vmul.f32 %v5359_v50, %v4742_v58 }
 0x19e   : > { %v1938_v24 = vadd.f32 %v1930_v22, %v1918_v14  ;;  %v2070_v10 = vsel %vm1880_vm3, %v2068_v59, %v2069_v47  ;;  %v2164_v39 = vrot.slane %v2127_v46, 1  ;;  %v2165_v36 = vrot.slane %v2128_v42, 1 }
 0x19f   : > { %v2276_v4 = vadd.f32 %v4557_v57, %v2261_v37  ;;  %v2240_v12 = vrot.slane %v2203_v23, 2  ;;  %v1783_v56 = vmul.f32 %v5353_v40, %v4694_v26  ;;  %v2241_v21 = vrot.slane %v2204_v7, 2 }
 0x1a0   : > { %v2014_v51 = vadd.f32 %v1994_v28, %v1938_v24  ;;  %v1784_v27 = vmul.f32 %v5353_v40, %v4700_v44  ;;  %v1860_v19 = vmul.f32 %v5356_v1, %v4694_v26  ;;  %v1861_v30 = vmul.f32 %v5356_v1, %v4700_v44 }
 0x1a1   : > { %v2284_v52 = vmax.f32 %v2276_v4, 0.0  ;;  %v1757_v2 = vmul.f32 %v5361_v43, %v4694_v26  ;;  %v1822_v38 = vrot.slane %v1783_v56, 1  ;;  %v2166_v20 = vsel %vm1803_vm2, %v2164_v39, %v2165_v36 }
 0x1a2   : > { %v2090_v18 = vadd.f32 %v2070_v10, %v2014_v51  ;;  %v1823_v29 = vrot.slane %v1784_v27, 1  ;;  %v1899_v25 = vrot.slane %v1860_v19, 2  ;;  %v1900_v9 = vrot.slane %v1861_v30, 2 }
 0x1a3   : > { %2685 = vmatprep.mubr.msk.f32.mxu0 %vm1694_vm0, %v2284_v52  ;;  %v1957_v61 = vmul.f32 %v5355_v54, %v4742_v58  ;;  %v1958_v44 = vmul.f32 %v5355_v54, %v4744_v13  ;;  %v2033_v26 = vmul.f32 %v5358_v34, %v4742_v58  ;;  %v2242_v6 = vsel %vm1880_vm3, %v2240_v12, %v2241_v21  ;;  %v1743_v52 = vld [vmem:[#allocation2 + $0x90] sm:$0xff] }
 0x1a4   : > { %v2110_v17 = vadd.f32 %v2102_v35, %v2090_v18  ;;  %v1824_v41 = vsel %vm1803_vm2, %v1822_v38, %v1823_v29  ;;  %v1901_v22 = vsel %vm1880_vm3, %v1899_v25, %v1900_v9  ;;  %v2034_v53 = vmul.f32 %v5358_v34, %v4744_v13  ;;  %v1744_v18 = vld [vmem:[#allocation2 + $0x98] sm:$0x3] }
 0x1a5   : > { %v1842_v31 = vadd.f32 %v1824_v41, %v1757_v2  ;;  %v1995_v62 = vrot.slane %v1957_v61, 1  ;;  %v1996_v16 = vrot.slane %v1958_v44, 1  ;;  %v2071_v11 = vrot.slane %v2033_v26, 2 }
 0x1a6   : > { %v2186_v55 = vadd.f32 %v2166_v20, %v2110_v17  ;;  %v2072_v60 = vrot.slane %v2034_v53, 2  ;;  %v2129_v48 = vmul.f32 %v5360_v5, %v1741_v33  ;;  %v2130_v8 = vmul.f32 %v5360_v5, %v1742_v3 }
 0x1a7   : > { %v1919_v63 = vadd.f32 %v1901_v22, %v1842_v31  ;;  %v1931_v32 = vmul.f32 %v5354_v45, %v4742_v58  ;;  %v2205_v15 = vmul.f32 %v4516_v49, %v1741_v33  ;;  %v2103_v14 = vmul.f32 %v5359_v50, %v1741_v33 }
 0x1a8   : > { %v2262_v0 = vadd.f32 %v2242_v6, %v2186_v55  ;;  %v2167_v59 = vrot.slane %v2129_v48, 1  ;;  %v2168_v47 = vrot.slane %v2130_v8, 1  ;;  %v2206_v28 = vmul.f32 %v4516_v49, %v1742_v3 }
 0x1a9   : > { %v1939_v42 = vadd.f32 %v1931_v32, %v1919_v63  ;;  %v1997_v23 = vsel %vm1803_vm2, %v1995_v62, %v1996_v16  ;;  %v2073_v37 = vsel %vm1880_vm3, %v2071_v11, %v2072_v60  ;;  %v2243_v24 = vrot.slane %v2205_v15, 2 }
 0x1aa   : > { %v2277_v46 = vadd.f32 %v4557_v57, %v2262_v0  ;;  %v1758_v7 = vmul.f32 %v5361_v43, %v4742_v58  ;;  %v1785_v10 = vmul.f32 %v5353_v40, %v4742_v58  ;;  %v1786_v35 = vmul.f32 %v5353_v40, %v4744_v13 }
 0x1ab   : > { %v2015_v36 = vadd.f32 %v1997_v23, %v1939_v42  ;;  %v1862_v4 = vmul.f32 %v5356_v1, %v4742_v58  ;;  %v1863_v51 = vmul.f32 %v5356_v1, %v4744_v13  ;;  %v2169_v12 = vsel %vm1803_vm2, %v2167_v59, %v2168_v47  ;;  %v2466_v23 = vld [vmem:[%s4925_s7 + $0x18] sm:$0xff] }
 0x1ac   : > { %v2285_v39 = vmax.f32 %v2277_v46, 0.0  ;;  %v2244_v56 = vrot.slane %v2206_v28, 2  ;;  %v1825_v21 = vrot.slane %v1785_v10, 1  ;;  %v1826_v27 = vrot.slane %v1786_v35, 1  ;;  %v2464_v28 = vld [vmem:[%s4925_s7 + $0x8] sm:$0xff]  ;;  %v2469_v35 = vld [vmem:[%s4925_s7 + $0x30] sm:$0xff] }
 0x1ad   : > { %v2091_v43 = vadd.f32 %v2073_v37, %v2015_v36  ;;  %v1902_v19 = vrot.slane %v1862_v4, 2  ;;  %v1903_v30 = vrot.slane %v1863_v51, 2  ;;  %v1959_v40 = vmul.f32 %v5355_v54, %v1741_v33  ;;  %v2624_v51 = vld [vmem:[%s4924_s6] ss:$0 sm:$0xff] }
 0x1ae   : > { %2686 = vmatmul.mubr.msk.f32.gmra.mrb[4].mxu0 %vm1694_vm0, %v2285_v39  ;;  %v1827_v2 = vsel %vm1803_vm2, %v1825_v21, %v1826_v27  ;;  %v1960_v58 = vmul.f32 %v5355_v54, %v1742_v3  ;;  %v2035_v1 = vmul.f32 %v5358_v34, %v1741_v33  ;;  %v2036_v13 = vmul.f32 %v5358_v34, %v1742_v3  ;;  %v2470_v39 = vld [vmem:[%s4925_s7 + $0x38] sm:$0xff] }
 0x1af   : > { %v2111_v38 = vadd.f32 %v2103_v14, %v2091_v43  ;;  %v1843_v20 = vadd.f32 %v1827_v2, %v1758_v7  ;;  %v1932_v29 = vmul.f32 %v5354_v45, %v1741_v33  ;;  %v1998_v25 = vrot.slane %v1959_v40, 1  ;;  %v2468_v7 = vld [vmem:[%s4925_s7 + $0x28] sm:$0xff] }
 0x1b0   : > { %v2245_v9 = vsel %vm1880_vm3, %v2243_v24, %v2244_v56  ;;  %v1904_v17 = vsel %vm1880_vm3, %v1902_v19, %v1903_v30  ;;  %v1999_v61 = vrot.slane %v1960_v58, 1  ;;  %v2074_v44 = vrot.slane %v2035_v1, 2  ;;  %v2467_v24 = vld [vmem:[%s4925_s7 + $0x20] sm:$0xff] }
 0x1b1   : > { %v2187_v26 = vadd.f32 %v2169_v12, %v2111_v38  ;;  %v1920_v6 = vadd.f32 %v1904_v17, %v1843_v20  ;;  %v2131_v41 = vmul.f32 %v5360_v5, %v1743_v52  ;;  %v2132_v54 = vmul.f32 %v5360_v5, %v1744_v18 }
 0x1b2   : > { %v2000_v22 = vsel %vm1803_vm2, %v1998_v25, %v1999_v61  ;;  %v2075_v34 = vrot.slane %v2036_v13, 2  ;;  %v2207_v3 = vmul.f32 %v4516_v49, %v1743_v52  ;;  %v2208_v45 = vmul.f32 %v4516_v49, %v1744_v18 }
 0x1b3   : > { %v2263_v33 = vadd.f32 %v2245_v9, %v2187_v26  ;;  %v1940_v53 = vadd.f32 %v1932_v29, %v1920_v6  ;;  %v2170_v55 = vrot.slane %v2131_v41, 1  ;;  %v2171_v31 = vrot.slane %v2132_v54, 1 }
 0x1b4   : > { %v2104_v11 = vmul.f32 %v5359_v50, %v1743_v52  ;;  %v2076_v60 = vsel %vm1880_vm3, %v2074_v44, %v2075_v34  ;;  %v2246_v48 = vrot.slane %v2207_v3, 2  ;;  %v2247_v5 = vrot.slane %v2208_v45, 2  ;;  %v2463_v50 = vld [vmem:[%s4925_s7] sm:$0xff] }
 0x1b5   : > { %v2278_v62 = vadd.f32 %v4557_v57, %v2263_v33  ;;  %v2016_v16 = vadd.f32 %v2000_v22, %v1940_v53  ;;  %v2172_v63 = vsel %vm1803_vm2, %v2170_v55, %v2171_v31  ;;  %v2727_v46 = vpack.c.bf16 %v2464_v28, %v2463_v50 }
 0x1b6   : > { %v2248_v32 = vsel %vm1880_vm3, %v2246_v48, %v2247_v5  ;;  %v2845_v42 = vmov 0.0|0.0   ;;  %v2733_v10 = vpack.c.bf16 %v2468_v7, %v2467_v24  ;;  %v5362_v36 = vmov 0.0  }
 0x1b7   : > { %v2286_v8 = vmax.f32 %v2278_v62, 0.0  ;;  %v2092_v0 = vadd.f32 %v2076_v60, %v2016_v16  ;;  %2726 = vmatprep.subr.bf16.mxu1 %v2845_v42  ;;  %2707 = vmatprep.mubr.msk.f32.mxu1 %vm2846_vm4, %v5362_v36  ;;  %v2736_v4 = vpack.c.bf16 %v2470_v39, %v2469_v35 }
 0x1b8   : > { %2728 = vmatpush3.bf16.msra.mxu1 %v2727_v46 }
 0x1b9   : > { %2688 = vmatprep.mubr.msk.f32.mxu0 %vm1694_vm0, %v2286_v8  ;;  %v2112_v49 = vadd.f32 %v2104_v11, %v2092_v0  ;;  %2729 = vmatprep.subr.bf16.mxu1 %v2845_v42 }
 0x1bb   : > { %v2188_v15 = vadd.f32 %v2172_v63, %v2112_v49 }
 0x1bd   : > { %v2264_v14 = vadd.f32 %v2248_v32, %v2188_v15 }
 0x1bf   : > { %v2279_v59 = vadd.f32 %v4557_v57, %v2264_v14  ;;  %v2465_v57 = vld [vmem:[%s4925_s7 + $0x10] sm:$0xff]  ;;  %v2471_v14 = vld [vmem:[%s4926_s8] sm:$0x1] }
 0x1c0   : > { %v2730_v37 = vpack.c.bf16 %v2466_v23, %v2465_v57 }
 0x1c1   : > { %v2287_v47 = vmax.f32 %v2279_v59, 0.0 }
 0x1c2   : > { %2731 = vmatpush3.bf16.msra.mxu1 %v2730_v37 }
 0x1c3   : > { %2689 = vmatmul.mubr.msk.f32.gmra.mrb[6].mxu0 %vm1694_vm0, %v2287_v47  ;;  %2732 = vmatprep.subr.bf16.mxu1 %v2845_v42 }
 0x1c6   : > { %2734 = vmatpush3.bf16.msra.mxu1 %v2733_v10 }
 0x1c7   : > { %2735 = vmatprep.subr.bf16.mxu1 %v2845_v42 }
 0x1ca   : > { %2737 = vmatpush3.bf16.msra.mxu1 %v2736_v4 }
 0x253   : > { %v2681_v12 = vpop.f32.mrb[0].mxu0 }
 0x254   : > { %v2399_v56 = vadd.f32 %v2681_v12, %v2624_v51  ;;  %v2393_v21 = vpop.f32.mrb[1].mxu0 }
 0x255   : > { %v2394_v27 = vadd.f32 %v2624_v51, %v2393_v21 }
 0x256   : > { %v2433_v43 = vmax.f32 %v2399_v56, 0.0 }
 0x257   : > { %v2432_v19 = vmax.f32 %v2394_v27, 0.0 }
 0x258   : > { %v2441_v30 = vsel %vm1694_vm0, %v2433_v43, 0.0 }
 0x259   : > { %v2440_v40 = vsel %vm1694_vm0, %v2432_v19, 0.0 }
 0x25a   : > { %v2442_v52 = vadd.f32 %v2441_v30, %v2440_v40 }
 0x26c   : > { %v2684_v18 = vpop.f32.mrb[2].mxu0 }
 0x26d   : > { %v2409_v2 = vadd.f32 %v2684_v18, %v2624_v51  ;;  %v2403_v58 = vpop.f32.mrb[3].mxu0 }
 0x26e   : > { %v2404_v1 = vadd.f32 %v2624_v51, %v2403_v58 }
 0x26f   : > { %v2435_v13 = vmax.f32 %v2409_v2, 0.0 }
 0x270   : > { %v2434_v38 = vmax.f32 %v2404_v1, 0.0 }
 0x271   : > { %v2445_v25 = vsel %vm1694_vm0, %v2435_v13, 0.0 }
 0x272   : > { %v2443_v20 = vsel %vm1694_vm0, %v2434_v38, 0.0 }
 0x273   : > { %v2444_v29 = vadd.f32 %v2443_v20, %v2442_v52 }
 0x275   : > { %v2446_v9 = vadd.f32 %v2445_v25, %v2444_v29 }
 0x281   : > { %v2687_v17 = vpop.f32.mrb[4].mxu0 }
 0x282   : > { %v2419_v61 = vadd.f32 %v2687_v17, %v2624_v51  ;;  %v2413_v44 = vpop.f32.mrb[5].mxu0 }
 0x283   : > { %v2414_v26 = vadd.f32 %v2624_v51, %v2413_v44 }
 0x284   : > { %v2437_v6 = vmax.f32 %v2419_v61, 0.0 }
 0x285   : > { %v2436_v41 = vmax.f32 %v2414_v26, 0.0 }
 0x286   : > { %v2449_v34 = vsel %vm1694_vm0, %v2437_v6, 0.0 }
 0x287   : > { %v2447_v54 = vsel %vm1694_vm0, %v2436_v41, 0.0 }
 0x288   : > { %v2448_v22 = vadd.f32 %v2447_v54, %v2446_v9 }
 0x28a   : > { %v2450_v3 = vadd.f32 %v2449_v34, %v2448_v22 }
 0x296   : > { %v2690_v45 = vpop.f32.mrb[6].mxu0 }
 0x297   : > { %v2429_v33 = vadd.f32 %v2690_v45, %v2624_v51  ;;  %v2423_v53 = vpop.f32.mrb[7].mxu0 }
 0x298   : > { %v2424_v55 = vadd.f32 %v2624_v51, %v2423_v53 }
 0x299   : > { %v2439_v31 = vmax.f32 %v2429_v33, 0.0 }
 0x29a   : > { %v2438_v62 = vmax.f32 %v2424_v55, 0.0 }
 0x29b   : > { %v2453_v60 = vsel %vm1694_vm0, %v2439_v31, 0.0 }
 0x29c   : > { %v2451_v16 = vsel %vm1694_vm0, %v2438_v62, 0.0 }
 0x29d   : > { %v2452_v11 = vadd.f32 %v2451_v16, %v2450_v3 }
 0x29f   : > { %v2454_v48 = vadd.f32 %v2453_v60, %v2452_v11 }
 0x2a1   : > { %v2455_v5 = vrot.slane %v2454_v48, 4 }
 0x2a3   : > { %v2456_v8 = vadd.f32 %v2455_v5, %v2454_v48 }
 0x2a5   : > { %v2457_v0 = vrot.slane %v2456_v8, 2 }
 0x2a7   : > { %v2458_v63 = vadd.f32 %v2457_v0, %v2456_v8 }
 0x2a9   : > { %v2459_v49 = vrot.slane %v2458_v63, 1 }
 0x2ab   : > { %v2460_v32 = vadd.f32 %v2459_v49, %v2458_v63 }
 0x2ad   : > { %v2462_v15 = vmul.f32 0.015625, %v2460_v32 }
 0x2af   : > { %2708 = vmatmul.mubr.msk.f32.vlgmr.msra.gmra.mrb[0].mxu1 %vm1694_vm0, %v2462_v15 }
 0x382   : > { %v2541_v59 = vpop.f32.mrb[0].mxu1 }
 0x383   : > { %v2542_v47 = vadd.f32 %v2541_v59, %v2471_v14  ;;  %v2709_v50 = vpop.f32.mrb[1].mxu1 }
 0x385   : > { %2546 = vst.msk [vmem:[%s324_s22] sm:$0x1] %vm2545_vm5, %v2542_v47 }
 0x386   : > { %2793 = shalt.err (!%p2790_p3)
}
 0x387   : > { %s2794_s14 = scalar_lea.hbm %s4876_s26, 16  ;;  %s2798_s22 = scalar_lea.hbm %s4927_s9, 32 }
 0x388   : > { %p2795_p4 = scmp.ne.s32.totalorder %s4876_s26, %s2794_s14  ;;  %p2799_p9 = scmp.lt.u32.totalorder %s4876_s26, %s4927_s9 }
 0x389   : > { %p2800_p10 = scmp.lt.u32.totalorder %s2798_s22, %s2794_s14  ;;  %p2802_p12 = scmp.lt.u32.totalorder %s2794_s14, %s4876_s26 }
 0x38a   : > { %p2796_p7 = pnand %p2795_p4, %p2936_p5 }
 0x38b   : > { %p2801_p11 = por %p2800_p10, %p2799_p9 }
 0x38c   : > { %p2797_p8 = pneg %p2796_p7 }
 0x38d   : > { %p2803_p13 = por %p2802_p12, %p2801_p11 }
 0x38f   : > { %p2804_p0 = pnand %p2803_p13, %p2797_p8 }
 0x391   : > { %2807 = shalt.err (!%p2804_p0)
}
 0x392   : > { %2738 = dma.vmem_to_hbm [thread:$0]  (%p2936_p5), %s4878_s23, 16, %s4876_s26, %s2548_s27  }
 0x393 PF: > { %p2744_p1 = scmp.ge.s32.totalorder %s2842_s12, 2  ;;  %s2572_s28 = sand.u32 1, %s2830_s30  }
 0x394   : > { %s2573_s13 = scalar_lea.sflag [#allocation4], %s2572_s28 }
 0x395   : > { %p2741_p2 = pnand %p2744_p1, %p2940_p6 }
 0x397   : > { %2825 = dma.done.wait (!%p2741_p2), %s2573_s13, 16  }
 0x398   : > { %2827 = vsyncadd (!%p2741_p2), %s2573_s13, 4294967280  ;;  %p19_p3 = scmp.ge.s32.totalorder %s2923_s15, 4   ;;  %s5363_s30 = smov %s2834_s10 }
 0x399   : > { %s5364_s10 = smov %s2838_s11  ;;  %s5365_s11 = smov %s2934_s18 }
 0x39a   : > { %s5366_s12 = smov %s2923_s15  ;;  %21 = sbr.rel (!%p19_p3) target bundleno = 3 (0x3), region = 92 }
 0x3a1   :  { %2577 = vsyncpa [#allocation4], 1 }
 0x3a2   :  { %2579 = vsyncpa [#allocation4 + $0x1], 1 }

</bundles_post_ra>
